<compile_context>
chip_gen: v6e
topology: v6e:2x2x1
jax: 0.10.0
libtpu: 0.0.40
codegen_flags: <defaults>
</compile_context>

<pallas_src>
import functools
import math

import jax
import jax.numpy as jnp
from jax.experimental import pallas as pl
from jax.experimental.pallas import tpu as pltpu


def _decoder_block_kernel(num_heads, block_b, T, Te,
                          valid_ref,                    # SMEM (B,) int32 enc_valid_lens
                          x_ref, enc_ref,
                          wqkv1, wo1, ln1g, ln1b,
                          wq2, wkv2, wo2, ln2g, ln2b,
                          fw1, fb1, fw2, fb2, ln3g, ln3b,
                          out_ref):
    f32 = jnp.float32
    nh = num_heads
    R, H = x_ref.shape            # R  = block_b * T   (row-fused decoder rows)
    Re = enc_ref.shape[0]         # Re = block_b * Te  (row-fused encoder rows)
    hd = H // nh
    NB = nh * block_b             # batched-attention leading dim
    scale = 1.0 / math.sqrt(hd)
    dot_dtype = wqkv1.dtype       # bf16 when the wrapper down-casts MXU operands

    x2d = x_ref[...]              # (R, H)
    enc2d = enc_ref[...]          # (Re, H)

    # ---- masks -------------------------------------------------------------
    # Self-attention: causal (dec_valid_lens = 1..T), shared by every (head, b).
    r_ids = jax.lax.broadcasted_iota(jnp.int32, (T, T), 0)
    c_ids = jax.lax.broadcasted_iota(jnp.int32, (T, T), 1)
    causal_mask = (c_ids <= r_ids)[None]                  # (1, T, T), broadcasts over NB

    # Cross-attention: key position < enc_valid_lens[b]; block_b SMEM scalar
    # reads + ONE vector compare (no O(block_b * R * Re) vector work).
    b0 = pl.program_id(0) * block_b
    key_pos = jax.lax.broadcasted_iota(jnp.int32, (1, 1, Te), 2)
    if block_b == 1:
        cross_b = key_pos < valid_ref[b0]                 # (1, 1, Te)
    else:
        vl = jnp.concatenate(
            [jnp.full((1, 1, 1), valid_ref[b0 + bb], jnp.int32)
             for bb in range(block_b)], axis=0)           # (block_b, 1, 1)
        cross_b = key_pos < vl                            # (block_b, 1, Te)
    cross_mask = jnp.broadcast_to(cross_b[None],
                                  (nh, block_b, 1, Te)).reshape(NB, 1, Te)

    def layer_norm(v, g, b):
        mu = jnp.mean(v, axis=-1, keepdims=True)
        var = jnp.mean((v - mu) * (v - mu), axis=-1, keepdims=True)
        return (v - mu) * jax.lax.rsqrt(var + 1e-5) * g.astype(f32) + b.astype(f32)

    def split_heads(a2d, bsz, seq):
        # (bsz*seq, H) -> (nh*bsz, seq, hd), batch index g = h*bsz + b.
        # Pure data movement (static lane slices + leading-dim concat); the
        # projections themselves stay one lane-dense 2-D matmul each.
        a3 = a2d.reshape(bsz, seq, H)
        parts = [a3[None, :, :, h * hd:(h + 1) * hd] for h in range(nh)]
        a4 = parts[0] if nh == 1 else jnp.concatenate(parts, axis=0)   # (nh,bsz,seq,hd)
        return a4.reshape(nh * bsz, seq, hd)

    def attention(q_nb, k_nb, v_nb, wo_heads, mask, bsz):
        # q_nb: (NB, Tq, hd); k_nb/v_nb: (NB, Tk, hd); mask broadcastable to scores.
        Tq = q_nb.shape[1]
        scores = jax.lax.dot_general(
            q_nb.astype(dot_dtype), k_nb.astype(dot_dtype),
            (((2,), (2,)), ((0,), (0,))),
            preferred_element_type=f32) * scale           # (NB, Tq, Tk)
        scores = jnp.where(mask, scores, -1e6)
        m = jnp.max(scores, axis=-1, keepdims=True)
        e = jnp.exp(scores - m)
        attn = e * pl.reciprocal(jnp.sum(e, axis=-1, keepdims=True), approx=True)
        o = jax.lax.dot_general(
            attn.astype(dot_dtype), v_nb.astype(dot_dtype),
            (((2,), (1,)), ((0,), (0,))),
            preferred_element_type=f32)                   # (NB, Tq, hd)
        o_h = o.reshape(nh, bsz * Tq, hd)                 # leading-dim reshape only
        # concat(heads) @ Wo == sum_h head_h @ Wo[h*hd:(h+1)*hd, :]  (no lane concat)
        # TODO(synk): for large R, accumulate head partials into an (R, H) scratch
        # instead of materializing the (nh, R, H) f32 tensor (v7x VMEM headroom).
        parts = jax.lax.dot_general(
            o_h.astype(dot_dtype), wo_heads,
            (((2,), (1,)), ((0,), (0,))),
            preferred_element_type=f32)                   # (nh, R, H)
        return jnp.sum(parts, axis=0)                     # (R, H) f32

    # ---- self-attention: one lane-dense fused QKV matmul + add & norm ----
    x_mm = x2d.astype(dot_dtype)
    qkv = jnp.dot(x_mm, wqkv1[...], preferred_element_type=f32)       # (R, 3H)
    qkv = qkv.astype(dot_dtype)
    q_nb = split_heads(qkv[:, 0:H], block_b, T)
    k_nb = split_heads(qkv[:, H:2 * H], block_b, T)
    v_nb = split_heads(qkv[:, 2 * H:3 * H], block_b, T)
    x2 = attention(q_nb, k_nb, v_nb, wo1[...], causal_mask, block_b)
    y = layer_norm(x2 + x2d.astype(f32), ln1g[...], ln1b[...])

    # ---- cross-attention: lane-dense Q and fused K|V matmuls + add & norm ----
    y_mm = y.astype(dot_dtype)
    enc_mm = enc2d.astype(dot_dtype)
    q2 = jnp.dot(y_mm, wq2[...], preferred_element_type=f32).astype(dot_dtype)      # (R, H)
    kv2 = jnp.dot(enc_mm, wkv2[...], preferred_element_type=f32).astype(dot_dtype)  # (Re, 2H)
    q2_nb = split_heads(q2, block_b, T)
    k2_nb = split_heads(kv2[:, 0:H], block_b, Te)
    v2_nb = split_heads(kv2[:, H:2 * H], block_b, Te)
    y2 = attention(q2_nb, k2_nb, v2_nb, wo2[...], cross_mask, block_b)
    z = layer_norm(y2 + y, ln2g[...], ln2b[...])

    # ---- position-wise FFN: row-fused (R, H) matmuls ----
    z_mm = z.astype(dot_dtype)
    h1 = jnp.dot(z_mm, fw1[...], preferred_element_type=f32) + fb1[...].astype(f32)
    h1 = jnp.maximum(h1, 0.0)
    ffn = (jnp.dot(h1.astype(dot_dtype), fw2[...], preferred_element_type=f32)
           + fb2[...].astype(f32))
    out = layer_norm(ffn + z, ln3g[...], ln3b[...])

    # TODO(synk): for production H < 128 this (R, H) store is lane-masked; a
    # lane-dense (block_b, T*H) output slab would avoid vst.msk but needs a
    # mid-kernel minor-dim reshape.  H >= 128 (typical) needs no change.
    out_ref[...] = out.astype(out_ref.dtype)


def decoder_block_forward(X, enc_outputs, enc_valid_lens, params, num_heads,
                          block_b=None, use_bf16_matmul=True):
    B, T, H = X.shape
    _, Te, _ = enc_outputs.shape
    F = params["fw1"].shape[1]
    nh = num_heads
    hd = H // nh
    assert H % nh == 0

    # Batch-block size: make the "parallel" grid axis real (>= 2 steps for
    # megacore) while bounding per-step VMEM.  Sub-batch blocks need their
    # row counts to be sublane-friendly (multiples of 8); otherwise fall back
    # to one full-batch block (full-extent blocks are always legal).
    if block_b is None:
        if B >= 2 and B % 2 == 0 and T % 8 == 0 and Te % 8 == 0:
            block_b = B // 2
            while block_b > 1 and block_b % 2 == 0 and block_b * T > 1024:
                block_b //= 2
        else:
            block_b = B
    assert B % block_b == 0, "block_b must divide the batch size"
    num_blocks = B // block_b
    R = block_b * T
    Re = block_b * Te

    f32 = jnp.float32
    dot_dtype = jnp.bfloat16 if (use_bf16_matmul and X.dtype == jnp.float32) else X.dtype
    p = params

    # Fused, MXU-dtype weights: QKV (H, 3H) and cross K|V (H, 2H) -> single
    # lane-dense matmuls; Wo regrouped (nh, hd, H) for head-partial projection.
    wqkv1 = jnp.concatenate([p["wq1"], p["wk1"], p["wv1"]], axis=1).astype(dot_dtype)
    wo1 = p["wo1"].reshape(nh, hd, H).astype(dot_dtype)
    wq2 = p["wq2"].astype(dot_dtype)
    wkv2 = jnp.concatenate([p["wk2"], p["wv2"]], axis=1).astype(dot_dtype)
    wo2 = p["wo2"].reshape(nh, hd, H).astype(dot_dtype)
    fw1 = p["fw1"].astype(dot_dtype)
    fw2 = p["fw2"].astype(dot_dtype)
    fb1 = p["fb1"].astype(f32)
    fb2 = p["fb2"].astype(f32)
    ln1g, ln1b = p["ln1g"].astype(f32), p["ln1b"].astype(f32)
    ln2g, ln2b = p["ln2g"].astype(f32), p["ln2b"].astype(f32)
    ln3g, ln3b = p["ln3g"].astype(f32), p["ln3b"].astype(f32)

    # Row-fused activations presented to the kernel as 2-D slabs (free in HBM).
    X2 = X.reshape(B * T, H)
    E2 = enc_outputs.reshape(B * Te, H)

    kernel = functools.partial(_decoder_block_kernel, nh, block_b, T, Te)

    def make_call(single_buffer_weights):
        def wspec(shape):
            zeros = (0,) * len(shape)
            if single_buffer_weights:
                # Grid-invariant weights: one VMEM buffer instead of two.
                return pl.BlockSpec(shape, lambda i, v: zeros,
                                    pipeline_mode=pl.Buffered(1))
            return pl.BlockSpec(shape, lambda i, v: zeros)

        in_specs = [
            pl.BlockSpec((R, H), lambda i, v: (i, 0)),     # decoder rows
            pl.BlockSpec((Re, H), lambda i, v: (i, 0)),    # encoder rows
            wspec((H, 3 * H)),                             # fused Wq|Wk|Wv (self)
            wspec((nh, hd, H)),                            # Wo (self)
            wspec((1, H)), wspec((1, H)),                  # LN1
            wspec((H, H)),                                 # Wq (cross)
            wspec((H, 2 * H)),                             # fused Wk|Wv (cross)
            wspec((nh, hd, H)),                            # Wo (cross)
            wspec((1, H)), wspec((1, H)),                  # LN2
            wspec((H, F)), wspec((1, F)),                  # FFN dense1
            wspec((F, H)), wspec((1, H)),                  # FFN dense2
            wspec((1, H)), wspec((1, H)),                  # LN3
        ]
        grid_spec = pltpu.PrefetchScalarGridSpec(
            num_scalar_prefetch=1,
            grid=(num_blocks,),
            in_specs=in_specs,
            out_specs=pl.BlockSpec((R, H), lambda i, v: (i, 0)),
        )
        return pl.pallas_call(
            kernel,
            out_shape=jax.ShapeDtypeStruct((B * T, H), X.dtype),
            grid_spec=grid_spec,
            compiler_params=pltpu.CompilerParams(
                dimension_semantics=("parallel",),   # batch blocks are independent
                vmem_limit_bytes=32 * 1024 * 1024,   # safe on v7x; raise for big v6e tiles
            ),
        )

    args = (enc_valid_lens.astype(jnp.int32), X2, E2,
            wqkv1, wo1, ln1g, ln1b,
            wq2, wkv2, wo2, ln2g, ln2b,
            fw1, fb1, fw2, fb2, ln3g, ln3b)
    try:
        out2d = make_call(True)(*args)
    except Exception:
        # pl.Buffered(1) single-buffering not accepted on this JAX/Mosaic
        # version -> fall back to default (double) buffering of the weights.
        out2d = make_call(False)(*args)
    return out2d.reshape(B, T, H)


# ---------------- pure-JAX reference (mirrors the PyTorch math) ----------------
def reference_forward(X, enc_outputs, enc_valid_lens, params, num_heads):
    B, T, H = X.shape
    Te = enc_outputs.shape[1]
    hd = H // num_heads

    def mha(q_in, kv_in, wq, wk, wv, wo, mask):   # mask: (B, Tq, Tk) bool
        def split(a):
            return a.reshape(a.shape[0], a.shape[1], num_heads, hd).transpose(0, 2, 1, 3)
        qh, kh, vh = split(q_in @ wq), split(kv_in @ wk), split(kv_in @ wv)
        scores = jnp.einsum('bhqd,bhkd->bhqk', qh, kh) / math.sqrt(hd)
        scores = jnp.where(mask[:, None, :, :], scores, -1e6)
        attn = jax.nn.softmax(scores, axis=-1)
        out = jnp.einsum('bhqk,bhkd->bhqd', attn, vh)
        out = out.transpose(0, 2, 1, 3).reshape(B, q_in.shape[1], H)
        return out @ wo

    def ln(x, g, b):
        mu = jnp.mean(x, axis=-1, keepdims=True)
        var = jnp.mean((x - mu) ** 2, axis=-1, keepdims=True)
        return (x - mu) / jnp.sqrt(var + 1e-5) * g + b

    p = params
    rows = jnp.arange(T)[:, None]
    causal = jnp.broadcast_to(jnp.arange(T)[None, :] <= rows, (B, T, T))
    cross = jnp.arange(Te)[None, None, :] < enc_valid_lens[:, None, None]
    cross = jnp.broadcast_to(cross, (B, T, Te))

    x2 = mha(X, X, p["wq1"], p["wk1"], p["wv1"], p["wo1"], causal)
    y = ln(x2 + X, p["ln1g"], p["ln1b"])
    y2 = mha(y, enc_outputs, p["wq2"], p["wk2"], p["wv2"], p["wo2"], cross)
    z = ln(y2 + y, p["ln2g"], p["ln2b"])
    h1 = jnp.maximum(z @ p["fw1"] + p["fb1"], 0.0)
    ffn_out = h1 @ p["fw2"] + p["fb2"]
    return ln(ffn_out + z, p["ln3g"], p["ln3b"])


if __name__ == "__main__":
    B, T, Te, H, NH, F = 2, 8, 16, 32, 4, 64   # batch, dec seq, enc seq, hidden, heads, ffn

    key = jax.random.PRNGKey(0)
    keys = jax.random.split(key, 24)
    ki = iter(keys)

    def w(shape, scale=0.1):
        return jax.random.normal(next(ki), shape, jnp.float32) * scale

    params = {
        "wq1": w((H, H)), "wk1": w((H, H)), "wv1": w((H, H)), "wo1": w((H, H)),
        "ln1g": 1.0 + w((1, H), 0.05), "ln1b": w((1, H), 0.05),
        "wq2": w((H, H)), "wk2": w((H, H)), "wv2": w((H, H)), "wo2": w((H, H)),
        "ln2g": 1.0 + w((1, H), 0.05), "ln2b": w((1, H), 0.05),
        "fw1": w((H, F)), "fb1": w((1, F), 0.05),
        "fw2": w((F, H)), "fb2": w((1, H), 0.05),
        "ln3g": 1.0 + w((1, H), 0.05), "ln3b": w((1, H), 0.05),
    }

    X = jax.random.normal(next(ki), (B, T, H), jnp.float32)
    enc_outputs = jax.random.normal(next(ki), (B, Te, H), jnp.float32)
    enc_valid_lens = jnp.array([5, 16], dtype=jnp.int32)

    out = decoder_block_forward(X, enc_outputs, enc_valid_lens, params, NH)
    out = jax.block_until_ready(out)

    ref = reference_forward(X, enc_outputs, enc_valid_lens, params, NH)
    assert out.shape == (B, T, H)
    # tolerance covers bf16 MXU operands (f32 accumulation) + EUP approx reciprocal
    max_err = jnp.max(jnp.abs(out - ref))
    assert jnp.allclose(out, ref, atol=5e-2, rtol=5e-2), f"mismatch: max abs err {max_err}"

    print("KERNEL_OK")
</pallas_src>

<mosaic_0001>
module attributes {stable_mosaic.version = 11 : i64} {
  func.func @_decoder_block_kernel(%arg0: i32, %arg1: memref<2xi32, #tpu.memory_space<smem>>, %arg2: memref<8x32xf32, #tpu.memory_space<vmem>>, %arg3: memref<16x32xf32, #tpu.memory_space<vmem>>, %arg4: memref<32x96xbf16, #tpu.memory_space<vmem>>, %arg5: memref<4x8x32xbf16, #tpu.memory_space<vmem>>, %arg6: memref<1x32xf32, #tpu.memory_space<vmem>>, %arg7: memref<1x32xf32, #tpu.memory_space<vmem>>, %arg8: memref<32x32xbf16, #tpu.memory_space<vmem>>, %arg9: memref<32x64xbf16, #tpu.memory_space<vmem>>, %arg10: memref<4x8x32xbf16, #tpu.memory_space<vmem>>, %arg11: memref<1x32xf32, #tpu.memory_space<vmem>>, %arg12: memref<1x32xf32, #tpu.memory_space<vmem>>, %arg13: memref<32x64xbf16, #tpu.memory_space<vmem>>, %arg14: memref<1x64xf32, #tpu.memory_space<vmem>>, %arg15: memref<64x32xbf16, #tpu.memory_space<vmem>>, %arg16: memref<1x32xf32, #tpu.memory_space<vmem>>, %arg17: memref<1x32xf32, #tpu.memory_space<vmem>>, %arg18: memref<1x32xf32, #tpu.memory_space<vmem>>, %arg19: memref<8x32xf32, #tpu.memory_space<vmem>>) attributes {dimension_semantics = [#tpu.dimension_semantics<parallel>], iteration_bounds = array<i64: 2>, scalar_prefetch = 1 : i64, scratch_operands = 0 : i64, tpu.core_type = #tpu.core_type<tc>, window_params = [{transform_indices = @transform_0, window_bounds = array<i64: 8, 32>}, {transform_indices = @transform_1, window_bounds = array<i64: 16, 32>}, {pipeline_mode = #tpu.pipeline_mode<synchronous>, transform_indices = @transform_2, window_bounds = array<i64: 32, 96>}, {pipeline_mode = #tpu.pipeline_mode<synchronous>, transform_indices = @transform_3, window_bounds = array<i64: 4, 8, 32>}, {pipeline_mode = #tpu.pipeline_mode<synchronous>, transform_indices = @transform_4, window_bounds = array<i64: 1, 32>}, {pipeline_mode = #tpu.pipeline_mode<synchronous>, transform_indices = @transform_5, window_bounds = array<i64: 1, 32>}, {pipeline_mode = #tpu.pipeline_mode<synchronous>, transform_indices = @transform_6, window_bounds = array<i64: 32, 32>}, {pipeline_mode = #tpu.pipeline_mode<synchronous>, transform_indices = @transform_7, window_bounds = array<i64: 32, 64>}, {pipeline_mode = #tpu.pipeline_mode<synchronous>, transform_indices = @transform_8, window_bounds = array<i64: 4, 8, 32>}, {pipeline_mode = #tpu.pipeline_mode<synchronous>, transform_indices = @transform_9, window_bounds = array<i64: 1, 32>}, {pipeline_mode = #tpu.pipeline_mode<synchronous>, transform_indices = @transform_10, window_bounds = array<i64: 1, 32>}, {pipeline_mode = #tpu.pipeline_mode<synchronous>, transform_indices = @transform_11, window_bounds = array<i64: 32, 64>}, {pipeline_mode = #tpu.pipeline_mode<synchronous>, transform_indices = @transform_12, window_bounds = array<i64: 1, 64>}, {pipeline_mode = #tpu.pipeline_mode<synchronous>, transform_indices = @transform_13, window_bounds = array<i64: 64, 32>}, {pipeline_mode = #tpu.pipeline_mode<synchronous>, transform_indices = @transform_14, window_bounds = array<i64: 1, 32>}, {pipeline_mode = #tpu.pipeline_mode<synchronous>, transform_indices = @transform_15, window_bounds = array<i64: 1, 32>}, {pipeline_mode = #tpu.pipeline_mode<synchronous>, transform_indices = @transform_16, window_bounds = array<i64: 1, 32>}, {transform_indices = @transform_17, window_bounds = array<i64: 8, 32>}]} {
    %c0 = arith.constant 0 : index
    %c0_0 = arith.constant 0 : index
    %0 = vector.load %arg2[%c0, %c0_0] : memref<8x32xf32, #tpu.memory_space<vmem>>, vector<8x32xf32>
    %c0_1 = arith.constant 0 : index
    %c0_2 = arith.constant 0 : index
    %1 = vector.load %arg3[%c0_1, %c0_2] : memref<16x32xf32, #tpu.memory_space<vmem>>, vector<16x32xf32>
    %2 = tpu.iota {dimensions = array<i32: 0>} : vector<8x8xi32>
    %3 = tpu.iota {dimensions = array<i32: 1>} : vector<8x8xi32>
    %4 = arith.cmpi sle, %3, %2 : vector<8x8xi32>
    %5 = vector.shape_cast %4 : vector<8x8xi1> to vector<1x8x8xi1>
    %c1_i32 = arith.constant 1 : i32
    %6 = arith.muli %arg0, %c1_i32 : i32
    %7 = tpu.iota {dimensions = array<i32: 2>} : vector<1x1x16xi32>
    %8 = arith.index_cast %6 : i32 to index
    %9 = memref.load %arg1[%8] : memref<2xi32, #tpu.memory_space<smem>>
    %10 = vector.broadcast %9 : i32 to vector<1x1x16xi32>
    %11 = arith.cmpi slt, %7, %10 : vector<1x1x16xi32>
    %12 = vector.shape_cast %11 : vector<1x1x16xi1> to vector<1x1x1x16xi1>
    %13 = vector.shape_cast %12 : vector<1x1x1x16xi1> to vector<1x1x1x16xi1>
    %14 = vector.broadcast %13 : vector<1x1x1x16xi1> to vector<4x1x1x16xi1>
    %15 = vector.shape_cast %14 : vector<4x1x1x16xi1> to vector<4x1x16xi1>
    %16 = arith.truncf %0 : vector<8x32xf32> to vector<8x32xbf16>
    %c0_3 = arith.constant 0 : index
    %c0_4 = arith.constant 0 : index
    %17 = vector.load %arg4[%c0_3, %c0_4] : memref<32x96xbf16, #tpu.memory_space<vmem>>, vector<32x96xbf16>
    %cst = arith.constant dense<0.000000e+00> : vector<8x96xf32>
    %18 = tpu.matmul %16, %17, %cst {dimension_numbers = #tpu.dot_dimension_numbers<[1], [0], [0], [1], [0, 0, 1, 1], [], []>} : vector<8x32xbf16>, vector<32x96xbf16>, vector<8x96xf32> -> vector<8x96xf32>
    %19 = arith.truncf %18 : vector<8x96xf32> to vector<8x96xbf16>
    %20 = vector.extract_strided_slice %19 {offsets = [0, 0], sizes = [8, 32], strides = [1, 1]} : vector<8x96xbf16> to vector<8x32xbf16>
    %21 = vector.shape_cast %20 : vector<8x32xbf16> to vector<1x8x32xbf16>
    %22 = vector.extract_strided_slice %21 {offsets = [0, 0, 0], sizes = [1, 8, 8], strides = [1, 1, 1]} : vector<1x8x32xbf16> to vector<1x8x8xbf16>
    %23 = vector.shape_cast %22 : vector<1x8x8xbf16> to vector<1x1x8x8xbf16>
    %24 = vector.extract_strided_slice %21 {offsets = [0, 0, 8], sizes = [1, 8, 8], strides = [1, 1, 1]} : vector<1x8x32xbf16> to vector<1x8x8xbf16>
    %25 = vector.shape_cast %24 : vector<1x8x8xbf16> to vector<1x1x8x8xbf16>
    %26 = vector.extract_strided_slice %21 {offsets = [0, 0, 16], sizes = [1, 8, 8], strides = [1, 1, 1]} : vector<1x8x32xbf16> to vector<1x8x8xbf16>
    %27 = vector.shape_cast %26 : vector<1x8x8xbf16> to vector<1x1x8x8xbf16>
    %28 = vector.extract_strided_slice %21 {offsets = [0, 0, 24], sizes = [1, 8, 8], strides = [1, 1, 1]} : vector<1x8x32xbf16> to vector<1x8x8xbf16>
    %29 = vector.shape_cast %28 : vector<1x8x8xbf16> to vector<1x1x8x8xbf16>
    %30 = tpu.concatenate %23, %25, %27, %29 in 0 : vector<1x1x8x8xbf16>, vector<1x1x8x8xbf16>, vector<1x1x8x8xbf16>, vector<1x1x8x8xbf16> -> vector<4x1x8x8xbf16>
    %31 = vector.shape_cast %30 : vector<4x1x8x8xbf16> to vector<4x8x8xbf16>
    %32 = vector.extract_strided_slice %19 {offsets = [0, 32], sizes = [8, 32], strides = [1, 1]} : vector<8x96xbf16> to vector<8x32xbf16>
    %33 = vector.shape_cast %32 : vector<8x32xbf16> to vector<1x8x32xbf16>
    %34 = vector.extract_strided_slice %33 {offsets = [0, 0, 0], sizes = [1, 8, 8], strides = [1, 1, 1]} : vector<1x8x32xbf16> to vector<1x8x8xbf16>
    %35 = vector.shape_cast %34 : vector<1x8x8xbf16> to vector<1x1x8x8xbf16>
    %36 = vector.extract_strided_slice %33 {offsets = [0, 0, 8], sizes = [1, 8, 8], strides = [1, 1, 1]} : vector<1x8x32xbf16> to vector<1x8x8xbf16>
    %37 = vector.shape_cast %36 : vector<1x8x8xbf16> to vector<1x1x8x8xbf16>
    %38 = vector.extract_strided_slice %33 {offsets = [0, 0, 16], sizes = [1, 8, 8], strides = [1, 1, 1]} : vector<1x8x32xbf16> to vector<1x8x8xbf16>
    %39 = vector.shape_cast %38 : vector<1x8x8xbf16> to vector<1x1x8x8xbf16>
    %40 = vector.extract_strided_slice %33 {offsets = [0, 0, 24], sizes = [1, 8, 8], strides = [1, 1, 1]} : vector<1x8x32xbf16> to vector<1x8x8xbf16>
    %41 = vector.shape_cast %40 : vector<1x8x8xbf16> to vector<1x1x8x8xbf16>
    %42 = tpu.concatenate %35, %37, %39, %41 in 0 : vector<1x1x8x8xbf16>, vector<1x1x8x8xbf16>, vector<1x1x8x8xbf16>, vector<1x1x8x8xbf16> -> vector<4x1x8x8xbf16>
    %43 = vector.shape_cast %42 : vector<4x1x8x8xbf16> to vector<4x8x8xbf16>
    %44 = vector.extract_strided_slice %19 {offsets = [0, 64], sizes = [8, 32], strides = [1, 1]} : vector<8x96xbf16> to vector<8x32xbf16>
    %45 = vector.shape_cast %44 : vector<8x32xbf16> to vector<1x8x32xbf16>
    %46 = vector.extract_strided_slice %45 {offsets = [0, 0, 0], sizes = [1, 8, 8], strides = [1, 1, 1]} : vector<1x8x32xbf16> to vector<1x8x8xbf16>
    %47 = vector.shape_cast %46 : vector<1x8x8xbf16> to vector<1x1x8x8xbf16>
    %48 = vector.extract_strided_slice %45 {offsets = [0, 0, 8], sizes = [1, 8, 8], strides = [1, 1, 1]} : vector<1x8x32xbf16> to vector<1x8x8xbf16>
    %49 = vector.shape_cast %48 : vector<1x8x8xbf16> to vector<1x1x8x8xbf16>
    %50 = vector.extract_strided_slice %45 {offsets = [0, 0, 16], sizes = [1, 8, 8], strides = [1, 1, 1]} : vector<1x8x32xbf16> to vector<1x8x8xbf16>
    %51 = vector.shape_cast %50 : vector<1x8x8xbf16> to vector<1x1x8x8xbf16>
    %52 = vector.extract_strided_slice %45 {offsets = [0, 0, 24], sizes = [1, 8, 8], strides = [1, 1, 1]} : vector<1x8x32xbf16> to vector<1x8x8xbf16>
    %53 = vector.shape_cast %52 : vector<1x8x8xbf16> to vector<1x1x8x8xbf16>
    %54 = tpu.concatenate %47, %49, %51, %53 in 0 : vector<1x1x8x8xbf16>, vector<1x1x8x8xbf16>, vector<1x1x8x8xbf16>, vector<1x1x8x8xbf16> -> vector<4x1x8x8xbf16>
    %55 = vector.shape_cast %54 : vector<4x1x8x8xbf16> to vector<4x8x8xbf16>
    %c0_5 = arith.constant 0 : index
    %c0_6 = arith.constant 0 : index
    %c0_7 = arith.constant 0 : index
    %56 = vector.load %arg5[%c0_5, %c0_6, %c0_7] : memref<4x8x32xbf16, #tpu.memory_space<vmem>>, vector<4x8x32xbf16>
    %cst_8 = arith.constant dense<0.000000e+00> : vector<4x8x8xf32>
    %57 = tpu.matmul %31, %43, %cst_8 {dimension_numbers = #tpu.dot_dimension_numbers<[2], [2], [1], [1], [0, 0, 0, 1, 1, 1], [0], [0]>} : vector<4x8x8xbf16>, vector<4x8x8xbf16>, vector<4x8x8xf32> -> vector<4x8x8xf32>
    %cst_9 = arith.constant 0.353553385 : f32
    %58 = vector.broadcast %cst_9 : f32 to vector<4x8x8xf32>
    %59 = arith.mulf %57, %58 : vector<4x8x8xf32>
    %cst_10 = arith.constant -1.000000e+06 : f32
    %60 = vector.shape_cast %5 : vector<1x8x8xi1> to vector<1x8x8xi1>
    %61 = vector.broadcast %60 : vector<1x8x8xi1> to vector<4x8x8xi1>
    %62 = vector.broadcast %cst_10 : f32 to vector<4x8x8xf32>
    %63 = arith.select %61, %59, %62 : vector<4x8x8xi1>, vector<4x8x8xf32>
    %cst_11 = arith.constant dense<0xFF800000> : vector<4x8xf32>
    %64 = vector.multi_reduction <maximumf>, %63, %cst_11 [2] : vector<4x8x8xf32> to vector<4x8xf32>
    %65 = vector.shape_cast %64 : vector<4x8xf32> to vector<4x8x1xf32>
    %66 = vector.broadcast %65 : vector<4x8x1xf32> to vector<4x8x8xf32>
    %67 = arith.subf %63, %66 : vector<4x8x8xf32>
    %68 = math.exp %67 : vector<4x8x8xf32>
    %cst_12 = arith.constant dense<0.000000e+00> : vector<4x8xf32>
    %69 = vector.multi_reduction <add>, %68, %cst_12 [2] : vector<4x8x8xf32> to vector<4x8xf32>
    %70 = vector.shape_cast %69 : vector<4x8xf32> to vector<4x8x1xf32>
    %71 = tpu.reciprocal %70 {approx = true} : vector<4x8x1xf32> -> vector<4x8x1xf32>
    %72 = vector.broadcast %71 : vector<4x8x1xf32> to vector<4x8x8xf32>
    %73 = arith.mulf %68, %72 : vector<4x8x8xf32>
    %74 = arith.truncf %73 : vector<4x8x8xf32> to vector<4x8x8xbf16>
    %cst_13 = arith.constant dense<0.000000e+00> : vector<4x8x8xf32>
    %75 = tpu.matmul %74, %55, %cst_13 {dimension_numbers = #tpu.dot_dimension_numbers<[2], [1], [1], [2], [0, 0, 0, 1, 1, 2], [0], [0]>} : vector<4x8x8xbf16>, vector<4x8x8xbf16>, vector<4x8x8xf32> -> vector<4x8x8xf32>
    %76 = arith.truncf %75 : vector<4x8x8xf32> to vector<4x8x8xbf16>
    %cst_14 = arith.constant dense<0.000000e+00> : vector<4x8x32xf32>
    %77 = tpu.matmul %76, %56, %cst_14 {dimension_numbers = #tpu.dot_dimension_numbers<[2], [1], [1], [2], [0, 0, 0, 1, 1, 2], [0], [0]>} : vector<4x8x8xbf16>, vector<4x8x32xbf16>, vector<4x8x32xf32> -> vector<4x8x32xf32>
    %cst_15 = arith.constant dense<0.000000e+00> : vector<8x32xf32>
    %78 = vector.multi_reduction <add>, %77, %cst_15 [0] : vector<4x8x32xf32> to vector<8x32xf32>
    %79 = arith.addf %78, %0 : vector<8x32xf32>
    %c0_16 = arith.constant 0 : index
    %c0_17 = arith.constant 0 : index
    %80 = vector.load %arg6[%c0_16, %c0_17] : memref<1x32xf32, #tpu.memory_space<vmem>>, vector<1x32xf32>
    %c0_18 = arith.constant 0 : index
    %c0_19 = arith.constant 0 : index
    %81 = vector.load %arg7[%c0_18, %c0_19] : memref<1x32xf32, #tpu.memory_space<vmem>>, vector<1x32xf32>
    %cst_20 = arith.constant dense<0.000000e+00> : vector<8xf32>
    %82 = vector.multi_reduction <add>, %79, %cst_20 [1] : vector<8x32xf32> to vector<8xf32>
    %83 = vector.shape_cast %82 : vector<8xf32> to vector<8x1xf32>
    %cst_21 = arith.constant 3.200000e+01 : f32
    %84 = vector.broadcast %cst_21 : f32 to vector<8x1xf32>
    %85 = arith.divf %83, %84 : vector<8x1xf32>
    %86 = vector.broadcast %85 : vector<8x1xf32> to vector<8x32xf32>
    %87 = arith.subf %79, %86 : vector<8x32xf32>
    %88 = vector.broadcast %85 : vector<8x1xf32> to vector<8x32xf32>
    %89 = arith.subf %79, %88 : vector<8x32xf32>
    %90 = arith.mulf %87, %89 : vector<8x32xf32>
    %cst_22 = arith.constant dense<0.000000e+00> : vector<8xf32>
    %91 = vector.multi_reduction <add>, %90, %cst_22 [1] : vector<8x32xf32> to vector<8xf32>
    %92 = vector.shape_cast %91 : vector<8xf32> to vector<8x1xf32>
    %cst_23 = arith.constant 3.200000e+01 : f32
    %93 = vector.broadcast %cst_23 : f32 to vector<8x1xf32>
    %94 = arith.divf %92, %93 : vector<8x1xf32>
    %95 = vector.broadcast %85 : vector<8x1xf32> to vector<8x32xf32>
    %96 = arith.subf %79, %95 : vector<8x32xf32>
    %cst_24 = arith.constant 9.99999974E-6 : f32
    %97 = vector.broadcast %cst_24 : f32 to vector<8x1xf32>
    %98 = arith.addf %94, %97 : vector<8x1xf32>
    %99 = math.rsqrt %98 : vector<8x1xf32>
    %100 = vector.broadcast %99 : vector<8x1xf32> to vector<8x32xf32>
    %101 = arith.mulf %96, %100 : vector<8x32xf32>
    %102 = vector.broadcast %80 : vector<1x32xf32> to vector<8x32xf32>
    %103 = arith.mulf %101, %102 : vector<8x32xf32>
    %104 = vector.broadcast %81 : vector<1x32xf32> to vector<8x32xf32>
    %105 = arith.addf %103, %104 : vector<8x32xf32>
    %106 = arith.truncf %105 : vector<8x32xf32> to vector<8x32xbf16>
    %107 = arith.truncf %1 : vector<16x32xf32> to vector<16x32xbf16>
    %c0_25 = arith.constant 0 : index
    %c0_26 = arith.constant 0 : index
    %108 = vector.load %arg8[%c0_25, %c0_26] : memref<32x32xbf16, #tpu.memory_space<vmem>>, vector<32x32xbf16>
    %cst_27 = arith.constant dense<0.000000e+00> : vector<8x32xf32>
    %109 = tpu.matmul %106, %108, %cst_27 {dimension_numbers = #tpu.dot_dimension_numbers<[1], [0], [0], [1], [0, 0, 1, 1], [], []>} : vector<8x32xbf16>, vector<32x32xbf16>, vector<8x32xf32> -> vector<8x32xf32>
    %110 = arith.truncf %109 : vector<8x32xf32> to vector<8x32xbf16>
    %c0_28 = arith.constant 0 : index
    %c0_29 = arith.constant 0 : index
    %111 = vector.load %arg9[%c0_28, %c0_29] : memref<32x64xbf16, #tpu.memory_space<vmem>>, vector<32x64xbf16>
    %cst_30 = arith.constant dense<0.000000e+00> : vector<16x64xf32>
    %112 = tpu.matmul %107, %111, %cst_30 {dimension_numbers = #tpu.dot_dimension_numbers<[1], [0], [0], [1], [0, 0, 1, 1], [], []>} : vector<16x32xbf16>, vector<32x64xbf16>, vector<16x64xf32> -> vector<16x64xf32>
    %113 = arith.truncf %112 : vector<16x64xf32> to vector<16x64xbf16>
    %114 = vector.shape_cast %110 : vector<8x32xbf16> to vector<1x8x32xbf16>
    %115 = vector.extract_strided_slice %114 {offsets = [0, 0, 0], sizes = [1, 8, 8], strides = [1, 1, 1]} : vector<1x8x32xbf16> to vector<1x8x8xbf16>
    %116 = vector.shape_cast %115 : vector<1x8x8xbf16> to vector<1x1x8x8xbf16>
    %117 = vector.extract_strided_slice %114 {offsets = [0, 0, 8], sizes = [1, 8, 8], strides = [1, 1, 1]} : vector<1x8x32xbf16> to vector<1x8x8xbf16>
    %118 = vector.shape_cast %117 : vector<1x8x8xbf16> to vector<1x1x8x8xbf16>
    %119 = vector.extract_strided_slice %114 {offsets = [0, 0, 16], sizes = [1, 8, 8], strides = [1, 1, 1]} : vector<1x8x32xbf16> to vector<1x8x8xbf16>
    %120 = vector.shape_cast %119 : vector<1x8x8xbf16> to vector<1x1x8x8xbf16>
    %121 = vector.extract_strided_slice %114 {offsets = [0, 0, 24], sizes = [1, 8, 8], strides = [1, 1, 1]} : vector<1x8x32xbf16> to vector<1x8x8xbf16>
    %122 = vector.shape_cast %121 : vector<1x8x8xbf16> to vector<1x1x8x8xbf16>
    %123 = tpu.concatenate %116, %118, %120, %122 in 0 : vector<1x1x8x8xbf16>, vector<1x1x8x8xbf16>, vector<1x1x8x8xbf16>, vector<1x1x8x8xbf16> -> vector<4x1x8x8xbf16>
    %124 = vector.shape_cast %123 : vector<4x1x8x8xbf16> to vector<4x8x8xbf16>
    %125 = vector.extract_strided_slice %113 {offsets = [0, 0], sizes = [16, 32], strides = [1, 1]} : vector<16x64xbf16> to vector<16x32xbf16>
    %126 = vector.shape_cast %125 : vector<16x32xbf16> to vector<1x16x32xbf16>
    %127 = vector.extract_strided_slice %126 {offsets = [0, 0, 0], sizes = [1, 16, 8], strides = [1, 1, 1]} : vector<1x16x32xbf16> to vector<1x16x8xbf16>
    %128 = vector.shape_cast %127 : vector<1x16x8xbf16> to vector<1x1x16x8xbf16>
    %129 = vector.extract_strided_slice %126 {offsets = [0, 0, 8], sizes = [1, 16, 8], strides = [1, 1, 1]} : vector<1x16x32xbf16> to vector<1x16x8xbf16>
    %130 = vector.shape_cast %129 : vector<1x16x8xbf16> to vector<1x1x16x8xbf16>
    %131 = vector.extract_strided_slice %126 {offsets = [0, 0, 16], sizes = [1, 16, 8], strides = [1, 1, 1]} : vector<1x16x32xbf16> to vector<1x16x8xbf16>
    %132 = vector.shape_cast %131 : vector<1x16x8xbf16> to vector<1x1x16x8xbf16>
    %133 = vector.extract_strided_slice %126 {offsets = [0, 0, 24], sizes = [1, 16, 8], strides = [1, 1, 1]} : vector<1x16x32xbf16> to vector<1x16x8xbf16>
    %134 = vector.shape_cast %133 : vector<1x16x8xbf16> to vector<1x1x16x8xbf16>
    %135 = tpu.concatenate %128, %130, %132, %134 in 0 : vector<1x1x16x8xbf16>, vector<1x1x16x8xbf16>, vector<1x1x16x8xbf16>, vector<1x1x16x8xbf16> -> vector<4x1x16x8xbf16>
    %136 = vector.shape_cast %135 : vector<4x1x16x8xbf16> to vector<4x16x8xbf16>
    %137 = vector.extract_strided_slice %113 {offsets = [0, 32], sizes = [16, 32], strides = [1, 1]} : vector<16x64xbf16> to vector<16x32xbf16>
    %138 = vector.shape_cast %137 : vector<16x32xbf16> to vector<1x16x32xbf16>
    %139 = vector.extract_strided_slice %138 {offsets = [0, 0, 0], sizes = [1, 16, 8], strides = [1, 1, 1]} : vector<1x16x32xbf16> to vector<1x16x8xbf16>
    %140 = vector.shape_cast %139 : vector<1x16x8xbf16> to vector<1x1x16x8xbf16>
    %141 = vector.extract_strided_slice %138 {offsets = [0, 0, 8], sizes = [1, 16, 8], strides = [1, 1, 1]} : vector<1x16x32xbf16> to vector<1x16x8xbf16>
    %142 = vector.shape_cast %141 : vector<1x16x8xbf16> to vector<1x1x16x8xbf16>
    %143 = vector.extract_strided_slice %138 {offsets = [0, 0, 16], sizes = [1, 16, 8], strides = [1, 1, 1]} : vector<1x16x32xbf16> to vector<1x16x8xbf16>
    %144 = vector.shape_cast %143 : vector<1x16x8xbf16> to vector<1x1x16x8xbf16>
    %145 = vector.extract_strided_slice %138 {offsets = [0, 0, 24], sizes = [1, 16, 8], strides = [1, 1, 1]} : vector<1x16x32xbf16> to vector<1x16x8xbf16>
    %146 = vector.shape_cast %145 : vector<1x16x8xbf16> to vector<1x1x16x8xbf16>
    %147 = tpu.concatenate %140, %142, %144, %146 in 0 : vector<1x1x16x8xbf16>, vector<1x1x16x8xbf16>, vector<1x1x16x8xbf16>, vector<1x1x16x8xbf16> -> vector<4x1x16x8xbf16>
    %148 = vector.shape_cast %147 : vector<4x1x16x8xbf16> to vector<4x16x8xbf16>
    %c0_31 = arith.constant 0 : index
    %c0_32 = arith.constant 0 : index
    %c0_33 = arith.constant 0 : index
    %149 = vector.load %arg10[%c0_31, %c0_32, %c0_33] : memref<4x8x32xbf16, #tpu.memory_space<vmem>>, vector<4x8x32xbf16>
    %cst_34 = arith.constant dense<0.000000e+00> : vector<4x8x16xf32>
    %150 = tpu.matmul %124, %136, %cst_34 {dimension_numbers = #tpu.dot_dimension_numbers<[2], [2], [1], [1], [0, 0, 0, 1, 1, 1], [0], [0]>} : vector<4x8x8xbf16>, vector<4x16x8xbf16>, vector<4x8x16xf32> -> vector<4x8x16xf32>
    %cst_35 = arith.constant 0.353553385 : f32
    %151 = vector.broadcast %cst_35 : f32 to vector<4x8x16xf32>
    %152 = arith.mulf %150, %151 : vector<4x8x16xf32>
    %cst_36 = arith.constant -1.000000e+06 : f32
    %153 = vector.shape_cast %15 : vector<4x1x16xi1> to vector<4x1x16xi1>
    %154 = vector.broadcast %153 : vector<4x1x16xi1> to vector<4x8x16xi1>
    %155 = vector.broadcast %cst_36 : f32 to vector<4x8x16xf32>
    %156 = arith.select %154, %152, %155 : vector<4x8x16xi1>, vector<4x8x16xf32>
    %cst_37 = arith.constant dense<0xFF800000> : vector<4x8xf32>
    %157 = vector.multi_reduction <maximumf>, %156, %cst_37 [2] : vector<4x8x16xf32> to vector<4x8xf32>
    %158 = vector.shape_cast %157 : vector<4x8xf32> to vector<4x8x1xf32>
    %159 = vector.broadcast %158 : vector<4x8x1xf32> to vector<4x8x16xf32>
    %160 = arith.subf %156, %159 : vector<4x8x16xf32>
    %161 = math.exp %160 : vector<4x8x16xf32>
    %cst_38 = arith.constant dense<0.000000e+00> : vector<4x8xf32>
    %162 = vector.multi_reduction <add>, %161, %cst_38 [2] : vector<4x8x16xf32> to vector<4x8xf32>
    %163 = vector.shape_cast %162 : vector<4x8xf32> to vector<4x8x1xf32>
    %164 = tpu.reciprocal %163 {approx = true} : vector<4x8x1xf32> -> vector<4x8x1xf32>
    %165 = vector.broadcast %164 : vector<4x8x1xf32> to vector<4x8x16xf32>
    %166 = arith.mulf %161, %165 : vector<4x8x16xf32>
    %167 = arith.truncf %166 : vector<4x8x16xf32> to vector<4x8x16xbf16>
    %cst_39 = arith.constant dense<0.000000e+00> : vector<4x8x8xf32>
    %168 = tpu.matmul %167, %148, %cst_39 {dimension_numbers = #tpu.dot_dimension_numbers<[2], [1], [1], [2], [0, 0, 0, 1, 1, 2], [0], [0]>} : vector<4x8x16xbf16>, vector<4x16x8xbf16>, vector<4x8x8xf32> -> vector<4x8x8xf32>
    %169 = arith.truncf %168 : vector<4x8x8xf32> to vector<4x8x8xbf16>
    %cst_40 = arith.constant dense<0.000000e+00> : vector<4x8x32xf32>
    %170 = tpu.matmul %169, %149, %cst_40 {dimension_numbers = #tpu.dot_dimension_numbers<[2], [1], [1], [2], [0, 0, 0, 1, 1, 2], [0], [0]>} : vector<4x8x8xbf16>, vector<4x8x32xbf16>, vector<4x8x32xf32> -> vector<4x8x32xf32>
    %cst_41 = arith.constant dense<0.000000e+00> : vector<8x32xf32>
    %171 = vector.multi_reduction <add>, %170, %cst_41 [0] : vector<4x8x32xf32> to vector<8x32xf32>
    %172 = arith.addf %171, %105 : vector<8x32xf32>
    %c0_42 = arith.constant 0 : index
    %c0_43 = arith.constant 0 : index
    %173 = vector.load %arg11[%c0_42, %c0_43] : memref<1x32xf32, #tpu.memory_space<vmem>>, vector<1x32xf32>
    %c0_44 = arith.constant 0 : index
    %c0_45 = arith.constant 0 : index
    %174 = vector.load %arg12[%c0_44, %c0_45] : memref<1x32xf32, #tpu.memory_space<vmem>>, vector<1x32xf32>
    %cst_46 = arith.constant dense<0.000000e+00> : vector<8xf32>
    %175 = vector.multi_reduction <add>, %172, %cst_46 [1] : vector<8x32xf32> to vector<8xf32>
    %176 = vector.shape_cast %175 : vector<8xf32> to vector<8x1xf32>
    %cst_47 = arith.constant 3.200000e+01 : f32
    %177 = vector.broadcast %cst_47 : f32 to vector<8x1xf32>
    %178 = arith.divf %176, %177 : vector<8x1xf32>
    %179 = vector.broadcast %178 : vector<8x1xf32> to vector<8x32xf32>
    %180 = arith.subf %172, %179 : vector<8x32xf32>
    %181 = vector.broadcast %178 : vector<8x1xf32> to vector<8x32xf32>
    %182 = arith.subf %172, %181 : vector<8x32xf32>
    %183 = arith.mulf %180, %182 : vector<8x32xf32>
    %cst_48 = arith.constant dense<0.000000e+00> : vector<8xf32>
    %184 = vector.multi_reduction <add>, %183, %cst_48 [1] : vector<8x32xf32> to vector<8xf32>
    %185 = vector.shape_cast %184 : vector<8xf32> to vector<8x1xf32>
    %cst_49 = arith.constant 3.200000e+01 : f32
    %186 = vector.broadcast %cst_49 : f32 to vector<8x1xf32>
    %187 = arith.divf %185, %186 : vector<8x1xf32>
    %188 = vector.broadcast %178 : vector<8x1xf32> to vector<8x32xf32>
    %189 = arith.subf %172, %188 : vector<8x32xf32>
    %cst_50 = arith.constant 9.99999974E-6 : f32
    %190 = vector.broadcast %cst_50 : f32 to vector<8x1xf32>
    %191 = arith.addf %187, %190 : vector<8x1xf32>
    %192 = math.rsqrt %191 : vector<8x1xf32>
    %193 = vector.broadcast %192 : vector<8x1xf32> to vector<8x32xf32>
    %194 = arith.mulf %189, %193 : vector<8x32xf32>
    %195 = vector.broadcast %173 : vector<1x32xf32> to vector<8x32xf32>
    %196 = arith.mulf %194, %195 : vector<8x32xf32>
    %197 = vector.broadcast %174 : vector<1x32xf32> to vector<8x32xf32>
    %198 = arith.addf %196, %197 : vector<8x32xf32>
    %199 = arith.truncf %198 : vector<8x32xf32> to vector<8x32xbf16>
    %c0_51 = arith.constant 0 : index
    %c0_52 = arith.constant 0 : index
    %200 = vector.load %arg13[%c0_51, %c0_52] : memref<32x64xbf16, #tpu.memory_space<vmem>>, vector<32x64xbf16>
    %cst_53 = arith.constant dense<0.000000e+00> : vector<8x64xf32>
    %201 = tpu.matmul %199, %200, %cst_53 {dimension_numbers = #tpu.dot_dimension_numbers<[1], [0], [0], [1], [0, 0, 1, 1], [], []>} : vector<8x32xbf16>, vector<32x64xbf16>, vector<8x64xf32> -> vector<8x64xf32>
    %c0_54 = arith.constant 0 : index
    %c0_55 = arith.constant 0 : index
    %202 = vector.load %arg14[%c0_54, %c0_55] : memref<1x64xf32, #tpu.memory_space<vmem>>, vector<1x64xf32>
    %203 = vector.broadcast %202 : vector<1x64xf32> to vector<8x64xf32>
    %204 = arith.addf %201, %203 : vector<8x64xf32>
    %cst_56 = arith.constant 0.000000e+00 : f32
    %205 = vector.broadcast %cst_56 : f32 to vector<8x64xf32>
    %206 = arith.maximumf %204, %205 : vector<8x64xf32>
    %207 = arith.truncf %206 : vector<8x64xf32> to vector<8x64xbf16>
    %c0_57 = arith.constant 0 : index
    %c0_58 = arith.constant 0 : index
    %208 = vector.load %arg15[%c0_57, %c0_58] : memref<64x32xbf16, #tpu.memory_space<vmem>>, vector<64x32xbf16>
    %cst_59 = arith.constant dense<0.000000e+00> : vector<8x32xf32>
    %209 = tpu.matmul %207, %208, %cst_59 {dimension_numbers = #tpu.dot_dimension_numbers<[1], [0], [0], [1], [0, 0, 1, 1], [], []>} : vector<8x64xbf16>, vector<64x32xbf16>, vector<8x32xf32> -> vector<8x32xf32>
    %c0_60 = arith.constant 0 : index
    %c0_61 = arith.constant 0 : index
    %210 = vector.load %arg16[%c0_60, %c0_61] : memref<1x32xf32, #tpu.memory_space<vmem>>, vector<1x32xf32>
    %211 = vector.broadcast %210 : vector<1x32xf32> to vector<8x32xf32>
    %212 = arith.addf %209, %211 : vector<8x32xf32>
    %213 = arith.addf %212, %198 : vector<8x32xf32>
    %c0_62 = arith.constant 0 : index
    %c0_63 = arith.constant 0 : index
    %214 = vector.load %arg17[%c0_62, %c0_63] : memref<1x32xf32, #tpu.memory_space<vmem>>, vector<1x32xf32>
    %c0_64 = arith.constant 0 : index
    %c0_65 = arith.constant 0 : index
    %215 = vector.load %arg18[%c0_64, %c0_65] : memref<1x32xf32, #tpu.memory_space<vmem>>, vector<1x32xf32>
    %cst_66 = arith.constant dense<0.000000e+00> : vector<8xf32>
    %216 = vector.multi_reduction <add>, %213, %cst_66 [1] : vector<8x32xf32> to vector<8xf32>
    %217 = vector.shape_cast %216 : vector<8xf32> to vector<8x1xf32>
    %cst_67 = arith.constant 3.200000e+01 : f32
    %218 = vector.broadcast %cst_67 : f32 to vector<8x1xf32>
    %219 = arith.divf %217, %218 : vector<8x1xf32>
    %220 = vector.broadcast %219 : vector<8x1xf32> to vector<8x32xf32>
    %221 = arith.subf %213, %220 : vector<8x32xf32>
    %222 = vector.broadcast %219 : vector<8x1xf32> to vector<8x32xf32>
    %223 = arith.subf %213, %222 : vector<8x32xf32>
    %224 = arith.mulf %221, %223 : vector<8x32xf32>
    %cst_68 = arith.constant dense<0.000000e+00> : vector<8xf32>
    %225 = vector.multi_reduction <add>, %224, %cst_68 [1] : vector<8x32xf32> to vector<8xf32>
    %226 = vector.shape_cast %225 : vector<8xf32> to vector<8x1xf32>
    %cst_69 = arith.constant 3.200000e+01 : f32
    %227 = vector.broadcast %cst_69 : f32 to vector<8x1xf32>
    %228 = arith.divf %226, %227 : vector<8x1xf32>
    %229 = vector.broadcast %219 : vector<8x1xf32> to vector<8x32xf32>
    %230 = arith.subf %213, %229 : vector<8x32xf32>
    %cst_70 = arith.constant 9.99999974E-6 : f32
    %231 = vector.broadcast %cst_70 : f32 to vector<8x1xf32>
    %232 = arith.addf %228, %231 : vector<8x1xf32>
    %233 = math.rsqrt %232 : vector<8x1xf32>
    %234 = vector.broadcast %233 : vector<8x1xf32> to vector<8x32xf32>
    %235 = arith.mulf %230, %234 : vector<8x32xf32>
    %236 = vector.broadcast %214 : vector<1x32xf32> to vector<8x32xf32>
    %237 = arith.mulf %235, %236 : vector<8x32xf32>
    %238 = vector.broadcast %215 : vector<1x32xf32> to vector<8x32xf32>
    %239 = arith.addf %237, %238 : vector<8x32xf32>
    %c0_71 = arith.constant 0 : index
    %c0_72 = arith.constant 0 : index
    %240 = vector.load %arg19[%c0_71, %c0_72] : memref<8x32xf32, #tpu.memory_space<vmem>>, vector<8x32xf32>
    tpu.vector_store %arg19[%c0_71, %c0_72], %239 {strides = array<i32>} : memref<8x32xf32, #tpu.memory_space<vmem>>, vector<8x32xf32>,
    return
  }
  func.func @transform_0(%arg0: i32, %arg1: memref<2xi32, #tpu.memory_space<smem>>) -> (i32, i32) {
    %c0_i32 = arith.constant 0 : i32
    %c0_i32_0 = arith.constant 0 : i32
    return %arg0, %c0_i32 : i32, i32
  }
  func.func @transform_1(%arg0: i32, %arg1: memref<2xi32, #tpu.memory_space<smem>>) -> (i32, i32) {
    %c0_i32 = arith.constant 0 : i32
    %c0_i32_0 = arith.constant 0 : i32
    return %arg0, %c0_i32 : i32, i32
  }
  func.func @transform_2(%arg0: i32, %arg1: memref<2xi32, #tpu.memory_space<smem>>) -> (i32, i32) {
    %c0_i32 = arith.constant 0 : i32
    %c0_i32_0 = arith.constant 0 : i32
    %c0_i32_1 = arith.constant 0 : i32
    return %c0_i32, %c0_i32_0 : i32, i32
  }
  func.func @transform_3(%arg0: i32, %arg1: memref<2xi32, #tpu.memory_space<smem>>) -> (i32, i32, i32) {
    %c0_i32 = arith.constant 0 : i32
    %c0_i32_0 = arith.constant 0 : i32
    %c0_i32_1 = arith.constant 0 : i32
    %c0_i32_2 = arith.constant 0 : i32
    return %c0_i32, %c0_i32_0, %c0_i32_1 : i32, i32, i32
  }
  func.func @transform_4(%arg0: i32, %arg1: memref<2xi32, #tpu.memory_space<smem>>) -> (i32, i32) {
    %c0_i32 = arith.constant 0 : i32
    %c0_i32_0 = arith.constant 0 : i32
    %c0_i32_1 = arith.constant 0 : i32
    return %c0_i32, %c0_i32_0 : i32, i32
  }
  func.func @transform_5(%arg0: i32, %arg1: memref<2xi32, #tpu.memory_space<smem>>) -> (i32, i32) {
    %c0_i32 = arith.constant 0 : i32
    %c0_i32_0 = arith.constant 0 : i32
    %c0_i32_1 = arith.constant 0 : i32
    return %c0_i32, %c0_i32_0 : i32, i32
  }
  func.func @transform_6(%arg0: i32, %arg1: memref<2xi32, #tpu.memory_space<smem>>) -> (i32, i32) {
    %c0_i32 = arith.constant 0 : i32
    %c0_i32_0 = arith.constant 0 : i32
    %c0_i32_1 = arith.constant 0 : i32
    return %c0_i32, %c0_i32_0 : i32, i32
  }
  func.func @transform_7(%arg0: i32, %arg1: memref<2xi32, #tpu.memory_space<smem>>) -> (i32, i32) {
    %c0_i32 = arith.constant 0 : i32
    %c0_i32_0 = arith.constant 0 : i32
    %c0_i32_1 = arith.constant 0 : i32
    return %c0_i32, %c0_i32_0 : i32, i32
  }
  func.func @transform_8(%arg0: i32, %arg1: memref<2xi32, #tpu.memory_space<smem>>) -> (i32, i32, i32) {
    %c0_i32 = arith.constant 0 : i32
    %c0_i32_0 = arith.constant 0 : i32
    %c0_i32_1 = arith.constant 0 : i32
    %c0_i32_2 = arith.constant 0 : i32
    return %c0_i32, %c0_i32_0, %c0_i32_1 : i32, i32, i32
  }
  func.func @transform_9(%arg0: i32, %arg1: memref<2xi32, #tpu.memory_space<smem>>) -> (i32, i32) {
    %c0_i32 = arith.constant 0 : i32
    %c0_i32_0 = arith.constant 0 : i32
    %c0_i32_1 = arith.constant 0 : i32
    return %c0_i32, %c0_i32_0 : i32, i32
  }
  func.func @transform_10(%arg0: i32, %arg1: memref<2xi32, #tpu.memory_space<smem>>) -> (i32, i32) {
    %c0_i32 = arith.constant 0 : i32
    %c0_i32_0 = arith.constant 0 : i32
    %c0_i32_1 = arith.constant 0 : i32
    return %c0_i32, %c0_i32_0 : i32, i32
  }
  func.func @transform_11(%arg0: i32, %arg1: memref<2xi32, #tpu.memory_space<smem>>) -> (i32, i32) {
    %c0_i32 = arith.constant 0 : i32
    %c0_i32_0 = arith.constant 0 : i32
    %c0_i32_1 = arith.constant 0 : i32
    return %c0_i32, %c0_i32_0 : i32, i32
  }
  func.func @transform_12(%arg0: i32, %arg1: memref<2xi32, #tpu.memory_space<smem>>) -> (i32, i32) {
    %c0_i32 = arith.constant 0 : i32
    %c0_i32_0 = arith.constant 0 : i32
    %c0_i32_1 = arith.constant 0 : i32
    return %c0_i32, %c0_i32_0 : i32, i32
  }
  func.func @transform_13(%arg0: i32, %arg1: memref<2xi32, #tpu.memory_space<smem>>) -> (i32, i32) {
    %c0_i32 = arith.constant 0 : i32
    %c0_i32_0 = arith.constant 0 : i32
    %c0_i32_1 = arith.constant 0 : i32
    return %c0_i32, %c0_i32_0 : i32, i32
  }
  func.func @transform_14(%arg0: i32, %arg1: memref<2xi32, #tpu.memory_space<smem>>) -> (i32, i32) {
    %c0_i32 = arith.constant 0 : i32
    %c0_i32_0 = arith.constant 0 : i32
    %c0_i32_1 = arith.constant 0 : i32
    return %c0_i32, %c0_i32_0 : i32, i32
  }
  func.func @transform_15(%arg0: i32, %arg1: memref<2xi32, #tpu.memory_space<smem>>) -> (i32, i32) {
    %c0_i32 = arith.constant 0 : i32
    %c0_i32_0 = arith.constant 0 : i32
    %c0_i32_1 = arith.constant 0 : i32
    return %c0_i32, %c0_i32_0 : i32, i32
  }
  func.func @transform_16(%arg0: i32, %arg1: memref<2xi32, #tpu.memory_space<smem>>) -> (i32, i32) {
    %c0_i32 = arith.constant 0 : i32
    %c0_i32_0 = arith.constant 0 : i32
    %c0_i32_1 = arith.constant 0 : i32
    return %c0_i32, %c0_i32_0 : i32, i32
  }
  func.func @transform_17(%arg0: i32, %arg1: memref<2xi32, #tpu.memory_space<smem>>) -> (i32, i32) {
    %c0_i32 = arith.constant 0 : i32
    %c0_i32_0 = arith.constant 0 : i32
    return %arg0, %c0_i32 : i32, i32
  }
}

module attributes {stable_mosaic.version = 11 : i64} {
  func.func @_decoder_block_kernel(%arg0: i32, %arg1: memref<2xi32, #tpu.memory_space<smem>>, %arg2: memref<8x32xf32, #tpu.memory_space<vmem>>, %arg3: memref<16x32xf32, #tpu.memory_space<vmem>>, %arg4: memref<32x96xbf16, #tpu.memory_space<vmem>>, %arg5: memref<4x8x32xbf16, #tpu.memory_space<vmem>>, %arg6: memref<1x32xf32, #tpu.memory_space<vmem>>, %arg7: memref<1x32xf32, #tpu.memory_space<vmem>>, %arg8: memref<32x32xbf16, #tpu.memory_space<vmem>>, %arg9: memref<32x64xbf16, #tpu.memory_space<vmem>>, %arg10: memref<4x8x32xbf16, #tpu.memory_space<vmem>>, %arg11: memref<1x32xf32, #tpu.memory_space<vmem>>, %arg12: memref<1x32xf32, #tpu.memory_space<vmem>>, %arg13: memref<32x64xbf16, #tpu.memory_space<vmem>>, %arg14: memref<1x64xf32, #tpu.memory_space<vmem>>, %arg15: memref<64x32xbf16, #tpu.memory_space<vmem>>, %arg16: memref<1x32xf32, #tpu.memory_space<vmem>>, %arg17: memref<1x32xf32, #tpu.memory_space<vmem>>, %arg18: memref<1x32xf32, #tpu.memory_space<vmem>>, %arg19: memref<8x32xf32, #tpu.memory_space<vmem>>) attributes {dimension_semantics = [#tpu.dimension_semantics<parallel>], iteration_bounds = array<i64: 2>, scalar_prefetch = 1 : i64, scratch_operands = 0 : i64, tpu.core_type = #tpu.core_type<tc>, window_params = [{transform_indices = @transform_0, window_bounds = array<i64: 8, 32>}, {transform_indices = @transform_1, window_bounds = array<i64: 16, 32>}, {pipeline_mode = #tpu.pipeline_mode<synchronous>, transform_indices = @transform_2, window_bounds = array<i64: 32, 96>}, {pipeline_mode = #tpu.pipeline_mode<synchronous>, transform_indices = @transform_3, window_bounds = array<i64: 4, 8, 32>}, {pipeline_mode = #tpu.pipeline_mode<synchronous>, transform_indices = @transform_4, window_bounds = array<i64: 1, 32>}, {pipeline_mode = #tpu.pipeline_mode<synchronous>, transform_indices = @transform_5, window_bounds = array<i64: 1, 32>}, {pipeline_mode = #tpu.pipeline_mode<synchronous>, transform_indices = @transform_6, window_bounds = array<i64: 32, 32>}, {pipeline_mode = #tpu.pipeline_mode<synchronous>, transform_indices = @transform_7, window_bounds = array<i64: 32, 64>}, {pipeline_mode = #tpu.pipeline_mode<synchronous>, transform_indices = @transform_8, window_bounds = array<i64: 4, 8, 32>}, {pipeline_mode = #tpu.pipeline_mode<synchronous>, transform_indices = @transform_9, window_bounds = array<i64: 1, 32>}, {pipeline_mode = #tpu.pipeline_mode<synchronous>, transform_indices = @transform_10, window_bounds = array<i64: 1, 32>}, {pipeline_mode = #tpu.pipeline_mode<synchronous>, transform_indices = @transform_11, window_bounds = array<i64: 32, 64>}, {pipeline_mode = #tpu.pipeline_mode<synchronous>, transform_indices = @transform_12, window_bounds = array<i64: 1, 64>}, {pipeline_mode = #tpu.pipeline_mode<synchronous>, transform_indices = @transform_13, window_bounds = array<i64: 64, 32>}, {pipeline_mode = #tpu.pipeline_mode<synchronous>, transform_indices = @transform_14, window_bounds = array<i64: 1, 32>}, {pipeline_mode = #tpu.pipeline_mode<synchronous>, transform_indices = @transform_15, window_bounds = array<i64: 1, 32>}, {pipeline_mode = #tpu.pipeline_mode<synchronous>, transform_indices = @transform_16, window_bounds = array<i64: 1, 32>}, {transform_indices = @transform_17, window_bounds = array<i64: 8, 32>}]} {
    %c0 = arith.constant 0 : index
    %c0_0 = arith.constant 0 : index
    %0 = vector.load %arg2[%c0, %c0_0] : memref<8x32xf32, #tpu.memory_space<vmem>>, vector<8x32xf32>
    %c0_1 = arith.constant 0 : index
    %c0_2 = arith.constant 0 : index
    %1 = vector.load %arg3[%c0_1, %c0_2] : memref<16x32xf32, #tpu.memory_space<vmem>>, vector<16x32xf32>
    %2 = tpu.iota {dimensions = array<i32: 0>} : vector<8x8xi32>
    %3 = tpu.iota {dimensions = array<i32: 1>} : vector<8x8xi32>
    %4 = arith.cmpi sle, %3, %2 : vector<8x8xi32>
    %5 = vector.shape_cast %4 : vector<8x8xi1> to vector<1x8x8xi1>
    %c1_i32 = arith.constant 1 : i32
    %6 = arith.muli %arg0, %c1_i32 : i32
    %7 = tpu.iota {dimensions = array<i32: 2>} : vector<1x1x16xi32>
    %8 = arith.index_cast %6 : i32 to index
    %9 = memref.load %arg1[%8] : memref<2xi32, #tpu.memory_space<smem>>
    %10 = vector.broadcast %9 : i32 to vector<1x1x16xi32>
    %11 = arith.cmpi slt, %7, %10 : vector<1x1x16xi32>
    %12 = vector.shape_cast %11 : vector<1x1x16xi1> to vector<1x1x1x16xi1>
    %13 = vector.shape_cast %12 : vector<1x1x1x16xi1> to vector<1x1x1x16xi1>
    %14 = vector.broadcast %13 : vector<1x1x1x16xi1> to vector<4x1x1x16xi1>
    %15 = vector.shape_cast %14 : vector<4x1x1x16xi1> to vector<4x1x16xi1>
    %16 = arith.truncf %0 : vector<8x32xf32> to vector<8x32xbf16>
    %c0_3 = arith.constant 0 : index
    %c0_4 = arith.constant 0 : index
    %17 = vector.load %arg4[%c0_3, %c0_4] : memref<32x96xbf16, #tpu.memory_space<vmem>>, vector<32x96xbf16>
    %cst = arith.constant dense<0.000000e+00> : vector<8x96xf32>
    %18 = tpu.matmul %16, %17, %cst {dimension_numbers = #tpu.dot_dimension_numbers<[1], [0], [0], [1], [0, 0, 1, 1], [], []>} : vector<8x32xbf16>, vector<32x96xbf16>, vector<8x96xf32> -> vector<8x96xf32>
    %19 = arith.truncf %18 : vector<8x96xf32> to vector<8x96xbf16>
    %20 = vector.extract_strided_slice %19 {offsets = [0, 0], sizes = [8, 32], strides = [1, 1]} : vector<8x96xbf16> to vector<8x32xbf16>
    %21 = vector.shape_cast %20 : vector<8x32xbf16> to vector<1x8x32xbf16>
    %22 = vector.extract_strided_slice %21 {offsets = [0, 0, 0], sizes = [1, 8, 8], strides = [1, 1, 1]} : vector<1x8x32xbf16> to vector<1x8x8xbf16>
    %23 = vector.shape_cast %22 : vector<1x8x8xbf16> to vector<1x1x8x8xbf16>
    %24 = vector.extract_strided_slice %21 {offsets = [0, 0, 8], sizes = [1, 8, 8], strides = [1, 1, 1]} : vector<1x8x32xbf16> to vector<1x8x8xbf16>
    %25 = vector.shape_cast %24 : vector<1x8x8xbf16> to vector<1x1x8x8xbf16>
    %26 = vector.extract_strided_slice %21 {offsets = [0, 0, 16], sizes = [1, 8, 8], strides = [1, 1, 1]} : vector<1x8x32xbf16> to vector<1x8x8xbf16>
    %27 = vector.shape_cast %26 : vector<1x8x8xbf16> to vector<1x1x8x8xbf16>
    %28 = vector.extract_strided_slice %21 {offsets = [0, 0, 24], sizes = [1, 8, 8], strides = [1, 1, 1]} : vector<1x8x32xbf16> to vector<1x8x8xbf16>
    %29 = vector.shape_cast %28 : vector<1x8x8xbf16> to vector<1x1x8x8xbf16>
    %30 = tpu.concatenate %23, %25, %27, %29 in 0 : vector<1x1x8x8xbf16>, vector<1x1x8x8xbf16>, vector<1x1x8x8xbf16>, vector<1x1x8x8xbf16> -> vector<4x1x8x8xbf16>
    %31 = vector.shape_cast %30 : vector<4x1x8x8xbf16> to vector<4x8x8xbf16>
    %32 = vector.extract_strided_slice %19 {offsets = [0, 32], sizes = [8, 32], strides = [1, 1]} : vector<8x96xbf16> to vector<8x32xbf16>
    %33 = vector.shape_cast %32 : vector<8x32xbf16> to vector<1x8x32xbf16>
    %34 = vector.extract_strided_slice %33 {offsets = [0, 0, 0], sizes = [1, 8, 8], strides = [1, 1, 1]} : vector<1x8x32xbf16> to vector<1x8x8xbf16>
    %35 = vector.shape_cast %34 : vector<1x8x8xbf16> to vector<1x1x8x8xbf16>
    %36 = vector.extract_strided_slice %33 {offsets = [0, 0, 8], sizes = [1, 8, 8], strides = [1, 1, 1]} : vector<1x8x32xbf16> to vector<1x8x8xbf16>
    %37 = vector.shape_cast %36 : vector<1x8x8xbf16> to vector<1x1x8x8xbf16>
    %38 = vector.extract_strided_slice %33 {offsets = [0, 0, 16], sizes = [1, 8, 8], strides = [1, 1, 1]} : vector<1x8x32xbf16> to vector<1x8x8xbf16>
    %39 = vector.shape_cast %38 : vector<1x8x8xbf16> to vector<1x1x8x8xbf16>
    %40 = vector.extract_strided_slice %33 {offsets = [0, 0, 24], sizes = [1, 8, 8], strides = [1, 1, 1]} : vector<1x8x32xbf16> to vector<1x8x8xbf16>
    %41 = vector.shape_cast %40 : vector<1x8x8xbf16> to vector<1x1x8x8xbf16>
    %42 = tpu.concatenate %35, %37, %39, %41 in 0 : vector<1x1x8x8xbf16>, vector<1x1x8x8xbf16>, vector<1x1x8x8xbf16>, vector<1x1x8x8xbf16> -> vector<4x1x8x8xbf16>
    %43 = vector.shape_cast %42 : vector<4x1x8x8xbf16> to vector<4x8x8xbf16>
    %44 = vector.extract_strided_slice %19 {offsets = [0, 64], sizes = [8, 32], strides = [1, 1]} : vector<8x96xbf16> to vector<8x32xbf16>
    %45 = vector.shape_cast %44 : vector<8x32xbf16> to vector<1x8x32xbf16>
    %46 = vector.extract_strided_slice %45 {offsets = [0, 0, 0], sizes = [1, 8, 8], strides = [1, 1, 1]} : vector<1x8x32xbf16> to vector<1x8x8xbf16>
    %47 = vector.shape_cast %46 : vector<1x8x8xbf16> to vector<1x1x8x8xbf16>
    %48 = vector.extract_strided_slice %45 {offsets = [0, 0, 8], sizes = [1, 8, 8], strides = [1, 1, 1]} : vector<1x8x32xbf16> to vector<1x8x8xbf16>
    %49 = vector.shape_cast %48 : vector<1x8x8xbf16> to vector<1x1x8x8xbf16>
    %50 = vector.extract_strided_slice %45 {offsets = [0, 0, 16], sizes = [1, 8, 8], strides = [1, 1, 1]} : vector<1x8x32xbf16> to vector<1x8x8xbf16>
    %51 = vector.shape_cast %50 : vector<1x8x8xbf16> to vector<1x1x8x8xbf16>
    %52 = vector.extract_strided_slice %45 {offsets = [0, 0, 24], sizes = [1, 8, 8], strides = [1, 1, 1]} : vector<1x8x32xbf16> to vector<1x8x8xbf16>
    %53 = vector.shape_cast %52 : vector<1x8x8xbf16> to vector<1x1x8x8xbf16>
    %54 = tpu.concatenate %47, %49, %51, %53 in 0 : vector<1x1x8x8xbf16>, vector<1x1x8x8xbf16>, vector<1x1x8x8xbf16>, vector<1x1x8x8xbf16> -> vector<4x1x8x8xbf16>
    %55 = vector.shape_cast %54 : vector<4x1x8x8xbf16> to vector<4x8x8xbf16>
    %c0_5 = arith.constant 0 : index
    %c0_6 = arith.constant 0 : index
    %c0_7 = arith.constant 0 : index
    %56 = vector.load %arg5[%c0_5, %c0_6, %c0_7] : memref<4x8x32xbf16, #tpu.memory_space<vmem>>, vector<4x8x32xbf16>
    %cst_8 = arith.constant dense<0.000000e+00> : vector<4x8x8xf32>
    %57 = tpu.matmul %31, %43, %cst_8 {dimension_numbers = #tpu.dot_dimension_numbers<[2], [2], [1], [1], [0, 0, 0, 1, 1, 1], [0], [0]>} : vector<4x8x8xbf16>, vector<4x8x8xbf16>, vector<4x8x8xf32> -> vector<4x8x8xf32>
    %cst_9 = arith.constant 0.353553385 : f32
    %58 = vector.broadcast %cst_9 : f32 to vector<4x8x8xf32>
    %59 = arith.mulf %57, %58 : vector<4x8x8xf32>
    %cst_10 = arith.constant -1.000000e+06 : f32
    %60 = vector.shape_cast %5 : vector<1x8x8xi1> to vector<1x8x8xi1>
    %61 = vector.broadcast %60 : vector<1x8x8xi1> to vector<4x8x8xi1>
    %62 = vector.broadcast %cst_10 : f32 to vector<4x8x8xf32>
    %63 = arith.select %61, %59, %62 : vector<4x8x8xi1>, vector<4x8x8xf32>
    %cst_11 = arith.constant dense<0xFF800000> : vector<4x8xf32>
    %64 = vector.multi_reduction <maximumf>, %63, %cst_11 [2] : vector<4x8x8xf32> to vector<4x8xf32>
    %65 = vector.shape_cast %64 : vector<4x8xf32> to vector<4x8x1xf32>
    %66 = vector.broadcast %65 : vector<4x8x1xf32> to vector<4x8x8xf32>
    %67 = arith.subf %63, %66 : vector<4x8x8xf32>
    %68 = math.exp %67 : vector<4x8x8xf32>
    %cst_12 = arith.constant dense<0.000000e+00> : vector<4x8xf32>
    %69 = vector.multi_reduction <add>, %68, %cst_12 [2] : vector<4x8x8xf32> to vector<4x8xf32>
    %70 = vector.shape_cast %69 : vector<4x8xf32> to vector<4x8x1xf32>
    %71 = tpu.reciprocal %70 {approx = true} : vector<4x8x1xf32> -> vector<4x8x1xf32>
    %72 = vector.broadcast %71 : vector<4x8x1xf32> to vector<4x8x8xf32>
    %73 = arith.mulf %68, %72 : vector<4x8x8xf32>
    %74 = arith.truncf %73 : vector<4x8x8xf32> to vector<4x8x8xbf16>
    %cst_13 = arith.constant dense<0.000000e+00> : vector<4x8x8xf32>
    %75 = tpu.matmul %74, %55, %cst_13 {dimension_numbers = #tpu.dot_dimension_numbers<[2], [1], [1], [2], [0, 0, 0, 1, 1, 2], [0], [0]>} : vector<4x8x8xbf16>, vector<4x8x8xbf16>, vector<4x8x8xf32> -> vector<4x8x8xf32>
    %76 = arith.truncf %75 : vector<4x8x8xf32> to vector<4x8x8xbf16>
    %cst_14 = arith.constant dense<0.000000e+00> : vector<4x8x32xf32>
    %77 = tpu.matmul %76, %56, %cst_14 {dimension_numbers = #tpu.dot_dimension_numbers<[2], [1], [1], [2], [0, 0, 0, 1, 1, 2], [0], [0]>} : vector<4x8x8xbf16>, vector<4x8x32xbf16>, vector<4x8x32xf32> -> vector<4x8x32xf32>
    %cst_15 = arith.constant dense<0.000000e+00> : vector<8x32xf32>
    %78 = vector.multi_reduction <add>, %77, %cst_15 [0] : vector<4x8x32xf32> to vector<8x32xf32>
    %79 = arith.addf %78, %0 : vector<8x32xf32>
    %c0_16 = arith.constant 0 : index
    %c0_17 = arith.constant 0 : index
    %80 = vector.load %arg6[%c0_16, %c0_17] : memref<1x32xf32, #tpu.memory_space<vmem>>, vector<1x32xf32>
    %c0_18 = arith.constant 0 : index
    %c0_19 = arith.constant 0 : index
    %81 = vector.load %arg7[%c0_18, %c0_19] : memref<1x32xf32, #tpu.memory_space<vmem>>, vector<1x32xf32>
    %cst_20 = arith.constant dense<0.000000e+00> : vector<8xf32>
    %82 = vector.multi_reduction <add>, %79, %cst_20 [1] : vector<8x32xf32> to vector<8xf32>
    %83 = vector.shape_cast %82 : vector<8xf32> to vector<8x1xf32>
    %cst_21 = arith.constant 3.200000e+01 : f32
    %84 = vector.broadcast %cst_21 : f32 to vector<8x1xf32>
    %85 = arith.divf %83, %84 : vector<8x1xf32>
    %86 = vector.broadcast %85 : vector<8x1xf32> to vector<8x32xf32>
    %87 = arith.subf %79, %86 : vector<8x32xf32>
    %88 = vector.broadcast %85 : vector<8x1xf32> to vector<8x32xf32>
    %89 = arith.subf %79, %88 : vector<8x32xf32>
    %90 = arith.mulf %87, %89 : vector<8x32xf32>
    %cst_22 = arith.constant dense<0.000000e+00> : vector<8xf32>
    %91 = vector.multi_reduction <add>, %90, %cst_22 [1] : vector<8x32xf32> to vector<8xf32>
    %92 = vector.shape_cast %91 : vector<8xf32> to vector<8x1xf32>
    %cst_23 = arith.constant 3.200000e+01 : f32
    %93 = vector.broadcast %cst_23 : f32 to vector<8x1xf32>
    %94 = arith.divf %92, %93 : vector<8x1xf32>
    %95 = vector.broadcast %85 : vector<8x1xf32> to vector<8x32xf32>
    %96 = arith.subf %79, %95 : vector<8x32xf32>
    %cst_24 = arith.constant 9.99999974E-6 : f32
    %97 = vector.broadcast %cst_24 : f32 to vector<8x1xf32>
    %98 = arith.addf %94, %97 : vector<8x1xf32>
    %99 = math.rsqrt %98 : vector<8x1xf32>
    %100 = vector.broadcast %99 : vector<8x1xf32> to vector<8x32xf32>
    %101 = arith.mulf %96, %100 : vector<8x32xf32>
    %102 = vector.broadcast %80 : vector<1x32xf32> to vector<8x32xf32>
    %103 = arith.mulf %101, %102 : vector<8x32xf32>
    %104 = vector.broadcast %81 : vector<1x32xf32> to vector<8x32xf32>
    %105 = arith.addf %103, %104 : vector<8x32xf32>
    %106 = arith.truncf %105 : vector<8x32xf32> to vector<8x32xbf16>
    %107 = arith.truncf %1 : vector<16x32xf32> to vector<16x32xbf16>
    %c0_25 = arith.constant 0 : index
    %c0_26 = arith.constant 0 : index
    %108 = vector.load %arg8[%c0_25, %c0_26] : memref<32x32xbf16, #tpu.memory_space<vmem>>, vector<32x32xbf16>
    %cst_27 = arith.constant dense<0.000000e+00> : vector<8x32xf32>
    %109 = tpu.matmul %106, %108, %cst_27 {dimension_numbers = #tpu.dot_dimension_numbers<[1], [0], [0], [1], [0, 0, 1, 1], [], []>} : vector<8x32xbf16>, vector<32x32xbf16>, vector<8x32xf32> -> vector<8x32xf32>
    %110 = arith.truncf %109 : vector<8x32xf32> to vector<8x32xbf16>
    %c0_28 = arith.constant 0 : index
    %c0_29 = arith.constant 0 : index
    %111 = vector.load %arg9[%c0_28, %c0_29] : memref<32x64xbf16, #tpu.memory_space<vmem>>, vector<32x64xbf16>
    %cst_30 = arith.constant dense<0.000000e+00> : vector<16x64xf32>
    %112 = tpu.matmul %107, %111, %cst_30 {dimension_numbers = #tpu.dot_dimension_numbers<[1], [0], [0], [1], [0, 0, 1, 1], [], []>} : vector<16x32xbf16>, vector<32x64xbf16>, vector<16x64xf32> -> vector<16x64xf32>
    %113 = arith.truncf %112 : vector<16x64xf32> to vector<16x64xbf16>
    %114 = vector.shape_cast %110 : vector<8x32xbf16> to vector<1x8x32xbf16>
    %115 = vector.extract_strided_slice %114 {offsets = [0, 0, 0], sizes = [1, 8, 8], strides = [1, 1, 1]} : vector<1x8x32xbf16> to vector<1x8x8xbf16>
    %116 = vector.shape_cast %115 : vector<1x8x8xbf16> to vector<1x1x8x8xbf16>
    %117 = vector.extract_strided_slice %114 {offsets = [0, 0, 8], sizes = [1, 8, 8], strides = [1, 1, 1]} : vector<1x8x32xbf16> to vector<1x8x8xbf16>
    %118 = vector.shape_cast %117 : vector<1x8x8xbf16> to vector<1x1x8x8xbf16>
    %119 = vector.extract_strided_slice %114 {offsets = [0, 0, 16], sizes = [1, 8, 8], strides = [1, 1, 1]} : vector<1x8x32xbf16> to vector<1x8x8xbf16>
    %120 = vector.shape_cast %119 : vector<1x8x8xbf16> to vector<1x1x8x8xbf16>
    %121 = vector.extract_strided_slice %114 {offsets = [0, 0, 24], sizes = [1, 8, 8], strides = [1, 1, 1]} : vector<1x8x32xbf16> to vector<1x8x8xbf16>
    %122 = vector.shape_cast %121 : vector<1x8x8xbf16> to vector<1x1x8x8xbf16>
    %123 = tpu.concatenate %116, %118, %120, %122 in 0 : vector<1x1x8x8xbf16>, vector<1x1x8x8xbf16>, vector<1x1x8x8xbf16>, vector<1x1x8x8xbf16> -> vector<4x1x8x8xbf16>
    %124 = vector.shape_cast %123 : vector<4x1x8x8xbf16> to vector<4x8x8xbf16>
    %125 = vector.extract_strided_slice %113 {offsets = [0, 0], sizes = [16, 32], strides = [1, 1]} : vector<16x64xbf16> to vector<16x32xbf16>
    %126 = vector.shape_cast %125 : vector<16x32xbf16> to vector<1x16x32xbf16>
    %127 = vector.extract_strided_slice %126 {offsets = [0, 0, 0], sizes = [1, 16, 8], strides = [1, 1, 1]} : vector<1x16x32xbf16> to vector<1x16x8xbf16>
    %128 = vector.shape_cast %127 : vector<1x16x8xbf16> to vector<1x1x16x8xbf16>
    %129 = vector.extract_strided_slice %126 {offsets = [0, 0, 8], sizes = [1, 16, 8], strides = [1, 1, 1]} : vector<1x16x32xbf16> to vector<1x16x8xbf16>
    %130 = vector.shape_cast %129 : vector<1x16x8xbf16> to vector<1x1x16x8xbf16>
    %131 = vector.extract_strided_slice %126 {offsets = [0, 0, 16], sizes = [1, 16, 8], strides = [1, 1, 1]} : vector<1x16x32xbf16> to vector<1x16x8xbf16>
    %132 = vector.shape_cast %131 : vector<1x16x8xbf16> to vector<1x1x16x8xbf16>
    %133 = vector.extract_strided_slice %126 {offsets = [0, 0, 24], sizes = [1, 16, 8], strides = [1, 1, 1]} : vector<1x16x32xbf16> to vector<1x16x8xbf16>
    %134 = vector.shape_cast %133 : vector<1x16x8xbf16> to vector<1x1x16x8xbf16>
    %135 = tpu.concatenate %128, %130, %132, %134 in 0 : vector<1x1x16x8xbf16>, vector<1x1x16x8xbf16>, vector<1x1x16x8xbf16>, vector<1x1x16x8xbf16> -> vector<4x1x16x8xbf16>
    %136 = vector.shape_cast %135 : vector<4x1x16x8xbf16> to vector<4x16x8xbf16>
    %137 = vector.extract_strided_slice %113 {offsets = [0, 32], sizes = [16, 32], strides = [1, 1]} : vector<16x64xbf16> to vector<16x32xbf16>
    %138 = vector.shape_cast %137 : vector<16x32xbf16> to vector<1x16x32xbf16>
    %139 = vector.extract_strided_slice %138 {offsets = [0, 0, 0], sizes = [1, 16, 8], strides = [1, 1, 1]} : vector<1x16x32xbf16> to vector<1x16x8xbf16>
    %140 = vector.shape_cast %139 : vector<1x16x8xbf16> to vector<1x1x16x8xbf16>
    %141 = vector.extract_strided_slice %138 {offsets = [0, 0, 8], sizes = [1, 16, 8], strides = [1, 1, 1]} : vector<1x16x32xbf16> to vector<1x16x8xbf16>
    %142 = vector.shape_cast %141 : vector<1x16x8xbf16> to vector<1x1x16x8xbf16>
    %143 = vector.extract_strided_slice %138 {offsets = [0, 0, 16], sizes = [1, 16, 8], strides = [1, 1, 1]} : vector<1x16x32xbf16> to vector<1x16x8xbf16>
    %144 = vector.shape_cast %143 : vector<1x16x8xbf16> to vector<1x1x16x8xbf16>
    %145 = vector.extract_strided_slice %138 {offsets = [0, 0, 24], sizes = [1, 16, 8], strides = [1, 1, 1]} : vector<1x16x32xbf16> to vector<1x16x8xbf16>
    %146 = vector.shape_cast %145 : vector<1x16x8xbf16> to vector<1x1x16x8xbf16>
    %147 = tpu.concatenate %140, %142, %144, %146 in 0 : vector<1x1x16x8xbf16>, vector<1x1x16x8xbf16>, vector<1x1x16x8xbf16>, vector<1x1x16x8xbf16> -> vector<4x1x16x8xbf16>
    %148 = vector.shape_cast %147 : vector<4x1x16x8xbf16> to vector<4x16x8xbf16>
    %c0_31 = arith.constant 0 : index
    %c0_32 = arith.constant 0 : index
    %c0_33 = arith.constant 0 : index
    %149 = vector.load %arg10[%c0_31, %c0_32, %c0_33] : memref<4x8x32xbf16, #tpu.memory_space<vmem>>, vector<4x8x32xbf16>
    %cst_34 = arith.constant dense<0.000000e+00> : vector<4x8x16xf32>
    %150 = tpu.matmul %124, %136, %cst_34 {dimension_numbers = #tpu.dot_dimension_numbers<[2], [2], [1], [1], [0, 0, 0, 1, 1, 1], [0], [0]>} : vector<4x8x8xbf16>, vector<4x16x8xbf16>, vector<4x8x16xf32> -> vector<4x8x16xf32>
    %cst_35 = arith.constant 0.353553385 : f32
    %151 = vector.broadcast %cst_35 : f32 to vector<4x8x16xf32>
    %152 = arith.mulf %150, %151 : vector<4x8x16xf32>
    %cst_36 = arith.constant -1.000000e+06 : f32
    %153 = vector.shape_cast %15 : vector<4x1x16xi1> to vector<4x1x16xi1>
    %154 = vector.broadcast %153 : vector<4x1x16xi1> to vector<4x8x16xi1>
    %155 = vector.broadcast %cst_36 : f32 to vector<4x8x16xf32>
    %156 = arith.select %154, %152, %155 : vector<4x8x16xi1>, vector<4x8x16xf32>
    %cst_37 = arith.constant dense<0xFF800000> : vector<4x8xf32>
    %157 = vector.multi_reduction <maximumf>, %156, %cst_37 [2] : vector<4x8x16xf32> to vector<4x8xf32>
    %158 = vector.shape_cast %157 : vector<4x8xf32> to vector<4x8x1xf32>
    %159 = vector.broadcast %158 : vector<4x8x1xf32> to vector<4x8x16xf32>
    %160 = arith.subf %156, %159 : vector<4x8x16xf32>
    %161 = math.exp %160 : vector<4x8x16xf32>
    %cst_38 = arith.constant dense<0.000000e+00> : vector<4x8xf32>
    %162 = vector.multi_reduction <add>, %161, %cst_38 [2] : vector<4x8x16xf32> to vector<4x8xf32>
    %163 = vector.shape_cast %162 : vector<4x8xf32> to vector<4x8x1xf32>
    %164 = tpu.reciprocal %163 {approx = true} : vector<4x8x1xf32> -> vector<4x8x1xf32>
    %165 = vector.broadcast %164 : vector<4x8x1xf32> to vector<4x8x16xf32>
    %166 = arith.mulf %161, %165 : vector<4x8x16xf32>
    %167 = arith.truncf %166 : vector<4x8x16xf32> to vector<4x8x16xbf16>
    %cst_39 = arith.constant dense<0.000000e+00> : vector<4x8x8xf32>
    %168 = tpu.matmul %167, %148, %cst_39 {dimension_numbers = #tpu.dot_dimension_numbers<[2], [1], [1], [2], [0, 0, 0, 1, 1, 2], [0], [0]>} : vector<4x8x16xbf16>, vector<4x16x8xbf16>, vector<4x8x8xf32> -> vector<4x8x8xf32>
    %169 = arith.truncf %168 : vector<4x8x8xf32> to vector<4x8x8xbf16>
    %cst_40 = arith.constant dense<0.000000e+00> : vector<4x8x32xf32>
    %170 = tpu.matmul %169, %149, %cst_40 {dimension_numbers = #tpu.dot_dimension_numbers<[2], [1], [1], [2], [0, 0, 0, 1, 1, 2], [0], [0]>} : vector<4x8x8xbf16>, vector<4x8x32xbf16>, vector<4x8x32xf32> -> vector<4x8x32xf32>
    %cst_41 = arith.constant dense<0.000000e+00> : vector<8x32xf32>
    %171 = vector.multi_reduction <add>, %170, %cst_41 [0] : vector<4x8x32xf32> to vector<8x32xf32>
    %172 = arith.addf %171, %105 : vector<8x32xf32>
    %c0_42 = arith.constant 0 : index
    %c0_43 = arith.constant 0 : index
    %173 = vector.load %arg11[%c0_42, %c0_43] : memref<1x32xf32, #tpu.memory_space<vmem>>, vector<1x32xf32>
    %c0_44 = arith.constant 0 : index
    %c0_45 = arith.constant 0 : index
    %174 = vector.load %arg12[%c0_44, %c0_45] : memref<1x32xf32, #tpu.memory_space<vmem>>, vector<1x32xf32>
    %cst_46 = arith.constant dense<0.000000e+00> : vector<8xf32>
    %175 = vector.multi_reduction <add>, %172, %cst_46 [1] : vector<8x32xf32> to vector<8xf32>
    %176 = vector.shape_cast %175 : vector<8xf32> to vector<8x1xf32>
    %cst_47 = arith.constant 3.200000e+01 : f32
    %177 = vector.broadcast %cst_47 : f32 to vector<8x1xf32>
    %178 = arith.divf %176, %177 : vector<8x1xf32>
    %179 = vector.broadcast %178 : vector<8x1xf32> to vector<8x32xf32>
    %180 = arith.subf %172, %179 : vector<8x32xf32>
    %181 = vector.broadcast %178 : vector<8x1xf32> to vector<8x32xf32>
    %182 = arith.subf %172, %181 : vector<8x32xf32>
    %183 = arith.mulf %180, %182 : vector<8x32xf32>
    %cst_48 = arith.constant dense<0.000000e+00> : vector<8xf32>
    %184 = vector.multi_reduction <add>, %183, %cst_48 [1] : vector<8x32xf32> to vector<8xf32>
    %185 = vector.shape_cast %184 : vector<8xf32> to vector<8x1xf32>
    %cst_49 = arith.constant 3.200000e+01 : f32
    %186 = vector.broadcast %cst_49 : f32 to vector<8x1xf32>
    %187 = arith.divf %185, %186 : vector<8x1xf32>
    %188 = vector.broadcast %178 : vector<8x1xf32> to vector<8x32xf32>
    %189 = arith.subf %172, %188 : vector<8x32xf32>
    %cst_50 = arith.constant 9.99999974E-6 : f32
    %190 = vector.broadcast %cst_50 : f32 to vector<8x1xf32>
    %191 = arith.addf %187, %190 : vector<8x1xf32>
    %192 = math.rsqrt %191 : vector<8x1xf32>
    %193 = vector.broadcast %192 : vector<8x1xf32> to vector<8x32xf32>
    %194 = arith.mulf %189, %193 : vector<8x32xf32>
    %195 = vector.broadcast %173 : vector<1x32xf32> to vector<8x32xf32>
    %196 = arith.mulf %194, %195 : vector<8x32xf32>
    %197 = vector.broadcast %174 : vector<1x32xf32> to vector<8x32xf32>
    %198 = arith.addf %196, %197 : vector<8x32xf32>
    %199 = arith.truncf %198 : vector<8x32xf32> to vector<8x32xbf16>
    %c0_51 = arith.constant 0 : index
    %c0_52 = arith.constant 0 : index
    %200 = vector.load %arg13[%c0_51, %c0_52] : memref<32x64xbf16, #tpu.memory_space<vmem>>, vector<32x64xbf16>
    %cst_53 = arith.constant dense<0.000000e+00> : vector<8x64xf32>
    %201 = tpu.matmul %199, %200, %cst_53 {dimension_numbers = #tpu.dot_dimension_numbers<[1], [0], [0], [1], [0, 0, 1, 1], [], []>} : vector<8x32xbf16>, vector<32x64xbf16>, vector<8x64xf32> -> vector<8x64xf32>
    %c0_54 = arith.constant 0 : index
    %c0_55 = arith.constant 0 : index
    %202 = vector.load %arg14[%c0_54, %c0_55] : memref<1x64xf32, #tpu.memory_space<vmem>>, vector<1x64xf32>
    %203 = vector.broadcast %202 : vector<1x64xf32> to vector<8x64xf32>
    %204 = arith.addf %201, %203 : vector<8x64xf32>
    %cst_56 = arith.constant 0.000000e+00 : f32
    %205 = vector.broadcast %cst_56 : f32 to vector<8x64xf32>
    %206 = arith.maximumf %204, %205 : vector<8x64xf32>
    %207 = arith.truncf %206 : vector<8x64xf32> to vector<8x64xbf16>
    %c0_57 = arith.constant 0 : index
    %c0_58 = arith.constant 0 : index
    %208 = vector.load %arg15[%c0_57, %c0_58] : memref<64x32xbf16, #tpu.memory_space<vmem>>, vector<64x32xbf16>
    %cst_59 = arith.constant dense<0.000000e+00> : vector<8x32xf32>
    %209 = tpu.matmul %207, %208, %cst_59 {dimension_numbers = #tpu.dot_dimension_numbers<[1], [0], [0], [1], [0, 0, 1, 1], [], []>} : vector<8x64xbf16>, vector<64x32xbf16>, vector<8x32xf32> -> vector<8x32xf32>
    %c0_60 = arith.constant 0 : index
    %c0_61 = arith.constant 0 : index
    %210 = vector.load %arg16[%c0_60, %c0_61] : memref<1x32xf32, #tpu.memory_space<vmem>>, vector<1x32xf32>
    %211 = vector.broadcast %210 : vector<1x32xf32> to vector<8x32xf32>
    %212 = arith.addf %209, %211 : vector<8x32xf32>
    %213 = arith.addf %212, %198 : vector<8x32xf32>
    %c0_62 = arith.constant 0 : index
    %c0_63 = arith.constant 0 : index
    %214 = vector.load %arg17[%c0_62, %c0_63] : memref<1x32xf32, #tpu.memory_space<vmem>>, vector<1x32xf32>
    %c0_64 = arith.constant 0 : index
    %c0_65 = arith.constant 0 : index
    %215 = vector.load %arg18[%c0_64, %c0_65] : memref<1x32xf32, #tpu.memory_space<vmem>>, vector<1x32xf32>
    %cst_66 = arith.constant dense<0.000000e+00> : vector<8xf32>
    %216 = vector.multi_reduction <add>, %213, %cst_66 [1] : vector<8x32xf32> to vector<8xf32>
    %217 = vector.shape_cast %216 : vector<8xf32> to vector<8x1xf32>
    %cst_67 = arith.constant 3.200000e+01 : f32
    %218 = vector.broadcast %cst_67 : f32 to vector<8x1xf32>
    %219 = arith.divf %217, %218 : vector<8x1xf32>
    %220 = vector.broadcast %219 : vector<8x1xf32> to vector<8x32xf32>
    %221 = arith.subf %213, %220 : vector<8x32xf32>
    %222 = vector.broadcast %219 : vector<8x1xf32> to vector<8x32xf32>
    %223 = arith.subf %213, %222 : vector<8x32xf32>
    %224 = arith.mulf %221, %223 : vector<8x32xf32>
    %cst_68 = arith.constant dense<0.000000e+00> : vector<8xf32>
    %225 = vector.multi_reduction <add>, %224, %cst_68 [1] : vector<8x32xf32> to vector<8xf32>
    %226 = vector.shape_cast %225 : vector<8xf32> to vector<8x1xf32>
    %cst_69 = arith.constant 3.200000e+01 : f32
    %227 = vector.broadcast %cst_69 : f32 to vector<8x1xf32>
    %228 = arith.divf %226, %227 : vector<8x1xf32>
    %229 = vector.broadcast %219 : vector<8x1xf32> to vector<8x32xf32>
    %230 = arith.subf %213, %229 : vector<8x32xf32>
    %cst_70 = arith.constant 9.99999974E-6 : f32
    %231 = vector.broadcast %cst_70 : f32 to vector<8x1xf32>
    %232 = arith.addf %228, %231 : vector<8x1xf32>
    %233 = math.rsqrt %232 : vector<8x1xf32>
    %234 = vector.broadcast %233 : vector<8x1xf32> to vector<8x32xf32>
    %235 = arith.mulf %230, %234 : vector<8x32xf32>
    %236 = vector.broadcast %214 : vector<1x32xf32> to vector<8x32xf32>
    %237 = arith.mulf %235, %236 : vector<8x32xf32>
    %238 = vector.broadcast %215 : vector<1x32xf32> to vector<8x32xf32>
    %239 = arith.addf %237, %238 : vector<8x32xf32>
    %c0_71 = arith.constant 0 : index
    %c0_72 = arith.constant 0 : index
    %240 = vector.load %arg19[%c0_71, %c0_72] : memref<8x32xf32, #tpu.memory_space<vmem>>, vector<8x32xf32>
    tpu.vector_store %arg19[%c0_71, %c0_72], %239 {strides = array<i32>} : memref<8x32xf32, #tpu.memory_space<vmem>>, vector<8x32xf32>,
    return
  }
  func.func @transform_0(%arg0: i32, %arg1: memref<2xi32, #tpu.memory_space<smem>>) -> (i32, i32) {
    %c0_i32 = arith.constant 0 : i32
    %c0_i32_0 = arith.constant 0 : i32
    return %arg0, %c0_i32 : i32, i32
  }
  func.func @transform_1(%arg0: i32, %arg1: memref<2xi32, #tpu.memory_space<smem>>) -> (i32, i32) {
    %c0_i32 = arith.constant 0 : i32
    %c0_i32_0 = arith.constant 0 : i32
    return %arg0, %c0_i32 : i32, i32
  }
  func.func @transform_2(%arg0: i32, %arg1: memref<2xi32, #tpu.memory_space<smem>>) -> (i32, i32) {
    %c0_i32 = arith.constant 0 : i32
    %c0_i32_0 = arith.constant 0 : i32
    %c0_i32_1 = arith.constant 0 : i32
    return %c0_i32, %c0_i32_0 : i32, i32
  }
  func.func @transform_3(%arg0: i32, %arg1: memref<2xi32, #tpu.memory_space<smem>>) -> (i32, i32, i32) {
    %c0_i32 = arith.constant 0 : i32
    %c0_i32_0 = arith.constant 0 : i32
    %c0_i32_1 = arith.constant 0 : i32
    %c0_i32_2 = arith.constant 0 : i32
    return %c0_i32, %c0_i32_0, %c0_i32_1 : i32, i32, i32
  }
  func.func @transform_4(%arg0: i32, %arg1: memref<2xi32, #tpu.memory_space<smem>>) -> (i32, i32) {
    %c0_i32 = arith.constant 0 : i32
    %c0_i32_0 = arith.constant 0 : i32
    %c0_i32_1 = arith.constant 0 : i32
    return %c0_i32, %c0_i32_0 : i32, i32
  }
  func.func @transform_5(%arg0: i32, %arg1: memref<2xi32, #tpu.memory_space<smem>>) -> (i32, i32) {
    %c0_i32 = arith.constant 0 : i32
    %c0_i32_0 = arith.constant 0 : i32
    %c0_i32_1 = arith.constant 0 : i32
    return %c0_i32, %c0_i32_0 : i32, i32
  }
  func.func @transform_6(%arg0: i32, %arg1: memref<2xi32, #tpu.memory_space<smem>>) -> (i32, i32) {
    %c0_i32 = arith.constant 0 : i32
    %c0_i32_0 = arith.constant 0 : i32
    %c0_i32_1 = arith.constant 0 : i32
    return %c0_i32, %c0_i32_0 : i32, i32
  }
  func.func @transform_7(%arg0: i32, %arg1: memref<2xi32, #tpu.memory_space<smem>>) -> (i32, i32) {
    %c0_i32 = arith.constant 0 : i32
    %c0_i32_0 = arith.constant 0 : i32
    %c0_i32_1 = arith.constant 0 : i32
    return %c0_i32, %c0_i32_0 : i32, i32
  }
  func.func @transform_8(%arg0: i32, %arg1: memref<2xi32, #tpu.memory_space<smem>>) -> (i32, i32, i32) {
    %c0_i32 = arith.constant 0 : i32
    %c0_i32_0 = arith.constant 0 : i32
    %c0_i32_1 = arith.constant 0 : i32
    %c0_i32_2 = arith.constant 0 : i32
    return %c0_i32, %c0_i32_0, %c0_i32_1 : i32, i32, i32
  }
  func.func @transform_9(%arg0: i32, %arg1: memref<2xi32, #tpu.memory_space<smem>>) -> (i32, i32) {
    %c0_i32 = arith.constant 0 : i32
    %c0_i32_0 = arith.constant 0 : i32
    %c0_i32_1 = arith.constant 0 : i32
    return %c0_i32, %c0_i32_0 : i32, i32
  }
  func.func @transform_10(%arg0: i32, %arg1: memref<2xi32, #tpu.memory_space<smem>>) -> (i32, i32) {
    %c0_i32 = arith.constant 0 : i32
    %c0_i32_0 = arith.constant 0 : i32
    %c0_i32_1 = arith.constant 0 : i32
    return %c0_i32, %c0_i32_0 : i32, i32
  }
  func.func @transform_11(%arg0: i32, %arg1: memref<2xi32, #tpu.memory_space<smem>>) -> (i32, i32) {
    %c0_i32 = arith.constant 0 : i32
    %c0_i32_0 = arith.constant 0 : i32
    %c0_i32_1 = arith.constant 0 : i32
    return %c0_i32, %c0_i32_0 : i32, i32
  }
  func.func @transform_12(%arg0: i32, %arg1: memref<2xi32, #tpu.memory_space<smem>>) -> (i32, i32) {
    %c0_i32 = arith.constant 0 : i32
    %c0_i32_0 = arith.constant 0 : i32
    %c0_i32_1 = arith.constant 0 : i32
    return %c0_i32, %c0_i32_0 : i32, i32
  }
  func.func @transform_13(%arg0: i32, %arg1: memref<2xi32, #tpu.memory_space<smem>>) -> (i32, i32) {
    %c0_i32 = arith.constant 0 : i32
    %c0_i32_0 = arith.constant 0 : i32
    %c0_i32_1 = arith.constant 0 : i32
    return %c0_i32, %c0_i32_0 : i32, i32
  }
  func.func @transform_14(%arg0: i32, %arg1: memref<2xi32, #tpu.memory_space<smem>>) -> (i32, i32) {
    %c0_i32 = arith.constant 0 : i32
    %c0_i32_0 = arith.constant 0 : i32
    %c0_i32_1 = arith.constant 0 : i32
    return %c0_i32, %c0_i32_0 : i32, i32
  }
  func.func @transform_15(%arg0: i32, %arg1: memref<2xi32, #tpu.memory_space<smem>>) -> (i32, i32) {
    %c0_i32 = arith.constant 0 : i32
    %c0_i32_0 = arith.constant 0 : i32
    %c0_i32_1 = arith.constant 0 : i32
    return %c0_i32, %c0_i32_0 : i32, i32
  }
  func.func @transform_16(%arg0: i32, %arg1: memref<2xi32, #tpu.memory_space<smem>>) -> (i32, i32) {
    %c0_i32 = arith.constant 0 : i32
    %c0_i32_0 = arith.constant 0 : i32
    %c0_i32_1 = arith.constant 0 : i32
    return %c0_i32, %c0_i32_0 : i32, i32
  }
  func.func @transform_17(%arg0: i32, %arg1: memref<2xi32, #tpu.memory_space<smem>>) -> (i32, i32) {
    %c0_i32 = arith.constant 0 : i32
    %c0_i32_0 = arith.constant 0 : i32
    return %arg0, %c0_i32 : i32, i32
  }
}

</mosaic_0001>

<bundles_post_ra>
// kernel: tpu_custom_call.1
= control target key start
LH: loop header
LB: loop body
LE: loop exit
PB: predicated region body
PF: predicated region fallthrough
CT: control target
= control target key end

     0   :  { %s3883_s0 = inlined_call_operand.vmem [shape: s32[2], index: 0, kind: input, shape index: {}]   ;;  %s3884_s1 = inlined_call_operand.vmem [shape: f32[16,32], index: 1, kind: input, shape index: {}]   ;;  %s3885_s2 = inlined_call_operand.vmem [shape: f32[32,32], index: 2, kind: input, shape index: {}]   ;;  %s3886_s3 = inlined_call_operand.hbm [shape: bf16[32,96], index: 3, kind: input, shape index: {}]   ;;  %s3887_s4 = inlined_call_operand.hbm [shape: bf16[4,8,32], index: 4, kind: input, shape index: {}]   ;;  %s3888_s5 = inlined_call_operand.vmem [shape: f32[1,32], index: 5, kind: input, shape index: {}]   ;;  %s3889_s6 = inlined_call_operand.vmem [shape: f32[1,32], index: 6, kind: input, shape index: {}]   ;;  %s3890_s7 = inlined_call_operand.hbm [shape: bf16[32,32], index: 7, kind: input, shape index: {}]   ;;  %s3891_s8 = inlined_call_operand.hbm [shape: bf16[32,64], index: 8, kind: input, shape index: {}]   ;;  %s3892_s9 = inlined_call_operand.hbm [shape: bf16[4,8,32], index: 9, kind: input, shape index: {}]   ;;  %s3893_s10 = inlined_call_operand.vmem [shape: f32[1,32], index: 10, kind: input, shape index: {}]   ;;  %s3894_s11 = inlined_call_operand.vmem [shape: f32[1,32], index: 11, kind: input, shape index: {}]   ;;  %s3895_s12 = inlined_call_operand.hbm [shape: bf16[32,64], index: 12, kind: input, shape index: {}]   ;;  %s3896_s13 = inlined_call_operand.vmem [shape: f32[1,64], index: 13, kind: input, shape index: {}]   ;;  %s3897_s14 = inlined_call_operand.vmem [shape: bf16[64,32], index: 14, kind: input, shape index: {}]   ;;  %s3898_s15 = inlined_call_operand.vmem [shape: f32[1,32], index: 15, kind: input, shape index: {}]   ;;  %s3899_s16 = inlined_call_operand.vmem [shape: f32[1,32], index: 16, kind: input, shape index: {}]   ;;  %s3900_s17 = inlined_call_operand.vmem [shape: f32[1,32], index: 17, kind: input, shape index: {}]   ;;  %s3901_s18 = inlined_call_operand.hbm [shape: f32[16,32], index: 18, kind: output, shape index: {}]  }
   0x1   :  { %3909 = sst [smem:[#allocation28_spill]] %s3883_s0 }
   0x2   :  { %3910 = sst [smem:[#allocation29_spill]] %s3884_s1 }
   0x3   :  { %3911 = sst [smem:[#allocation30_spill]] %s3885_s2 }
   0x4   :  { %3912 = sst [smem:[#allocation31_spill]] %s3887_s4 }
   0x5   :  { %3913 = sst [smem:[#allocation32_spill]] %s3894_s11 }
   0x6   :  { %s3914_s29 = sld [smem:[#allocation28_spill]] }
   0xc   :  { %s23_s11 = sshll.u32 %s3914_s29, 4  ;;  %s24_s11 = int_to_ptr.vmem [resolvable:$true] %s23_s11 }
   0xd   :  { %s3025_s30 = scalar_lea.vmem %s24_s11, 16  ;;  %p3030_p1 = scmp.lt.s32.totalorder %s24_s11, %s24_s11 }
   0xe   :  { %p3026_p0 = scmp.ne.s32.totalorder %s24_s11, %s3025_s30  ;;  %p3031_p2 = scmp.lt.s32.totalorder %s3025_s30, %s3025_s30 }
  0x10   :  { %p3032_p3 = por %p3031_p2, %p3030_p1 }
  0x12   :  { %p3033_p4 = pnand %p3032_p3, %p3026_p0 }
  0x14   :  { %3036 = shalt.err (!%p3033_p4)  }
  0x15   :  { %s3273_s0 = smov [#allocation3]  }
  0x16   :  { %26 = dma.vmem_to_smem %s24_s11, 16, %s3273_s0, [#allocation2] }
  0x17   :  { %3235 = dma.done.wait [#allocation2], 16 }
  0x18   :  { %3236 = vsyncadd [#allocation2], 4294967280 }
  0x19   :  { %28 = sfence }
  0x1a   :  { %29 = vsyncpa [#allocation5], 0 }
  0x1b   :  { %30 = vsyncpa [#allocation8], 0 }
  0x1c   :  { %31 = vsyncpa [#allocation11], 0 }
  0x1d   :  { %32 = vsyncpa [#allocation14], 0 }
  0x1e   :  { %33 = vsyncpa [#allocation6], 0 }
  0x1f   :  { %35 = vsyncpa [#allocation6 + $0x1], 0  ;;  %s3388_s19 = smov 0   ;;  %s3390_s1 = smov 0  }
  0x20   :  { %s3392_s20 = smov 0   ;;  %s3394_s21 = smov 0  }
  0x21 LB: > { %3915 = sst [smem:[#allocation22_spill]] %s3259_s19  ;;  %s3409_s11 = sadd.s32 4294967295, %s3271_s21   ;;  %s3271_s21 = sphi %s3394_s21, %s3943_s21   ;;  %s3267_s20 = sphi %s3392_s20, %s3945_s20   ;;  %s3263_s1 = sphi %s3390_s1, %s3947_s1   ;;  %s3259_s19 = sphi %s3388_s19, %s3946_s19  }
  0x22   : > { %3916 = sst [smem:[#allocation23_spill]] %s3267_s20  ;;  %s2539_s22 = sadd.s32 4294967294, %s3271_s21  }
  0x23   : > { %3917 = sst [smem:[#allocation24_spill]] %s3271_s21  ;;  %s3413_s2 = sadd.s32 1, %s3271_s21  }
  0x24   : > { %3918 = sst [smem:[#allocation25_spill]] %s3413_s2  ;;  %s415_s23 = sadd.s32 1, %s3267_s20 }
  0x25   : > { %s412_s24 = ssub.s32 %s3271_s21, %s3413_s2  ;;  %p425_p5 = scmp.ne.s32.totalorder %s3267_s20, %s3263_s1 }
  0x26   : > { %p413_p6 = scmp.eq.s32.totalorder %s412_s24, 0  ;;  %p426_p7 = scmp.eq.s32.totalorder %s3409_s11, 1 }
  0x27   : > { %p431_p8 = scmp.ne.s32.totalorder %s3263_s1, %s3259_s19  ;;  %p432_p9 = scmp.eq.s32.totalorder %s2539_s22, 1 }
  0x28   : > { %s3424_s25 = scalar_select %p413_p6, %s3267_s20, %s415_s23  }
  0x29   : > { %p3426_p10 = por %p426_p7, %p425_p5  ;;  %p3430_p11 = por %p432_p9, %p431_p8 }
  0x2a   : > { %3919 = sst [smem:[#allocation26_spill]] %s3424_s25  ;;  %p2540_p12 = scmp.ge.s32.totalorder %s3271_s21, 1 }
  0x2b   : > { %s3921_s27 = scalar_select %p3430_p11, 1, 0 }
  0x2c   : > { %p439_p13 = scmp.lt.s32.totalorder %s3271_s21, 3  ;;  %p3908_p0 = scmp.eq.s32.totalorder %s3409_s11, 0 }
  0x2d   : > { %3922 = sst [smem:[#allocation27_spill]] %s3921_s27  ;;  %s3274_s29 = smov [#allocation7]  }
  0x2e   : > { %p3437_p1 = pnand %p2540_p12, %p439_p13  ;;  %s464_s30 = sshll.u32 %s3274_s29, 4  ;;  %s465_s30 = int_to_ptr.vmem [resolvable:$true] %s464_s30 }
  0x2f   : > { %s3275_s22 = smov [#allocation10]   ;;  %s3276_s24 = smov [#allocation4]  }
  0x30   : > { %p2891_p2 = pneg %p3437_p1  ;;  %s496_s23 = sshll.u32 %s3275_s22, 4  ;;  %s497_s23 = int_to_ptr.vmem [resolvable:$true] %s496_s23 }
  0x31   : > { %s451_s25 = sshll.u32 %s3276_s24, 4  ;;  %s3048_s2 = scalar_lea.vmem %s465_s30, 256  ;;  %s452_s25 = int_to_ptr.vmem [resolvable:$true] %s451_s25 }
  0x32   : > { %p3445_p3 = pnand %p3908_p0, %p2891_p2  ;;  %p3049_p5 = scmp.ne.s32.totalorder %s465_s30, %s3048_s2 }
  0x33   : > { %p3056_p8 = scmp.lt.s32.totalorder %s465_s30, %s465_s30  ;;  %p3057_p9 = scmp.lt.s32.totalorder %s3048_s2, %s3048_s2 }
  0x34   : > { %p3451_p4 = pneg %p3445_p3 }
  0x35   : > { %p3058_p12 = por %p3057_p9, %p3056_p8 }
  0x36   : > { %p3051_p6 = pnand %p3049_p5, %p3451_p4 }
  0x38   : > { %p3052_p7 = pneg %p3051_p6 }
  0x3a   : > { %p3059_p13 = pnand %p3058_p12, %p3052_p7 }
  0x3c   : > { %3062 = shalt.err (!%p3059_p13)
}
  0x3d   : > { %s3277_s29 = smov 64   ;;  %s3278_s22 = smov 4  }
  0x3e   : > { %s3926_s4 = sld [smem:[#allocation31_spill]]  ;;  %s3074_s19 = scalar_lea.vmem %s497_s23, 256 }
  0x3f   : > { %p3075_p2 = scmp.ne.s32.totalorder %s497_s23, %s3074_s19  ;;  %p3082_p8 = scmp.lt.s32.totalorder %s497_s23, %s497_s23 }
  0x40   : > { %p3083_p7 = scmp.lt.s32.totalorder %s3074_s19, %s3074_s19 }
  0x41   : > { %p3077_p5 = pnand %p3075_p2, %p3451_p4 }
  0x42   : > { %p3084_p9 = por %p3083_p7, %p3082_p8 }
  0x43   : > { %p3078_p6 = pneg %p3077_p5 }
  0x44   : > { %2897 = dma.hbm_to_vmem [thread:$0]  (!%p3445_p3), %s3926_s4, 256, %s465_s30, [#allocation8], %s3277_s29, %s3277_s29, %s3278_s22  }
  0x45   : > { %p3085_p12 = pnand %p3084_p9, %p3078_p6 }
  0x47   : > { %3088 = shalt.err (!%p3085_p12)
}
  0x48   : > { %2903 = dma.hbm_to_vmem [thread:$0]  (!%p3445_p3), %s3891_s8, 256, %s497_s23, [#allocation11], %s3277_s29, %s3277_s29, %s3278_s22  }
  0x49   : > { %s3100_s27 = scalar_lea.vmem %s452_s25, 256  ;;  %p3108_p0 = scmp.lt.s32.totalorder %s452_s25, %s452_s25 }
  0x4a   : > { %p3101_p13 = scmp.ne.s32.totalorder %s452_s25, %s3100_s27  ;;  %p3109_p8 = scmp.lt.s32.totalorder %s3100_s27, %s3100_s27 }
  0x4c   : > { %p3103_p2 = pnand %p3101_p13, %p3451_p4  ;;  %p3110_p6 = por %p3109_p8, %p3108_p0 }
  0x4e   : > { %p3104_p5 = pneg %p3103_p2 }
  0x50   : > { %p3111_p7 = pnand %p3110_p6, %p3104_p5 }
  0x52   : > { %3114 = shalt.err (!%p3111_p7)
}
  0x53   : > { %2894 = dma.hbm_to_vmem [thread:$0]  (!%p3445_p3), %s3886_s3, 256, %s452_s25, [#allocation5], %s3277_s29, %s3277_s29, %s3278_s22  }
  0x54   : > { %s3279_s30 = smov [#allocation9]   ;;  %s3280_s24 = smov [#allocation12]  }
  0x55   : > { %s483_s23 = sshll.u32 %s3279_s30, 4  ;;  %s509_s2 = sshll.u32 %s3280_s24, 4  ;;  %s484_s23 = int_to_ptr.vmem [resolvable:$true] %s483_s23  ;;  %s510_s2 = int_to_ptr.vmem [resolvable:$true] %s509_s2 }
  0x56   : > { %s3126_s4 = scalar_lea.vmem %s484_s23, 256  ;;  %p3134_p13 = scmp.lt.s32.totalorder %s484_s23, %s484_s23 }
  0x57   : > { %p3127_p9 = scmp.ne.s32.totalorder %s484_s23, %s3126_s4  ;;  %p3135_p2 = scmp.lt.s32.totalorder %s3126_s4, %s3126_s4 }
  0x59   : > { %p3129_p0 = pnand %p3127_p9, %p3451_p4  ;;  %p3136_p5 = por %p3135_p2, %p3134_p13 }
  0x5b   : > { %p3130_p12 = pneg %p3129_p0 }
  0x5d   : > { %p3137_p8 = pnand %p3136_p5, %p3130_p12 }
  0x5f   : > { %3140 = shalt.err (!%p3137_p8)
}
  0x60   : > { %2900 = dma.hbm_to_vmem [thread:$0]  (!%p3445_p3), %s3890_s7, 256, %s484_s23, [#allocation8], %s3277_s29, %s3277_s29, %s3278_s22  }
  0x61   : > { %s3152_s19 = scalar_lea.vmem %s510_s2, 256  ;;  %p3160_p0 = scmp.lt.s32.totalorder %s510_s2, %s510_s2 }
  0x62   : > { %p3153_p6 = scmp.ne.s32.totalorder %s510_s2, %s3152_s19  ;;  %p3161_p13 = scmp.lt.s32.totalorder %s3152_s19, %s3152_s19 }
  0x64   : > { %p3155_p7 = pnand %p3153_p6, %p3451_p4  ;;  %p3162_p12 = por %p3161_p13, %p3160_p0 }
  0x66   : > { %p3156_p9 = pneg %p3155_p7 }
  0x68   : > { %p3163_p2 = pnand %p3162_p12, %p3156_p9 }
  0x6a   : > { %3166 = shalt.err (!%p3163_p2)
}
  0x6b   : > { %2906 = dma.hbm_to_vmem [thread:$0]  (!%p3445_p3), %s3892_s9, 256, %s510_s2, [#allocation11], %s3277_s29, %s3277_s29, %s3278_s22  }
  0x6c   : > { %s3281_s30 = smov [#allocation13]  }
  0x6d   : > { %s528_s23 = sshll.u32 %s3281_s30, 4  ;;  %s529_s23 = int_to_ptr.vmem [resolvable:$true] %s528_s23 }
  0x6e   : > { %s3178_s24 = scalar_lea.vmem %s529_s23, 256  ;;  %p3186_p7 = scmp.lt.s32.totalorder %s529_s23, %s529_s23 }
  0x6f   : > { %p3179_p5 = scmp.ne.s32.totalorder %s529_s23, %s3178_s24  ;;  %p3187_p9 = scmp.lt.s32.totalorder %s3178_s24, %s3178_s24 }
  0x71   : > { %p3181_p8 = pnand %p3179_p5, %p3451_p4  ;;  %p3188_p0 = por %p3187_p9, %p3186_p7 }
  0x73   : > { %p3182_p6 = pneg %p3181_p8 }
  0x75   : > { %p3189_p13 = pnand %p3188_p0, %p3182_p6 }
  0x77   : > { %3192 = shalt.err (!%p3189_p13)
}
  0x78   : > { %2909 = dma.hbm_to_vmem [thread:$0]  (!%p3445_p3), %s3895_s12, 256, %s529_s23, [#allocation14], %s3277_s29, %s3277_s29, %s3278_s22  }
  0x79   : > { %575 = sbr.rel (%p3437_p1) target bundleno = 4048 (0xfd0), region = 88  ;;  %p3927_p4 = scmp.eq.s32.totalorder (!%p3437_p1), %s3409_s11, 0 }
  0x7e   : > { %3238 = dma.done.wait (%p3927_p4), [#allocation5], 256   ;;  %p3928_p12 = pmov %p3927_p4 }
  0x7f   : > { %p3929_p2 = pmov %p3927_p4 }
  0x80   : > { %3240 = vsyncadd (%p3928_p12), [#allocation5], 4294967040 }
  0x81   : > { %3242 = dma.done.wait (%p3929_p2), [#allocation8], 512   ;;  %p3930_p5 = pmov %p3929_p2 }
  0x82   : > { %p3931_p8 = pmov %p3929_p2 }
  0x83   : > { %3244 = vsyncadd (%p3930_p5), [#allocation8], 4294966784 }
  0x84   : > { %3246 = dma.done.wait (%p3931_p8), [#allocation11], 512   ;;  %p3932_p3 = pmov %p3929_p2 }
  0x85   : > { %p3933_p1 = pmov %p3929_p2 }
  0x86   : > { %3248 = vsyncadd (%p3932_p3), [#allocation11], 4294966784 }
  0x87   : > { %3250 = dma.done.wait (%p3933_p1), [#allocation14], 256   ;;  %p3934_p6 = pmov %p3933_p1 }
  0x88   : > { %p651_p7 = scmp.lt.s32.totalorder %s3409_s11, 1  ;;  %v3282_v0 = vmov 0.0   ;;  %vm3283_vm0 = vmmov 0   ;;  %s3935_s22 = sld [smem:[#allocation29_spill]]  ;;  %v2975_v1 = vld [vmem:[#allocation4 + $0x8] sm:$0xff]   ;;  %v2976_v2 = vld [vmem:[#allocation4] sm:$0xff]   ;;  %v665_v21 = vlaneseq }
  0x89   : > { %3252 = vsyncadd (%p3934_p6), [#allocation14], 4294967040  ;;  %2677 = vmatprep.subr.bf16.mxu1 %v3282_v0  ;;  %2681 = vmatprep.mubr.msk.bf16.mxu1 %vm3283_vm0, %v3282_v0  ;;  %vm692_vm1 = vcmask 261120   ;;  %s3284_s19 = smov 104   ;;  %s3285_s4 = smov 120   ;;  %vm750_vm2 = vcmask 64512  }
  0x8a   : > { %s652_s20 = scalar_select %p651_p7, %s3409_s11, 1  ;;  %2691 = vmatprep.subr.bf16.mxu0 %v3282_v0  ;;  %2693 = vmatprep.mubr.msk.bf16.mxu0 %vm3283_vm0, %v3282_v0  ;;  %v666_v22 = vshrl.u32 %v665_v21, 7  ;;  %v3599_v23 = vand.u32 127, %v665_v21  ;;  %vm1004_vm4 = vcmask 1043456   ;;  %vm1753_vm6 = vcmask 130048  }
  0x8b   : > { %2678 = vmatpush3.bf16.msra.mxu1 %v2975_v1  ;;  %s3286_s21 = smov 96   ;;  %s3287_s30 = smov 112   ;;  %vm2319_vm7 = vcmask 523264  }
  0x8c   : > { %s2556_s28 = sshll.u32 %s652_s20, 3  ;;  %2679 = vmatprep.subr.bf16.mxu1 %v3282_v0  ;;  %vm669_vm3 = vcmp.le.s32.totalorder %v3599_v23, %v666_v22  ;;  %s3288_s23 = smov 64  }
  0x8d   : > { %s2557_s24 = sshll.u32 %s3409_s11, 1  ;;  %s2609_s29 = sshll.u32 %s3409_s11, 7 }
  0x8e   : > { %s654_s27 = scalar_lea.vmem %s3935_s22, %s2556_s28  ;;  %p656_p9 = scmp.lt.s32.totalorder %s2557_s24, 3 }
  0x8f   : > { %v3544_v3 = vld [vmem:[%s654_s27] sm:$0xff]  ;;  %2680 = vmatpush3.bf16.msra.mxu1 %v2976_v2  ;;  %s3936_s28 = sld [smem:[#allocation30_spill]]  ;;  %s3289_s2 = smov [#allocation15]  }
  0x90   : > { %v675_v4 = vpack.c.bf16 %v3544_v3, %v3544_v3  ;;  %2685 = vmatprep.subr.bf16.mxu1 %v3282_v0  ;;  %s3949_s24 = smov (!%p656_p9, %s2557_s24), 3  ;;  %s3197_s20 = sshll.u32 %s3289_s2, 4  ;;  %s3198_s20 = int_to_ptr.vmem [resolvable:$false] %s3197_s20 }
  0x91   : > { %s2558_s25 = sshll.u32 %s3949_s24, 3  ;;  %s648_s24 = sand.u32 1, %s3263_s1  }
  0x92   : > { %2682 = vmatmul.mubr.msk.bf16.vlgmr.msra.gmra.mxu1 %vm692_vm1, %v675_v4 }
  0x93   : > { %2687 = vmatprep.mubr.msk.bf16.mxu1 %vm3283_vm0, %v3282_v0 }
  0x95   : > { %s659_s0 = scalar_lea.vmem %s3936_s28, %s2558_s25  ;;  %s2555_s25 = sshll.u32 %s648_s24, 3 }
  0x96   : > { %s650_s22 = scalar_lea.vmem [#allocation15], %s2555_s25 }
  0x97   : > { %s2408_s27 = sshll.u32 %s650_s22, 4  ;;  %s2409_s27 = int_to_ptr.vmem [resolvable:$true] %s2408_s27 }
  0x98   : > { %p3200_p12 = scmp.lt.s32.totalorder %s2409_s27, %s3198_s20 }
 0x152   : > { %v730_v5 = vpop.f32.mrf.mxu1 }
 0x153   : > { %v3553_v6 = vpack.c.bf16 %v730_v5, %v730_v5 }
 0x154   : > { %v2683_v7 = vpop.f32.mrf.mxu1 }
 0x155   : > { %742 = vrot.lane.b32.xlu1 %v3553_v6, %s3284_s19  ;;  %738 = vrot.lane.b32.xlu0 %v3553_v6, %s3285_s4 }
 0x156   : > { %v733_v8 = vpop.f32.mrf.mxu1 }
 0x158   : > { %v2684_v9 = vpop.f32.mrf.mxu1 }
 0x159   : > { %748 = vrot.lane.b32.xlu1 %v3553_v6, %s3286_s21  ;;  %740 = vrot.lane.b32.xlu0 %v3553_v6, %s3287_s30 }
 0x1c7   : > { %v3563_v10 = vpop.permute.xlu1 %742  ;;  %v3565_v11 = vpop.permute.xlu0 %738 }
 0x1c8   : > { %797 = vrot.lane.b32.xlu0 %v3565_v11, %s3286_s21 }
 0x1cb   : > { %v749_v12 = vpop.permute.xlu1 %748  ;;  %v3569_v13 = vpop.permute.xlu0 %740 }
 0x1cc   : > { %v755_v14 = vsel %vm750_vm2, %v749_v12, 0  ;;  %893 = vrot.lane.b32.xlu0 %v3563_v10, %s3286_s21  ;;  %845 = vrot.lane.b32.xlu1 %v3569_v13, %s3286_s21 }
 0x1cd   : > { %2686 = vmatpush3.bf16.xpose.msra.mxu1 %v755_v14 }
 0x1ce   : > { %2697 = vmatprep.subr.bf16.mxu1 %v3282_v0 }
 0x1d4   : > { %2688 = vmatmul.mubr.msk.bf16.vlgmr.msra.gmra.mxu1 %vm750_vm2, %v3553_v6 }
 0x1d5   : > { %2699 = vmatprep.mubr.msk.bf16.mxu1 %vm3283_vm0, %v3282_v0 }
 0x23a   : > { %v798_v15 = vpop.permute.xlu0 %797 }
 0x23b   : > { %v803_v16 = vsel %vm750_vm2, %v798_v15, 0 }
 0x23c   : > { %2692 = vmatpush3.bf16.xpose.msra.mxu0 %v803_v16 }
 0x23d   : > { %2703 = vmatprep.subr.bf16.mxu0 %v3282_v0 }
 0x23e   : > { %v846_v17 = vpop.permute.xlu1 %845  ;;  %v894_v19 = vpop.permute.xlu0 %893 }
 0x23f   : > { %v851_v18 = vsel %vm750_vm2, %v846_v17, 0  ;;  %v899_v20 = vsel %vm750_vm2, %v894_v19, 0 }
 0x240   : > { %2698 = vmatpush3.bf16.xpose.msra.mxu1 %v851_v18 }
 0x241   : > { %2709 = vmatprep.subr.bf16.mxu1 %v3282_v0 }
 0x243   : > { %2694 = vmatmul.mubr.msk.bf16.vlgmr.msra.gmra.mxu0 %vm750_vm2, %v3565_v11 }
 0x244   : > { %2704 = vmatpush3.bf16.xpose.msra.mxu0 %v899_v20  ;;  %2705 = vmatprep.mubr.msk.bf16.mxu0 %vm3283_vm0, %v3282_v0 }
 0x245   : > { %2715 = vmatprep.subr.bf16.mxu0 %v3282_v0 }
 0x247   : > { %2700 = vmatmul.mubr.msk.bf16.vlgmr.msra.gmra.mxu1 %vm750_vm2, %v3569_v13 }
 0x248   : > { %2711 = vmatprep.mubr.msk.bf16.mxu1 %vm3283_vm0, %v3282_v0 }
 0x24b   : > { %2706 = vmatmul.mubr.msk.bf16.vlgmr.msra.gmra.mxu0 %vm750_vm2, %v3563_v10 }
 0x24c   : > { %2717 = vmatprep.mubr.msk.bf16.mxu0 %vm3283_vm0, %v3282_v0 }
 0x294   : > { %v791_v24 = vpop.f32.mrf.mxu1 }
 0x295   : > { %v941_v25 = vmul.f32 0.35355338, %v791_v24 }
 0x296   : > { %v2689_v26 = vpop.f32.mrf.mxu1 }
 0x297   : > { %v947_v27 = vsel %vm669_vm3, %v941_v25, -1000000.0 }
 0x298   : > { %v794_v28 = vpop.f32.mrf.mxu1  ;;  %v951_v29 = vsel %vm750_vm2, %v947_v27, -inf }
 0x299   : > { %952 = vmax.xlane.f32.xlu1 %v951_v29  ;;  %v744_v29 = vld [vmem:[#allocation7] sm:$0xf] }
 0x29a   : > { %v2690_v30 = vpop.f32.mrf.mxu1 }
 0x303   : > { %v839_v31 = vpop.f32.mrf.mxu0 }
 0x304   : > { %v942_v32 = vmul.f32 0.35355338, %v839_v31 }
 0x305   : > { %v2695_v33 = vpop.f32.mrf.mxu0 }
 0x306   : > { %v948_v34 = vsel %vm669_vm3, %v942_v32, -1000000.0  ;;  %v1200_v33 = vsel %vm1004_vm4, %v744_v29, 0 }
 0x307   : > { %v842_v35 = vpop.f32.mrf.mxu0  ;;  %v887_v36 = vpop.f32.mrf.mxu1  ;;  %v954_v37 = vsel %vm750_vm2, %v948_v34, -inf }
 0x308   : > { %v943_v38 = vmul.f32 0.35355338, %v887_v36  ;;  %955 = vmax.xlane.f32.xlu0 %v954_v37  ;;  %v745_v35 = vld [vmem:[#allocation7 + $0x4] sm:$0xf] }
 0x309   : > { %v2696_v39 = vpop.f32.mrf.mxu0  ;;  %v2701_v40 = vpop.f32.mrf.mxu1 }
 0x30a   : > { %v949_v41 = vsel %vm669_vm3, %v943_v38, -1000000.0  ;;  %v1246_v38 = vsel %vm1004_vm4, %v745_v35, 0  ;;  %v746_v39 = vld [vmem:[#allocation7 + $0x8] sm:$0xf] }
 0x30b   : > { %v890_v42 = vpop.f32.mrf.mxu1  ;;  %v935_v43 = vpop.f32.mrf.mxu0  ;;  %v957_v44 = vsel %vm750_vm2, %v949_v41, -inf }
 0x30c   : > { %v944_v45 = vmul.f32 0.35355338, %v935_v43  ;;  %958 = vmax.xlane.f32.xlu0 %v957_v44  ;;  %v1292_v42 = vsel %vm1004_vm4, %v746_v39, 0 }
 0x30d   : > { %v2702_v46 = vpop.f32.mrf.mxu1  ;;  %v2707_v47 = vpop.f32.mrf.mxu0 }
 0x30e   : > { %v950_v48 = vsel %vm669_vm3, %v944_v45, -1000000.0  ;;  %v747_v46 = vld [vmem:[#allocation7 + $0xc] sm:$0xf] }
 0x30f   : > { %v938_v49 = vpop.f32.mrf.mxu0  ;;  %v960_v50 = vsel %vm750_vm2, %v950_v48, -inf }
 0x310   : > { %961 = vmax.xlane.f32.xlu1 %v960_v50  ;;  %v1338_v49 = vsel %vm1004_vm4, %v747_v46, 0 }
 0x311   : > { %v2708_v51 = vpop.f32.mrf.mxu0 }
 0x321   : > { %1048 = vrot.lane.b32.xlu1 %v3565_v11, %s3288_s23 }
 0x322   : > { %v953_v52 = vpop.xlane.xlu1 %952 }
 0x323   : > { %v963_v53 = vsub.f32 %v947_v27, %v953_v52 }
 0x325   : > { %v967_v54 = vmul.f32 1.442695, %v963_v53 }
 0x327   : > { %2987 = vpow2.f32 %v967_v54 }
 0x334   : > { %v2988_v55 = vpop.eup %2987 }
 0x335   : > { %v975_v56 = vsel %vm750_vm2, %v2988_v55, 0.0 }
 0x336   : > { %976 = vadd.xlane.f32.xlu0 %v975_v56 }
 0x34c   : > { %999 = vrot.lane.b32.xlu0 %v3553_v6, %s3288_s23 }
 0x391   : > { %v956_v57 = vpop.xlane.xlu0 %955 }
 0x392   : > { %v964_v58 = vsub.f32 %v948_v34, %v956_v57 }
 0x394   : > { %v969_v59 = vmul.f32 1.442695, %v964_v58 }
 0x395   : > { %v959_v60 = vpop.xlane.xlu0 %958 }
 0x396   : > { %2989 = vpow2.f32 %v969_v59  ;;  %v965_v61 = vsub.f32 %v949_v41, %v959_v60 }
 0x398   : > { %v971_v62 = vmul.f32 1.442695, %v965_v61 }
 0x399   : > { %v962_v63 = vpop.xlane.xlu1 %961 }
 0x39a   : > { %2991 = vpow2.f32 %v971_v62  ;;  %v966_v1 = vsub.f32 %v950_v48, %v962_v63 }
 0x39c   : > { %v973_v2 = vmul.f32 1.442695, %v966_v1 }
 0x39d   : > { %v1049_v4 = vpop.permute.xlu1 %1048 }
 0x39e   : > { %2993 = vpow2.f32 %v973_v2  ;;  %v1054_v5 = vsel %vm1004_vm4, %v1049_v4, 0 }
 0x39f   : > { %2716 = vmatpush3.bf16.msra.mxu0 %v1054_v5 }
 0x3a0   : > { %2727 = vmatprep.subr.bf16.mxu0 %v3282_v0 }
 0x3a3   : > { %v2990_v6 = vpop.eup %2989 }
 0x3a4   : > { %v978_v7 = vsel %vm750_vm2, %v2990_v6, 0.0 }
 0x3a5   : > { %979 = vadd.xlane.f32.xlu1 %v978_v7 }
 0x3a7   : > { %v2992_v8 = vpop.eup %2991 }
 0x3a8   : > { %v981_v9 = vsel %vm750_vm2, %v2992_v8, 0.0 }
 0x3a9   : > { %982 = vadd.xlane.f32.xlu0 %v981_v9 }
 0x3ab   : > { %v2994_v11 = vpop.eup %2993 }
 0x3ac   : > { %v984_v12 = vsel %vm750_vm2, %v2994_v11, 0.0 }
 0x3ad   : > { %985 = vadd.xlane.f32.xlu1 %v984_v12 }
 0x3be   : > { %1096 = vrot.lane.b32.xlu1 %v3569_v13, %s3288_s23 }
 0x3bf   : > { %1144 = vrot.lane.b32.xlu0 %v3563_v10, %s3288_s23  ;;  %v977_v14 = vpop.xlane.xlu0 %976 }
 0x3c0   : > { %2995 = vrcp.f32 %v977_v14 }
 0x3c3   : > { %v1000_v15 = vpop.permute.xlu0 %999 }
 0x3c4   : > { %v1006_v16 = vsel %vm1004_vm4, %v1000_v15, 0 }
 0x3c5   : > { %2710 = vmatpush3.bf16.msra.mxu1 %v1006_v16 }
 0x3c6   : > { %2721 = vmatprep.subr.bf16.mxu1 %v3282_v0 }
 0x3cd   : > { %v2996_v17 = vpop.eup %2995 }
 0x3ce   : > { %v991_v18 = vmul.f32 %v2996_v17, %v2988_v55 }
 0x3d0   : > { %v995_v19 = vpack.c.bf16 %v991_v18, %v991_v18 }
 0x3d2   : > { %2712 = vmatmul.mubr.msk.bf16.vlgmr.msra.gmra.mxu1 %vm750_vm2, %v995_v19 }
 0x3d3   : > { %2723 = vmatprep.mubr.msk.bf16.mxu1 %vm3283_vm0, %v3282_v0 }
 0x42e   : > { %v980_v13 = vpop.xlane.xlu1 %979 }
 0x42f   : > { %2997 = vrcp.f32 %v980_v13 }
 0x432   : > { %v983_v20 = vpop.xlane.xlu0 %982 }
 0x433   : > { %2999 = vrcp.f32 %v983_v20 }
 0x436   : > { %v986_v10 = vpop.xlane.xlu1 %985  ;;  %v1145_v26 = vpop.permute.xlu0 %1144 }
 0x437   : > { %3001 = vrcp.f32 %v986_v10  ;;  %v1150_v30 = vsel %vm1004_vm4, %v1145_v26, 0 }
 0x43a   : > { %v1097_v21 = vpop.permute.xlu1 %1096 }
 0x43b   : > { %v1102_v22 = vsel %vm1004_vm4, %v1097_v21, 0 }
 0x43c   : > { %v2998_v24 = vpop.eup %2997  ;;  %2722 = vmatpush3.bf16.msra.mxu1 %v1102_v22 }
 0x43d   : > { %v992_v25 = vmul.f32 %v2998_v24, %v2990_v6  ;;  %2733 = vmatprep.subr.bf16.mxu1 %v3282_v0 }
 0x43f   : > { %v996_v27 = vpack.c.bf16 %v992_v25, %v992_v25 }
 0x440   : > { %v3000_v28 = vpop.eup %2999 }
 0x441   : > { %2718 = vmatmul.mubr.msk.bf16.vlgmr.msra.gmra.mxu0 %vm750_vm2, %v996_v27  ;;  %v993_v31 = vmul.f32 %v3000_v28, %v2992_v8  ;;  %v2977_v27 = vld [vmem:[#allocation10 + $0x8] sm:$0xff]  }
 0x442   : > { %2728 = vmatpush3.bf16.msra.mxu0 %v1150_v30  ;;  %2729 = vmatprep.mubr.msk.bf16.mxu0 %vm3283_vm0, %v3282_v0 }
 0x443   : > { %v997_v32 = vpack.c.bf16 %v993_v31, %v993_v31  ;;  %2739 = vmatprep.subr.bf16.mxu0 %v3282_v0 }
 0x444   : > { %v3002_v34 = vpop.eup %3001 }
 0x445   : > { %2724 = vmatmul.mubr.msk.bf16.vlgmr.msra.gmra.mxu1 %vm750_vm2, %v997_v32  ;;  %v994_v36 = vmul.f32 %v3002_v34, %v2994_v11  ;;  %v664_v34 = vld [vmem:[%s659_s0 + $0x8] sm:$0xff] }
 0x446   : > { %2734 = vmatpush3.bf16.msra.mxu1 %v1200_v33  ;;  %2735 = vmatprep.mubr.msk.bf16.mxu1 %vm3283_vm0, %v3282_v0  ;;  %v2978_v33 = vld [vmem:[#allocation10] sm:$0xff]  }
 0x447   : > { %v998_v37 = vpack.c.bf16 %v994_v36, %v994_v36  ;;  %2745 = vmatprep.subr.bf16.mxu1 %v3282_v0  ;;  %v2979_v36 = vld [vmem:[#allocation9 + $0x8] sm:$0xff]  }
 0x449   : > { %2730 = vmatmul.mubr.msk.bf16.vlgmr.msra.gmra.mxu0 %vm750_vm2, %v998_v37  ;;  %v2980_v37 = vld [vmem:[#allocation9] sm:$0xff]  }
 0x44a   : > { %2740 = vmatpush3.bf16.msra.mxu0 %v1246_v38  ;;  %2741 = vmatprep.mubr.msk.bf16.mxu0 %vm3283_vm0, %v3282_v0 }
 0x44b   : > { %2751 = vmatprep.subr.bf16.mxu0 %v3282_v0 }
 0x492   : > { %v1042_v40 = vpop.f32.mrf.mxu1 }
 0x493   : > { %v1192_v41 = vpack.c.bf16 %v1042_v40, %v1042_v40 }
 0x494   : > { %v2713_v43 = vpop.f32.mrf.mxu1 }
 0x495   : > { %2736 = vmatmul.mubr.msk.bf16.vlgmr.msra.gmra.mxu1 %vm750_vm2, %v1192_v41 }
 0x496   : > { %v1045_v44 = vpop.f32.mrf.mxu1  ;;  %2746 = vmatpush3.bf16.msra.mxu1 %v1292_v42  ;;  %2747 = vmatprep.mubr.msk.bf16.mxu1 %vm3283_vm0, %v3282_v0  ;;  %v2574_v42 = vld [vmem:[%s3888_s5] ss:$0 sm:$0xff] }
 0x497   : > { %2757 = vmatprep.subr.bf16.mxu1 %v3282_v0  ;;  %v2575_v44 = vld [vmem:[%s3889_s6] ss:$0 sm:$0xff] }
 0x498   : > { %v2714_v45 = vpop.f32.mrf.mxu1 }
 0x501   : > { %v1090_v47 = vpop.f32.mrf.mxu0 }
 0x502   : > { %v1193_v48 = vpack.c.bf16 %v1090_v47, %v1090_v47 }
 0x503   : > { %v2719_v50 = vpop.f32.mrf.mxu0 }
 0x504   : > { %2742 = vmatmul.mubr.msk.bf16.vlgmr.msra.gmra.mxu0 %vm750_vm2, %v1193_v48 }
 0x505   : > { %v1093_v51 = vpop.f32.mrf.mxu0  ;;  %v1138_v52 = vpop.f32.mrf.mxu1  ;;  %2752 = vmatpush3.bf16.msra.mxu0 %v1338_v49  ;;  %2753 = vmatprep.mubr.msk.bf16.mxu0 %vm3283_vm0, %v3282_v0 }
 0x506   : > { %v1194_v53 = vpack.c.bf16 %v1138_v52, %v1138_v52  ;;  %2765 = vmatprep.subr.bf16.mxu0 %v3282_v0 }
 0x507   : > { %v2720_v54 = vpop.f32.mrf.mxu0  ;;  %v2725_v55 = vpop.f32.mrf.mxu1 }
 0x508   : > { %2748 = vmatmul.mubr.msk.bf16.vlgmr.msra.gmra.mxu1 %vm750_vm2, %v1194_v53 }
 0x509   : > { %v1141_v56 = vpop.f32.mrf.mxu1  ;;  %v1186_v57 = vpop.f32.mrf.mxu0  ;;  %2761 = vmatprep.mubr.msk.bf16.mxu1 %vm3283_vm0, %v3282_v0  ;;  %2758 = vmatpush3.bf16.msra.mxu1 %v2979_v36 }
 0x50a   : > { %v1195_v58 = vpack.c.bf16 %v1186_v57, %v1186_v57  ;;  %2759 = vmatprep.subr.bf16.mxu1 %v3282_v0 }
 0x50b   : > { %v2726_v59 = vpop.f32.mrf.mxu1  ;;  %v2731_v60 = vpop.f32.mrf.mxu0 }
 0x50c   : > { %2754 = vmatmul.mubr.msk.bf16.vlgmr.msra.gmra.mxu0 %vm750_vm2, %v1195_v58 }
 0x50d   : > { %v1189_v61 = vpop.f32.mrf.mxu0  ;;  %2769 = vmatprep.mubr.msk.bf16.mxu0 %vm3283_vm0, %v3282_v0  ;;  %2766 = vmatpush3.bf16.msra.mxu0 %v2977_v27 }
 0x50e   : > { %2767 = vmatprep.subr.bf16.mxu0 %v3282_v0  ;;  %2760 = vmatpush3.bf16.msra.mxu1 %v2980_v37 }
 0x50f   : > { %v2732_v62 = vpop.f32.mrf.mxu0  ;;  %2773 = vmatprep.subr.bf16.mxu1 %v3282_v0 }
 0x511   : > { %2768 = vmatpush3.bf16.msra.mxu0 %v2978_v33 }
 0x512   : > { %2779 = vmatprep.subr.bf16.mxu0 %v3282_v0 }
 0x555   : > { %v1236_v63 = vpop.f32.mrf.mxu1 }
 0x556   : > { %v1380_v11 = vsel %vm692_vm1, %v1236_v63, 0.0 }
 0x557   : > { %v2737_v1 = vpop.f32.mrf.mxu1 }
 0x559   : > { %v1239_v2 = vpop.f32.mrf.mxu1 }
 0x55b   : > { %v2738_v4 = vpop.f32.mrf.mxu1 }
 0x5c4   : > { %v1282_v5 = vpop.f32.mrf.mxu0 }
 0x5c5   : > { %v1381_v7 = vsel %vm692_vm1, %v1282_v5, 0.0 }
 0x5c6   : > { %v2743_v6 = vpop.f32.mrf.mxu0  ;;  %v1382_v14 = vadd.f32 %v1381_v7, %v1380_v11 }
 0x5c8   : > { %v1285_v8 = vpop.f32.mrf.mxu0  ;;  %v1328_v9 = vpop.f32.mrf.mxu1 }
 0x5c9   : > { %v1383_v12 = vsel %vm692_vm1, %v1328_v9, 0.0  ;;  %v1555_v8 = vld [vmem:[#allocation12] sm:$0xf] }
 0x5ca   : > { %v2744_v15 = vpop.f32.mrf.mxu0  ;;  %v2749_v16 = vpop.f32.mrf.mxu1  ;;  %v1384_v17 = vadd.f32 %v1383_v12, %v1382_v14 }
 0x5cc   : > { %v1331_v18 = vpop.f32.mrf.mxu1  ;;  %v1374_v19 = vpop.f32.mrf.mxu0 }
 0x5cd   : > { %v1385_v13 = vsel %vm692_vm1, %v1374_v19, 0.0 }
 0x5ce   : > { %v1386_v20 = vadd.f32 %v1385_v13, %v1384_v17  ;;  %v2750_v10 = vpop.f32.mrf.mxu1  ;;  %v2755_v21 = vpop.f32.mrf.mxu0 }
 0x5d0   : > { %v1377_v22 = vpop.f32.mrf.mxu0  ;;  %v1387_v24 = vadd.f32 %v1386_v20, %v3544_v3  ;;  %v663_v3 = vld [vmem:[%s659_s0] sm:$0xff]  ;;  %s3939_s0 = sld [smem:[#allocation32_spill]] }
 0x5d1   : > { %v1419_v35 = vpack.c.bf16 %v664_v34, %v663_v3 }
 0x5d2   : > { %v2756_v25 = vpop.f32.mrf.mxu0  ;;  %v1390_v26 = vsel %vm692_vm1, %v1387_v24, 0.0 }
 0x5d3   : > { %1391 = vadd.xlane.f32.xlu1 %v1390_v26  ;;  %2770 = vmatmul.mubr.msk.bf16.vlgmr.msra.gmra.mxu0 %vm692_vm1, %v1419_v35 }
 0x5d4   : > { %2781 = vmatprep.mubr.msk.bf16.mxu0 %vm3283_vm0, %v3282_v0 }
 0x65c   : > { %v1392_v28 = vpop.xlane.xlu1 %1391 }
 0x65d   : > { %v1394_v29 = vmul.f32 0.03125, %v1392_v28 }
 0x65f   : > { %v1395_v30 = vsub.f32 %v1387_v24, %v1394_v29 }
 0x661   : > { %v1396_v31 = vmul.f32 %v1395_v30, %v1395_v30 }
 0x663   : > { %v1397_v32 = vsel %vm692_vm1, %v1396_v31, 0.0 }
 0x664   : > { %1398 = vadd.xlane.f32.xlu0 %v1397_v32 }
 0x693   : > { %v1533_v48 = vpop.f32.mrf.mxu0 }
 0x695   : > { %v2771_v49 = vpop.f32.mrf.mxu0 }
 0x697   : > { %v1536_v50 = vpop.f32.mrf.mxu0 }
 0x698   : > { %v3697_v51 = vpack.c.bf16 %v1536_v50, %v1533_v48 }
 0x699   : > { %v2772_v52 = vpop.f32.mrf.mxu0 }
 0x69a   : > { %1549 = vrot.lane.b32.xlu0 %v3697_v51, %s3285_s4  ;;  %1551 = vrot.lane.b32.xlu1 %v3697_v51, %s3287_s30  ;;  %v1563_v53 = vsel %vm750_vm2, %v3697_v51, 0 }
 0x69e   : > { %1553 = vrot.lane.b32.xlu0 %v3697_v51, %s3284_s19 }
 0x6ed   : > { %v1399_v38 = vpop.xlane.xlu0 %1398 }
 0x6ee   : > { %v1400_v39 = vmul.f32 0.03125, %v1399_v38 }
 0x6f0   : > { %v1401_v40 = vadd.f32 1e-05, %v1400_v39 }
 0x6f2   : > { %3003 = vrsqrt.f32 %v1401_v40 }
 0x6ff   : > { %v3004_v41 = vpop.eup %3003 }
 0x700   : > { %v1403_v43 = vmul.f32 %v3004_v41, %v1395_v30 }
 0x702   : > { %v1410_v45 = vmul.f32 %v2574_v42, %v1403_v43 }
 0x704   : > { %v3690_v46 = vadd.f32 %v2575_v44, %v1410_v45 }
 0x706   : > { %v1418_v47 = vpack.c.bf16 %v3690_v46, %v3690_v46 }
 0x708   : > { %2762 = vmatmul.mubr.msk.bf16.vlgmr.msra.gmra.mxu1 %vm692_vm1, %v1418_v47 }
 0x709   : > { %2775 = vmatprep.mubr.msk.bf16.mxu1 %vm3283_vm0, %v3282_v0  ;;  %2774 = vmatpush3.bf16.xpose.msra.mxu1 %v1563_v53 }
 0x70a   : > { %2785 = vmatprep.subr.bf16.mxu1 %v3282_v0 }
 0x70c   : > { %v3708_v54 = vpop.permute.xlu0 %1549  ;;  %v3713_v56 = vpop.permute.xlu1 %1551 }
 0x70d   : > { %v1609_v55 = vsel %vm750_vm2, %v3708_v54, 0  ;;  %v1655_v60 = vsel %vm750_vm2, %v3713_v56, 0 }
 0x70e   : > { %2780 = vmatpush3.bf16.xpose.msra.mxu0 %v1609_v55 }
 0x70f   : > { %2791 = vmatprep.subr.bf16.mxu0 %v3282_v0 }
 0x710   : > { %v3724_v63 = vpop.permute.xlu0 %1553 }
 0x711   : > { %v1701_v2 = vsel %vm750_vm2, %v3724_v63, 0 }
 0x7c8   : > { %v1473_v57 = vpop.f32.mrf.mxu1 }
 0x7c9   : > { %v1479_v58 = vpack.c.bf16 %v1473_v57, %v1473_v57 }
 0x7ca   : > { %v2763_v59 = vpop.f32.mrf.mxu1 }
 0x7cb   : > { %1546 = vrot.lane.b32.xlu0 %v1479_v58, %s3284_s19  ;;  %1542 = vrot.lane.b32.xlu1 %v1479_v58, %s3285_s4  ;;  %s670_s19 = sld [smem:[#allocation3 + %s3409_s11]]  ;;  %s2406_s4 = scalar_lea.hbm %s3901_s18, %s2609_s29 }
 0x7cc   : > { %2776 = vmatmul.mubr.msk.bf16.vlgmr.msra.gmra.mxu1 %vm750_vm2, %v1479_v58  ;;  %v1476_v61 = vpop.f32.mrf.mxu1  ;;  %s3199_s11 = scalar_lea.vmem %s3198_s20, 256 }
 0x7cd   : > { %2786 = vmatpush3.bf16.xpose.msra.mxu1 %v1655_v60  ;;  %2787 = vmatprep.mubr.msk.bf16.mxu1 %vm3283_vm0, %v3282_v0 }
 0x7ce   : > { %v2764_v62 = vpop.f32.mrf.mxu1  ;;  %2797 = vmatprep.subr.bf16.mxu1 %v3282_v0 }
 0x7cf   : > { %1544 = vrot.lane.b32.xlu1 %v1479_v58, %s3287_s30  ;;  %s3193_s30 = scalar_lea.vmem %s2409_s27, 128 }
 0x7d0   : > { %p3194_p0 = scmp.ne.s32.totalorder %s2409_s27, %s3193_s30  ;;  %p3201_p2 = scmp.lt.s32.totalorder %s3199_s11, %s3193_s30 }
 0x7d1   : > { %v671_v6 = vstv %s670_s19 }
 0x7d2   : > { %vm3740_vm5 = vcmp.lt.s32.totalorder %v3599_v23, %v671_v6  ;;  %p3195_p13 = pnand %p3194_p0, %p3426_p10  ;;  %p3202_p5 = por %p3201_p2, %p3200_p12 }
 0x7d4   : > { %p3196_p4 = pneg %p3195_p13 }
 0x7d6   : > { %p3203_p8 = pnand %p3202_p5, %p3196_p4 }
 0x83d   : > { %v1543_v1 = vpop.permute.xlu1 %1542  ;;  %v1547_v5 = vpop.permute.xlu0 %1546 }
 0x83e   : > { %2782 = vmatmul.mubr.msk.bf16.vlgmr.msra.gmra.mxu0 %vm750_vm2, %v1543_v1 }
 0x83f   : > { %2792 = vmatpush3.bf16.xpose.msra.mxu0 %v1701_v2  ;;  %2793 = vmatprep.mubr.msk.bf16.mxu0 %vm3283_vm0, %v3282_v0 }
 0x840   : > { %2803 = vmatprep.subr.bf16.mxu0 %v3282_v0 }
 0x841   : > { %v1545_v4 = vpop.permute.xlu1 %1544 }
 0x842   : > { %2788 = vmatmul.mubr.msk.bf16.vlgmr.msra.gmra.mxu1 %vm750_vm2, %v1545_v4 }
 0x843   : > { %2799 = vmatprep.mubr.msk.bf16.mxu1 %vm3283_vm0, %v3282_v0 }
 0x846   : > { %2794 = vmatmul.mubr.msk.bf16.vlgmr.msra.gmra.mxu0 %vm750_vm2, %v1547_v5 }
 0x847   : > { %2805 = vmatprep.mubr.msk.bf16.mxu0 %vm3283_vm0, %v3282_v0 }
 0x88c   : > { %v1599_v7 = vpop.f32.mrf.mxu1 }
 0x88d   : > { %v1743_v9 = vmul.f32 0.35355338, %v1599_v7 }
 0x88e   : > { %v2777_v11 = vpop.f32.mrf.mxu1 }
 0x88f   : > { %v1749_v12 = vsel %vm3740_vm5, %v1743_v9, -1000000.0 }
 0x890   : > { %v1602_v14 = vpop.f32.mrf.mxu1  ;;  %v1754_v15 = vsel %vm1753_vm6, %v1749_v12, -inf }
 0x891   : > { %1755 = vmax.xlane.f32.xlu1 %v1754_v15  ;;  %v1994_v14 = vsel %vm1004_vm4, %v1555_v8, 0 }
 0x892   : > { %v2778_v16 = vpop.f32.mrf.mxu1 }
 0x893   : > { %v1556_v16 = vld [vmem:[#allocation12 + $0x4] sm:$0xf] }
 0x8fe   : > { %v1645_v17 = vpop.f32.mrf.mxu0 }
 0x8ff   : > { %v1744_v18 = vmul.f32 0.35355338, %v1645_v17 }
 0x900   : > { %v2783_v19 = vpop.f32.mrf.mxu0 }
 0x901   : > { %v1750_v23 = vsel %vm3740_vm5, %v1744_v18, -1000000.0  ;;  %v2040_v19 = vsel %vm1004_vm4, %v1556_v16, 0 }
 0x902   : > { %v1648_v13 = vpop.f32.mrf.mxu0  ;;  %v1691_v20 = vpop.f32.mrf.mxu1  ;;  %v1757_v10 = vsel %vm1753_vm6, %v1750_v23, -inf }
 0x903   : > { %v1745_v21 = vmul.f32 0.35355338, %v1691_v20  ;;  %1758 = vmax.xlane.f32.xlu0 %v1757_v10 }
 0x904   : > { %v2784_v22 = vpop.f32.mrf.mxu0  ;;  %v2789_v24 = vpop.f32.mrf.mxu1 }
 0x905   : > { %v1751_v25 = vsel %vm3740_vm5, %v1745_v21, -1000000.0 }
 0x906   : > { %v1694_v26 = vpop.f32.mrf.mxu1  ;;  %v1737_v27 = vpop.f32.mrf.mxu0  ;;  %v1760_v28 = vsel %vm1753_vm6, %v1751_v25, -inf }
 0x907   : > { %v1746_v29 = vmul.f32 0.35355338, %v1737_v27  ;;  %1761 = vmax.xlane.f32.xlu0 %v1760_v28 }
 0x908   : > { %v2790_v30 = vpop.f32.mrf.mxu1  ;;  %v2795_v31 = vpop.f32.mrf.mxu0 }
 0x909   : > { %v1752_v32 = vsel %vm3740_vm5, %v1746_v29, -1000000.0 }
 0x90a   : > { %v1740_v33 = vpop.f32.mrf.mxu0  ;;  %v1763_v3 = vsel %vm1753_vm6, %v1752_v32, -inf }
 0x90b   : > { %1764 = vmax.xlane.f32.xlu1 %v1763_v3 }
 0x90c   : > { %v2796_v34 = vpop.f32.mrf.mxu0 }
 0x91a   : > { %v1756_v35 = vpop.xlane.xlu1 %1755 }
 0x91b   : > { %v1766_v36 = vsub.f32 %v1749_v12, %v1756_v35 }
 0x91c   : > { %1848 = vrot.lane.b32.xlu1 %v3708_v54, %s3286_s21 }
 0x91d   : > { %v1770_v37 = vmul.f32 1.442695, %v1766_v36 }
 0x91f   : > { %3005 = vpow2.f32 %v1770_v37 }
 0x92c   : > { %v3006_v38 = vpop.eup %3005 }
 0x92d   : > { %v1778_v39 = vsel %vm1753_vm6, %v3006_v38, 0.0 }
 0x92e   : > { %1779 = vadd.xlane.f32.xlu0 %v1778_v39 }
 0x944   : > { %1802 = vrot.lane.b32.xlu0 %v3697_v51, %s3286_s21 }
 0x98c   : > { %v1759_v40 = vpop.xlane.xlu0 %1758 }
 0x98d   : > { %v1767_v41 = vsub.f32 %v1750_v23, %v1759_v40  ;;  %v1557_v23 = vld [vmem:[#allocation12 + $0x8] sm:$0xf] }
 0x98e   : > { %v2086_v10 = vsel %vm1004_vm4, %v1557_v23, 0 }
 0x98f   : > { %v1772_v42 = vmul.f32 1.442695, %v1767_v41 }
 0x990   : > { %v1762_v43 = vpop.xlane.xlu0 %1761 }
 0x991   : > { %3007 = vpow2.f32 %v1772_v42  ;;  %v1768_v44 = vsub.f32 %v1751_v25, %v1762_v43  ;;  %v1558_v25 = vld [vmem:[#allocation12 + $0xc] sm:$0xf] }
 0x992   : > { %v2132_v28 = vsel %vm1004_vm4, %v1558_v25, 0  ;;  %v2596_v25 = vld [vmem:[%s3896_s13] ss:$0 sm:$0xff] }
 0x993   : > { %v1774_v45 = vmul.f32 1.442695, %v1768_v44 }
 0x994   : > { %v1765_v47 = vpop.xlane.xlu1 %1764 }
 0x995   : > { %3009 = vpow2.f32 %v1774_v45  ;;  %v1769_v48 = vsub.f32 %v1752_v32, %v1765_v47 }
 0x997   : > { %v1776_v49 = vmul.f32 1.442695, %v1769_v48 }
 0x998   : > { %v1849_v50 = vpop.permute.xlu1 %1848 }
 0x999   : > { %3011 = vpow2.f32 %v1776_v49  ;;  %2804 = vmatpush3.bf16.msra.mxu0 %v1849_v50 }
 0x99a   : > { %2815 = vmatprep.subr.bf16.mxu0 %v3282_v0 }
 0x99e   : > { %v3008_v52 = vpop.eup %3007 }
 0x99f   : > { %v1781_v53 = vsel %vm1753_vm6, %v3008_v52, 0.0 }
 0x9a0   : > { %1782 = vadd.xlane.f32.xlu1 %v1781_v53 }
 0x9a2   : > { %v3010_v51 = vpop.eup %3009 }
 0x9a3   : > { %v1784_v54 = vsel %vm1753_vm6, %v3010_v51, 0.0 }
 0x9a4   : > { %1785 = vadd.xlane.f32.xlu0 %v1784_v54 }
 0x9a6   : > { %v3012_v55 = vpop.eup %3011 }
 0x9a7   : > { %v1787_v57 = vsel %vm1753_vm6, %v3012_v55, 0.0 }
 0x9a8   : > { %1788 = vadd.xlane.f32.xlu1 %v1787_v57 }
 0x9b7   : > { %v1780_v58 = vpop.xlane.xlu0 %1779 }
 0x9b8   : > { %3013 = vrcp.f32 %v1780_v58 }
 0x9b9   : > { %1894 = vrot.lane.b32.xlu1 %v3713_v56, %s3286_s21 }
 0x9ba   : > { %1940 = vrot.lane.b32.xlu0 %v3724_v63, %s3286_s21  ;;  %s2395_s21 = scalar_lea.sflag [#allocation6], %s648_s24 }
 0x9bb   : > { %v1803_v59 = vpop.permute.xlu0 %1802 }
 0x9bc   : > { %2798 = vmatpush3.bf16.msra.mxu1 %v1803_v59 }
 0x9bd   : > { %2809 = vmatprep.subr.bf16.mxu1 %v3282_v0 }
 0x9c5   : > { %v3014_v60 = vpop.eup %3013 }
 0x9c6   : > { %v1794_v61 = vmul.f32 %v3014_v60, %v3006_v38 }
 0x9c8   : > { %v1798_v62 = vpack.c.bf16 %v1794_v61, %v1794_v61 }
 0x9ca   : > { %2800 = vmatmul.mubr.msk.bf16.vlgmr.msra.gmra.mxu1 %vm1753_vm6, %v1798_v62 }
 0x9cb   : > { %2811 = vmatprep.mubr.msk.bf16.mxu1 %vm3283_vm0, %v3282_v0 }
 0xa29   : > { %v1783_v1 = vpop.xlane.xlu1 %1782 }
 0xa2a   : > { %3015 = vrcp.f32 %v1783_v1 }
 0xa2d   : > { %v1786_v2 = vpop.xlane.xlu0 %1785 }
 0xa2e   : > { %3017 = vrcp.f32 %v1786_v2 }
 0xa31   : > { %v1789_v56 = vpop.xlane.xlu1 %1788  ;;  %v1941_v9 = vpop.permute.xlu0 %1940 }
 0xa32   : > { %3019 = vrcp.f32 %v1789_v56 }
 0xa35   : > { %v1895_v4 = vpop.permute.xlu1 %1894 }
 0xa36   : > { %2810 = vmatpush3.bf16.msra.mxu1 %v1895_v4 }
 0xa37   : > { %v3016_v63 = vpop.eup %3015  ;;  %2821 = vmatprep.subr.bf16.mxu1 %v3282_v0 }
 0xa38   : > { %v1795_v5 = vmul.f32 %v3016_v63, %v3008_v52 }
 0xa3a   : > { %v1799_v6 = vpack.c.bf16 %v1795_v5, %v1795_v5 }
 0xa3b   : > { %v3018_v7 = vpop.eup %3017 }
 0xa3c   : > { %2806 = vmatmul.mubr.msk.bf16.vlgmr.msra.gmra.mxu0 %vm1753_vm6, %v1799_v6  ;;  %v1796_v11 = vmul.f32 %v3018_v7, %v3010_v51 }
 0xa3d   : > { %2816 = vmatpush3.bf16.msra.mxu0 %v1941_v9  ;;  %2817 = vmatprep.mubr.msk.bf16.mxu0 %vm3283_vm0, %v3282_v0 }
 0xa3e   : > { %v1800_v12 = vpack.c.bf16 %v1796_v11, %v1796_v11  ;;  %2827 = vmatprep.subr.bf16.mxu0 %v3282_v0  ;;  %v2981_v11 = vld [vmem:[#allocation13 + $0x8] sm:$0xff]  }
 0xa3f   : > { %v3020_v15 = vpop.eup %3019 }
 0xa40   : > { %2812 = vmatmul.mubr.msk.bf16.vlgmr.msra.gmra.mxu1 %vm1753_vm6, %v1800_v12  ;;  %v1797_v17 = vmul.f32 %v3020_v15, %v3012_v55  ;;  %v2982_v12 = vld [vmem:[#allocation13] sm:$0xff]  }
 0xa41   : > { %2822 = vmatpush3.bf16.msra.mxu1 %v1994_v14  ;;  %2823 = vmatprep.mubr.msk.bf16.mxu1 %vm3283_vm0, %v3282_v0  ;;  %v2984_v14 = vld [vmem:[%s3897_s14 + $0x10] sm:$0xff]  }
 0xa42   : > { %v1801_v18 = vpack.c.bf16 %v1797_v17, %v1797_v17  ;;  %2833 = vmatprep.subr.bf16.mxu1 %v3282_v0 }
 0xa44   : > { %2818 = vmatmul.mubr.msk.bf16.vlgmr.msra.gmra.mxu0 %vm1753_vm6, %v1801_v18 }
 0xa45   : > { %2828 = vmatpush3.bf16.msra.mxu0 %v2040_v19  ;;  %2829 = vmatprep.mubr.msk.bf16.mxu0 %vm3283_vm0, %v3282_v0  ;;  %v2594_v19 = vld [vmem:[%s3893_s10] ss:$0 sm:$0xff] }
 0xa46   : > { %2839 = vmatprep.subr.bf16.mxu0 %v3282_v0 }
 0xa8a   : > { %v1842_v13 = vpop.f32.mrf.mxu1 }
 0xa8b   : > { %v1986_v20 = vpack.c.bf16 %v1842_v13, %v1842_v13  ;;  %v2595_v13 = vld [vmem:[%s3939_s0] ss:$0 sm:$0xff] }
 0xa8c   : > { %v2801_v21 = vpop.f32.mrf.mxu1 }
 0xa8d   : > { %2824 = vmatmul.mubr.msk.bf16.vlgmr.msra.gmra.mxu1 %vm750_vm2, %v1986_v20 }
 0xa8e   : > { %v1845_v22 = vpop.f32.mrf.mxu1  ;;  %2834 = vmatpush3.bf16.msra.mxu1 %v2086_v10  ;;  %2835 = vmatprep.mubr.msk.bf16.mxu1 %vm3283_vm0, %v3282_v0 }
 0xa8f   : > { %2845 = vmatprep.subr.bf16.mxu1 %v3282_v0  ;;  %v2985_v22 = vld [vmem:[%s3897_s14 + $0x8] sm:$0xff]  }
 0xa90   : > { %v2802_v24 = vpop.f32.mrf.mxu1 }
 0xa91   : > { %v2986_v24 = vld [vmem:[%s3897_s14] sm:$0xff]  }
 0xafc   : > { %v1888_v26 = vpop.f32.mrf.mxu0 }
 0xafd   : > { %v1987_v27 = vpack.c.bf16 %v1888_v26, %v1888_v26 }
 0xafe   : > { %v2807_v29 = vpop.f32.mrf.mxu0 }
 0xaff   : > { %2830 = vmatmul.mubr.msk.bf16.vlgmr.msra.gmra.mxu0 %vm750_vm2, %v1987_v27 }
 0xb00   : > { %v1891_v30 = vpop.f32.mrf.mxu0  ;;  %v1934_v31 = vpop.f32.mrf.mxu1  ;;  %2840 = vmatpush3.bf16.msra.mxu0 %v2132_v28  ;;  %2841 = vmatprep.mubr.msk.bf16.mxu0 %vm3283_vm0, %v3282_v0 }
 0xb01   : > { %v1988_v32 = vpack.c.bf16 %v1934_v31, %v1934_v31  ;;  %2853 = vmatprep.subr.bf16.mxu0 %v3282_v0 }
 0xb02   : > { %v2808_v33 = vpop.f32.mrf.mxu0  ;;  %v2813_v3 = vpop.f32.mrf.mxu1 }
 0xb03   : > { %2836 = vmatmul.mubr.msk.bf16.vlgmr.msra.gmra.mxu1 %vm750_vm2, %v1988_v32 }
 0xb04   : > { %v1937_v34 = vpop.f32.mrf.mxu1  ;;  %v1980_v35 = vpop.f32.mrf.mxu0  ;;  %2849 = vmatprep.mubr.msk.bf16.mxu1 %vm3283_vm0, %v3282_v0  ;;  %2846 = vmatpush3.bf16.msra.mxu1 %v2981_v11 }
 0xb05   : > { %v1989_v36 = vpack.c.bf16 %v1980_v35, %v1980_v35  ;;  %2847 = vmatprep.subr.bf16.mxu1 %v3282_v0 }
 0xb06   : > { %v2814_v37 = vpop.f32.mrf.mxu1  ;;  %v2819_v38 = vpop.f32.mrf.mxu0 }
 0xb07   : > { %2842 = vmatmul.mubr.msk.bf16.vlgmr.msra.gmra.mxu0 %vm750_vm2, %v1989_v36 }
 0xb08   : > { %v1983_v39 = vpop.f32.mrf.mxu0  ;;  %2861 = vmatprep.mubr.msk.bf16.mxu0 %vm3283_vm0, %v3282_v0  ;;  %2848 = vmatpush3.bf16.msra.mxu1 %v2982_v12 }
 0xb0a   : > { %v2820_v40 = vpop.f32.mrf.mxu0 }
 0xb4d   : > { %v2030_v41 = vpop.f32.mrf.mxu1 }
 0xb4e   : > { %v2174_v52 = vsel %vm692_vm1, %v2030_v41, 0.0 }
 0xb4f   : > { %v2825_v42 = vpop.f32.mrf.mxu1 }
 0xb51   : > { %v2033_v43 = vpop.f32.mrf.mxu1 }
 0xb53   : > { %v2826_v44 = vpop.f32.mrf.mxu1 }
 0xbbf   : > { %v2076_v45 = vpop.f32.mrf.mxu0 }
 0xbc0   : > { %v2175_v48 = vsel %vm692_vm1, %v2076_v45, 0.0 }
 0xbc1   : > { %v2831_v47 = vpop.f32.mrf.mxu0  ;;  %v2176_v51 = vadd.f32 %v2175_v48, %v2174_v52  ;;  %v2607_v52 = vld [vmem:[%s3900_s17] ss:$0 sm:$0xff] }
 0xbc3   : > { %v2079_v49 = vpop.f32.mrf.mxu0  ;;  %v2122_v50 = vpop.f32.mrf.mxu1 }
 0xbc4   : > { %v2177_v53 = vsel %vm692_vm1, %v2122_v50, 0.0  ;;  %v2606_v49 = vld [vmem:[%s3899_s16] ss:$0 sm:$0xff] }
 0xbc5   : > { %v2832_v54 = vpop.f32.mrf.mxu0  ;;  %v2837_v55 = vpop.f32.mrf.mxu1  ;;  %v2178_v57 = vadd.f32 %v2177_v53, %v2176_v51 }
 0xbc7   : > { %v2125_v58 = vpop.f32.mrf.mxu1  ;;  %v2168_v59 = vpop.f32.mrf.mxu0 }
 0xbc8   : > { %v2179_v60 = vsel %vm692_vm1, %v2168_v59, 0.0 }
 0xbc9   : > { %v2180_v61 = vadd.f32 %v2179_v60, %v2178_v57  ;;  %v2838_v62 = vpop.f32.mrf.mxu1  ;;  %v2843_v1 = vpop.f32.mrf.mxu0 }
 0xbcb   : > { %v2171_v2 = vpop.f32.mrf.mxu0  ;;  %v2181_v56 = vadd.f32 %v2180_v61, %v3690_v46  ;;  %v2983_v46 = vld [vmem:[%s3897_s14 + $0x18] sm:$0xff]  }
 0xbcc   : > { %2854 = vmatpush3.bf16.msra.mxu0 %v2983_v46 }
 0xbcd   : > { %v2844_v4 = vpop.f32.mrf.mxu0  ;;  %v2184_v63 = vsel %vm692_vm1, %v2181_v56, 0.0  ;;  %2855 = vmatprep.subr.bf16.mxu0 %v3282_v0 }
 0xbce   : > { %2185 = vadd.xlane.f32.xlu1 %v2184_v63 }
 0xbd0   : > { %2856 = vmatpush3.bf16.msra.mxu0 %v2984_v14 }
 0xbd1   : > { %2857 = vmatprep.subr.bf16.mxu0 %v3282_v0 }
 0xbd4   : > { %2858 = vmatpush3.bf16.msra.mxu0 %v2985_v22 }
 0xbd5   : > { %2859 = vmatprep.subr.bf16.mxu0 %v3282_v0  ;;  %v2600_v0 = vld [vmem:[%s3898_s15] ss:$0 sm:$0xff] }
 0xbd8   : > { %2860 = vmatpush3.bf16.msra.mxu0 %v2986_v24 }
 0xc57   : > { %v2186_v5 = vpop.xlane.xlu1 %2185 }
 0xc58   : > { %v2187_v6 = vmul.f32 0.03125, %v2186_v5 }
 0xc5a   : > { %v2188_v7 = vsub.f32 %v2181_v56, %v2187_v6 }
 0xc5c   : > { %v2189_v8 = vmul.f32 %v2188_v7, %v2188_v7 }
 0xc5e   : > { %v2190_v9 = vsel %vm692_vm1, %v2189_v8, 0.0 }
 0xc5f   : > { %2191 = vadd.xlane.f32.xlu0 %v2190_v9 }
 0xce8   : > { %v2192_v15 = vpop.xlane.xlu0 %2191 }
 0xce9   : > { %v2193_v16 = vmul.f32 0.03125, %v2192_v15 }
 0xceb   : > { %v2194_v17 = vadd.f32 1e-05, %v2193_v16 }
 0xced   : > { %3021 = vrsqrt.f32 %v2194_v17 }
 0xcfa   : > { %v3022_v18 = vpop.eup %3021 }
 0xcfb   : > { %v2196_v23 = vmul.f32 %v3022_v18, %v2188_v7 }
 0xcfd   : > { %v2203_v20 = vmul.f32 %v2594_v19, %v2196_v23 }
 0xcff   : > { %v2210_v10 = vadd.f32 %v2595_v13, %v2203_v20 }
 0xd01   : > { %v2211_v21 = vpack.c.bf16 %v2210_v10, %v2210_v10 }
 0xd03   : > { %2850 = vmatmul.mubr.msk.bf16.vlgmr.msra.gmra.mxu1 %vm692_vm1, %v2211_v21 }
 0xdc3   : > { %v2272_v26 = vpop.f32.mrf.mxu1 }
 0xdc4   : > { %v2273_v27 = vadd.f32 %v2596_v25, %v2272_v26 }
 0xdc5   : > { %v2851_v28 = vpop.f32.mrf.mxu1 }
 0xdc6   : > { %v2278_v29 = vmax.f32 %v2273_v27, 0.0 }
 0xdc7   : > { %v2275_v30 = vpop.f32.mrf.mxu1 }
 0xdc8   : > { %v2279_v31 = vpack.c.bf16 %v2278_v29, %v2278_v29 }
 0xdc9   : > { %v2852_v32 = vpop.f32.mrf.mxu1 }
 0xdca   : > { %2862 = vmatmul.mubr.msk.bf16.vlgmr.msra.gmra.mxu0 %vm2319_vm7, %v2279_v31 }
 0xe8a   : > { %v2357_v33 = vpop.f32.mrf.mxu0 }
 0xe8b   : > { %v2358_v3 = vadd.f32 %v2600_v0, %v2357_v33 }
 0xe8c   : > { %v2863_v34 = vpop.f32.mrf.mxu0 }
 0xe8d   : > { %v2363_v35 = vadd.f32 %v2358_v3, %v2210_v10 }
 0xe8e   : > { %v2360_v36 = vpop.f32.mrf.mxu0 }
 0xe8f   : > { %v2366_v37 = vsel %vm692_vm1, %v2363_v35, 0.0 }
 0xe90   : > { %2367 = vadd.xlane.f32.xlu0 %v2366_v37  ;;  %v2864_v38 = vpop.f32.mrf.mxu0 }
 0xf19   : > { %v2368_v39 = vpop.xlane.xlu0 %2367 }
 0xf1a   : > { %v2369_v40 = vmul.f32 0.03125, %v2368_v39 }
 0xf1c   : > { %v2370_v41 = vsub.f32 %v2363_v35, %v2369_v40 }
 0xf1e   : > { %v2371_v42 = vmul.f32 %v2370_v41, %v2370_v41 }
 0xf20   : > { %v2372_v43 = vsel %vm692_vm1, %v2371_v42, 0.0 }
 0xf21   : > { %2373 = vadd.xlane.f32.xlu1 %v2372_v43 }
 0xfaa   : > { %v2374_v44 = vpop.xlane.xlu1 %2373 }
 0xfab   : > { %v2375_v45 = vmul.f32 0.03125, %v2374_v44 }
 0xfad   : > { %v2376_v47 = vadd.f32 1e-05, %v2375_v45 }
 0xfaf   : > { %3023 = vrsqrt.f32 %v2376_v47 }
 0xfbc   : > { %v3024_v48 = vpop.eup %3023 }
 0xfbd   : > { %v2378_v50 = vmul.f32 %v3024_v48, %v2370_v41 }
 0xfbf   : > { %v2385_v53 = vmul.f32 %v2606_v49, %v2378_v50 }
 0xfc1   : > { %v2392_v51 = vadd.f32 %v2607_v52, %v2385_v53 }
 0xfc3   : > { %2393 = vst.msk [vmem:[%s650_s22] sm:$0xff] %vm692_vm1, %v2392_v51 }
 0xfc4   : > { %3206 = shalt.err (!%p3203_p8)
}
 0xfc5   : > { %s3207_s25 = scalar_lea.hbm %s2406_s4, 128  ;;  %s3211_s0 = scalar_lea.hbm %s3901_s18, 256 }
 0xfc6   : > { %p3208_p3 = scmp.ne.s32.totalorder %s2406_s4, %s3207_s25  ;;  %p3212_p7 = scmp.lt.s32.totalorder %s2406_s4, %s3901_s18 }
 0xfc7   : > { %p3213_p9 = scmp.lt.s32.totalorder %s3211_s0, %s3207_s25 }
 0xfc8   : > { %p3209_p1 = pnand %p3208_p3, %p3426_p10 }
 0xfc9   : > { %p3214_p0 = por %p3213_p9, %p3212_p7 }
 0xfca   : > { %p3210_p6 = pneg %p3209_p1 }
 0xfcc   : > { %p3215_p13 = pnand %p3214_p0, %p3210_p6 }
 0xfce   : > { %3218 = shalt.err (!%p3215_p13)
}
 0xfcf   : > { %2889 = dma.vmem_to_hbm [thread:$0]  (%p3426_p10), %s2409_s27, 128, %s2406_s4, %s2395_s21  }
 0xfd0 PF: > { %s3940_s23 = sld [smem:[#allocation24_spill]] }
 0xfd1   : > { %s3941_s19 = sld [smem:[#allocation22_spill]] }
 0xfd6   : > { %p2926_p4 = scmp.ge.s32.totalorder %s3940_s23, 2 }
 0xfd7   : > { %s2420_s2 = sand.u32 1, %s3941_s19  }
 0xfd8   : > { %p2911_p12 = pnand %p2926_p4, %p3430_p11  ;;  %s2421_s20 = scalar_lea.sflag [#allocation6], %s2420_s2 }
 0xfda   : > { %p2912_p2 = pneg %p2911_p12 }
 0xfdc   : > { %3254 = dma.done.wait (%p2912_p2), %s2421_s20, 128  }
 0xfdd   : > { %3256 = vsyncadd (%p2912_p2), %s2421_s20, 4294967168  ;;  %s3943_s21 = sld [smem:[#allocation25_spill]]  ;;  %s3946_s19 = smov %s3263_s1 }
 0xfde   : > { %s3944_s11 = sld [smem:[#allocation23_spill]] }
 0xfdf   : > { %s3945_s20 = sld [smem:[#allocation26_spill]] }
 0xfe3   : > { %p38_p5 = scmp.ge.s32.totalorder %s3943_s21, 4  }
 0xfe4   : > { %s3947_s1 = smov %s3944_s11 }
 0xfe5   :  { %40 = sbr.rel (!%p38_p5) target bundleno = 33 (0x21), region = 151 }
 0xfea   :  { %2426 = vsyncpa [#allocation5], 1 }
 0xfeb   :  { %2428 = vsyncpa [#allocation5 + $0x1], 1 }
 0xfec   :  { %2429 = vsyncpa [#allocation8], 1 }
 0xfed   :  { %2430 = vsyncpa [#allocation11], 1 }
 0xfee   :  { %2431 = vsyncpa [#allocation14], 1 }
 0xfef   :  { %2432 = vsyncpa [#allocation6], 1 }
 0xff0   :  { %2434 = vsyncpa [#allocation6 + $0x1], 1 }

// kernel: tpu_custom_call.1
= control target key start
LH: loop header
LB: loop body
LE: loop exit
PB: predicated region body
PF: predicated region fallthrough
CT: control target
= control target key end

     0   :  { %s3883_s0 = inlined_call_operand.vmem [shape: s32[2], index: 0, kind: input, shape index: {}]   ;;  %s3884_s1 = inlined_call_operand.vmem [shape: f32[16,32], index: 1, kind: input, shape index: {}]   ;;  %s3885_s2 = inlined_call_operand.vmem [shape: f32[32,32], index: 2, kind: input, shape index: {}]   ;;  %s3886_s3 = inlined_call_operand.hbm [shape: bf16[32,96], index: 3, kind: input, shape index: {}]   ;;  %s3887_s4 = inlined_call_operand.hbm [shape: bf16[4,8,32], index: 4, kind: input, shape index: {}]   ;;  %s3888_s5 = inlined_call_operand.vmem [shape: f32[1,32], index: 5, kind: input, shape index: {}]   ;;  %s3889_s6 = inlined_call_operand.vmem [shape: f32[1,32], index: 6, kind: input, shape index: {}]   ;;  %s3890_s7 = inlined_call_operand.hbm [shape: bf16[32,32], index: 7, kind: input, shape index: {}]   ;;  %s3891_s8 = inlined_call_operand.hbm [shape: bf16[32,64], index: 8, kind: input, shape index: {}]   ;;  %s3892_s9 = inlined_call_operand.hbm [shape: bf16[4,8,32], index: 9, kind: input, shape index: {}]   ;;  %s3893_s10 = inlined_call_operand.vmem [shape: f32[1,32], index: 10, kind: input, shape index: {}]   ;;  %s3894_s11 = inlined_call_operand.vmem [shape: f32[1,32], index: 11, kind: input, shape index: {}]   ;;  %s3895_s12 = inlined_call_operand.hbm [shape: bf16[32,64], index: 12, kind: input, shape index: {}]   ;;  %s3896_s13 = inlined_call_operand.vmem [shape: f32[1,64], index: 13, kind: input, shape index: {}]   ;;  %s3897_s14 = inlined_call_operand.vmem [shape: bf16[64,32], index: 14, kind: input, shape index: {}]   ;;  %s3898_s15 = inlined_call_operand.vmem [shape: f32[1,32], index: 15, kind: input, shape index: {}]   ;;  %s3899_s16 = inlined_call_operand.vmem [shape: f32[1,32], index: 16, kind: input, shape index: {}]   ;;  %s3900_s17 = inlined_call_operand.vmem [shape: f32[1,32], index: 17, kind: input, shape index: {}]   ;;  %s3901_s18 = inlined_call_operand.hbm [shape: f32[16,32], index: 18, kind: output, shape index: {}]  }
   0x1   :  { %3909 = sst [smem:[#allocation28_spill]] %s3883_s0 }
   0x2   :  { %3910 = sst [smem:[#allocation29_spill]] %s3884_s1 }
   0x3   :  { %3911 = sst [smem:[#allocation30_spill]] %s3885_s2 }
   0x4   :  { %3912 = sst [smem:[#allocation31_spill]] %s3887_s4 }
   0x5   :  { %3913 = sst [smem:[#allocation32_spill]] %s3894_s11 }
   0x6   :  { %s3914_s29 = sld [smem:[#allocation28_spill]] }
   0xc   :  { %s23_s11 = sshll.u32 %s3914_s29, 4  ;;  %s24_s11 = int_to_ptr.vmem [resolvable:$true] %s23_s11 }
   0xd   :  { %s3025_s30 = scalar_lea.vmem %s24_s11, 16  ;;  %p3030_p1 = scmp.lt.s32.totalorder %s24_s11, %s24_s11 }
   0xe   :  { %p3026_p0 = scmp.ne.s32.totalorder %s24_s11, %s3025_s30  ;;  %p3031_p2 = scmp.lt.s32.totalorder %s3025_s30, %s3025_s30 }
  0x10   :  { %p3032_p3 = por %p3031_p2, %p3030_p1 }
  0x12   :  { %p3033_p4 = pnand %p3032_p3, %p3026_p0 }
  0x14   :  { %3036 = shalt.err (!%p3033_p4)  }
  0x15   :  { %s3273_s0 = smov [#allocation3]  }
  0x16   :  { %26 = dma.vmem_to_smem %s24_s11, 16, %s3273_s0, [#allocation2] }
  0x17   :  { %3235 = dma.done.wait [#allocation2], 16 }
  0x18   :  { %3236 = vsyncadd [#allocation2], 4294967280 }
  0x19   :  { %28 = sfence }
  0x1a   :  { %29 = vsyncpa [#allocation5], 0 }
  0x1b   :  { %30 = vsyncpa [#allocation8], 0 }
  0x1c   :  { %31 = vsyncpa [#allocation11], 0 }
  0x1d   :  { %32 = vsyncpa [#allocation14], 0 }
  0x1e   :  { %33 = vsyncpa [#allocation6], 0 }
  0x1f   :  { %35 = vsyncpa [#allocation6 + $0x1], 0  ;;  %s3388_s19 = smov 0   ;;  %s3390_s1 = smov 0  }
  0x20   :  { %s3392_s20 = smov 0   ;;  %s3394_s21 = smov 0  }
  0x21 LB: > { %3915 = sst [smem:[#allocation22_spill]] %s3259_s19  ;;  %s3409_s11 = sadd.s32 4294967295, %s3271_s21   ;;  %s3271_s21 = sphi %s3394_s21, %s3943_s21   ;;  %s3267_s20 = sphi %s3392_s20, %s3945_s20   ;;  %s3263_s1 = sphi %s3390_s1, %s3947_s1   ;;  %s3259_s19 = sphi %s3388_s19, %s3946_s19  }
  0x22   : > { %3916 = sst [smem:[#allocation23_spill]] %s3267_s20  ;;  %s2539_s22 = sadd.s32 4294967294, %s3271_s21  }
  0x23   : > { %3917 = sst [smem:[#allocation24_spill]] %s3271_s21  ;;  %s3413_s2 = sadd.s32 1, %s3271_s21  }
  0x24   : > { %3918 = sst [smem:[#allocation25_spill]] %s3413_s2  ;;  %s415_s23 = sadd.s32 1, %s3267_s20 }
  0x25   : > { %s412_s24 = ssub.s32 %s3271_s21, %s3413_s2  ;;  %p425_p5 = scmp.ne.s32.totalorder %s3267_s20, %s3263_s1 }
  0x26   : > { %p413_p6 = scmp.eq.s32.totalorder %s412_s24, 0  ;;  %p426_p7 = scmp.eq.s32.totalorder %s3409_s11, 1 }
  0x27   : > { %p431_p8 = scmp.ne.s32.totalorder %s3263_s1, %s3259_s19  ;;  %p432_p9 = scmp.eq.s32.totalorder %s2539_s22, 1 }
  0x28   : > { %s3424_s25 = scalar_select %p413_p6, %s3267_s20, %s415_s23  }
  0x29   : > { %p3426_p10 = por %p426_p7, %p425_p5  ;;  %p3430_p11 = por %p432_p9, %p431_p8 }
  0x2a   : > { %3919 = sst [smem:[#allocation26_spill]] %s3424_s25  ;;  %p2540_p12 = scmp.ge.s32.totalorder %s3271_s21, 1 }
  0x2b   : > { %s3921_s27 = scalar_select %p3430_p11, 1, 0 }
  0x2c   : > { %p439_p13 = scmp.lt.s32.totalorder %s3271_s21, 3  ;;  %p3908_p0 = scmp.eq.s32.totalorder %s3409_s11, 0 }
  0x2d   : > { %3922 = sst [smem:[#allocation27_spill]] %s3921_s27  ;;  %s3274_s29 = smov [#allocation7]  }
  0x2e   : > { %p3437_p1 = pnand %p2540_p12, %p439_p13  ;;  %s464_s30 = sshll.u32 %s3274_s29, 4  ;;  %s465_s30 = int_to_ptr.vmem [resolvable:$true] %s464_s30 }
  0x2f   : > { %s3275_s22 = smov [#allocation10]   ;;  %s3276_s24 = smov [#allocation4]  }
  0x30   : > { %p2891_p2 = pneg %p3437_p1  ;;  %s496_s23 = sshll.u32 %s3275_s22, 4  ;;  %s497_s23 = int_to_ptr.vmem [resolvable:$true] %s496_s23 }
  0x31   : > { %s451_s25 = sshll.u32 %s3276_s24, 4  ;;  %s3048_s2 = scalar_lea.vmem %s465_s30, 256  ;;  %s452_s25 = int_to_ptr.vmem [resolvable:$true] %s451_s25 }
  0x32   : > { %p3445_p3 = pnand %p3908_p0, %p2891_p2  ;;  %p3049_p5 = scmp.ne.s32.totalorder %s465_s30, %s3048_s2 }
  0x33   : > { %p3056_p8 = scmp.lt.s32.totalorder %s465_s30, %s465_s30  ;;  %p3057_p9 = scmp.lt.s32.totalorder %s3048_s2, %s3048_s2 }
  0x34   : > { %p3451_p4 = pneg %p3445_p3 }
  0x35   : > { %p3058_p12 = por %p3057_p9, %p3056_p8 }
  0x36   : > { %p3051_p6 = pnand %p3049_p5, %p3451_p4 }
  0x38   : > { %p3052_p7 = pneg %p3051_p6 }
  0x3a   : > { %p3059_p13 = pnand %p3058_p12, %p3052_p7 }
  0x3c   : > { %3062 = shalt.err (!%p3059_p13)
}
  0x3d   : > { %s3277_s29 = smov 64   ;;  %s3278_s22 = smov 4  }
  0x3e   : > { %s3926_s4 = sld [smem:[#allocation31_spill]]  ;;  %s3074_s19 = scalar_lea.vmem %s497_s23, 256 }
  0x3f   : > { %p3075_p2 = scmp.ne.s32.totalorder %s497_s23, %s3074_s19  ;;  %p3082_p8 = scmp.lt.s32.totalorder %s497_s23, %s497_s23 }
  0x40   : > { %p3083_p7 = scmp.lt.s32.totalorder %s3074_s19, %s3074_s19 }
  0x41   : > { %p3077_p5 = pnand %p3075_p2, %p3451_p4 }
  0x42   : > { %p3084_p9 = por %p3083_p7, %p3082_p8 }
  0x43   : > { %p3078_p6 = pneg %p3077_p5 }
  0x44   : > { %2897 = dma.hbm_to_vmem [thread:$0]  (!%p3445_p3), %s3926_s4, 256, %s465_s30, [#allocation8], %s3277_s29, %s3277_s29, %s3278_s22  }
  0x45   : > { %p3085_p12 = pnand %p3084_p9, %p3078_p6 }
  0x47   : > { %3088 = shalt.err (!%p3085_p12)
}
  0x48   : > { %2903 = dma.hbm_to_vmem [thread:$0]  (!%p3445_p3), %s3891_s8, 256, %s497_s23, [#allocation11], %s3277_s29, %s3277_s29, %s3278_s22  }
  0x49   : > { %s3100_s27 = scalar_lea.vmem %s452_s25, 256  ;;  %p3108_p0 = scmp.lt.s32.totalorder %s452_s25, %s452_s25 }
  0x4a   : > { %p3101_p13 = scmp.ne.s32.totalorder %s452_s25, %s3100_s27  ;;  %p3109_p8 = scmp.lt.s32.totalorder %s3100_s27, %s3100_s27 }
  0x4c   : > { %p3103_p2 = pnand %p3101_p13, %p3451_p4  ;;  %p3110_p6 = por %p3109_p8, %p3108_p0 }
  0x4e   : > { %p3104_p5 = pneg %p3103_p2 }
  0x50   : > { %p3111_p7 = pnand %p3110_p6, %p3104_p5 }
  0x52   : > { %3114 = shalt.err (!%p3111_p7)
}
  0x53   : > { %2894 = dma.hbm_to_vmem [thread:$0]  (!%p3445_p3), %s3886_s3, 256, %s452_s25, [#allocation5], %s3277_s29, %s3277_s29, %s3278_s22  }
  0x54   : > { %s3279_s30 = smov [#allocation9]   ;;  %s3280_s24 = smov [#allocation12]  }
  0x55   : > { %s483_s23 = sshll.u32 %s3279_s30, 4  ;;  %s509_s2 = sshll.u32 %s3280_s24, 4  ;;  %s484_s23 = int_to_ptr.vmem [resolvable:$true] %s483_s23  ;;  %s510_s2 = int_to_ptr.vmem [resolvable:$true] %s509_s2 }
  0x56   : > { %s3126_s4 = scalar_lea.vmem %s484_s23, 256  ;;  %p3134_p13 = scmp.lt.s32.totalorder %s484_s23, %s484_s23 }
  0x57   : > { %p3127_p9 = scmp.ne.s32.totalorder %s484_s23, %s3126_s4  ;;  %p3135_p2 = scmp.lt.s32.totalorder %s3126_s4, %s3126_s4 }
  0x59   : > { %p3129_p0 = pnand %p3127_p9, %p3451_p4  ;;  %p3136_p5 = por %p3135_p2, %p3134_p13 }
  0x5b   : > { %p3130_p12 = pneg %p3129_p0 }
  0x5d   : > { %p3137_p8 = pnand %p3136_p5, %p3130_p12 }
  0x5f   : > { %3140 = shalt.err (!%p3137_p8)
}
  0x60   : > { %2900 = dma.hbm_to_vmem [thread:$0]  (!%p3445_p3), %s3890_s7, 256, %s484_s23, [#allocation8], %s3277_s29, %s3277_s29, %s3278_s22  }
  0x61   : > { %s3152_s19 = scalar_lea.vmem %s510_s2, 256  ;;  %p3160_p0 = scmp.lt.s32.totalorder %s510_s2, %s510_s2 }
  0x62   : > { %p3153_p6 = scmp.ne.s32.totalorder %s510_s2, %s3152_s19  ;;  %p3161_p13 = scmp.lt.s32.totalorder %s3152_s19, %s3152_s19 }
  0x64   : > { %p3155_p7 = pnand %p3153_p6, %p3451_p4  ;;  %p3162_p12 = por %p3161_p13, %p3160_p0 }
  0x66   : > { %p3156_p9 = pneg %p3155_p7 }
  0x68   : > { %p3163_p2 = pnand %p3162_p12, %p3156_p9 }
  0x6a   : > { %3166 = shalt.err (!%p3163_p2)
}
  0x6b   : > { %2906 = dma.hbm_to_vmem [thread:$0]  (!%p3445_p3), %s3892_s9, 256, %s510_s2, [#allocation11], %s3277_s29, %s3277_s29, %s3278_s22  }
  0x6c   : > { %s3281_s30 = smov [#allocation13]  }
  0x6d   : > { %s528_s23 = sshll.u32 %s3281_s30, 4  ;;  %s529_s23 = int_to_ptr.vmem [resolvable:$true] %s528_s23 }
  0x6e   : > { %s3178_s24 = scalar_lea.vmem %s529_s23, 256  ;;  %p3186_p7 = scmp.lt.s32.totalorder %s529_s23, %s529_s23 }
  0x6f   : > { %p3179_p5 = scmp.ne.s32.totalorder %s529_s23, %s3178_s24  ;;  %p3187_p9 = scmp.lt.s32.totalorder %s3178_s24, %s3178_s24 }
  0x71   : > { %p3181_p8 = pnand %p3179_p5, %p3451_p4  ;;  %p3188_p0 = por %p3187_p9, %p3186_p7 }
  0x73   : > { %p3182_p6 = pneg %p3181_p8 }
  0x75   : > { %p3189_p13 = pnand %p3188_p0, %p3182_p6 }
  0x77   : > { %3192 = shalt.err (!%p3189_p13)
}
  0x78   : > { %2909 = dma.hbm_to_vmem [thread:$0]  (!%p3445_p3), %s3895_s12, 256, %s529_s23, [#allocation14], %s3277_s29, %s3277_s29, %s3278_s22  }
  0x79   : > { %575 = sbr.rel (%p3437_p1) target bundleno = 4048 (0xfd0), region = 88  ;;  %p3927_p4 = scmp.eq.s32.totalorder (!%p3437_p1), %s3409_s11, 0 }
  0x7e   : > { %3238 = dma.done.wait (%p3927_p4), [#allocation5], 256   ;;  %p3928_p12 = pmov %p3927_p4 }
  0x7f   : > { %p3929_p2 = pmov %p3927_p4 }
  0x80   : > { %3240 = vsyncadd (%p3928_p12), [#allocation5], 4294967040 }
  0x81   : > { %3242 = dma.done.wait (%p3929_p2), [#allocation8], 512   ;;  %p3930_p5 = pmov %p3929_p2 }
  0x82   : > { %p3931_p8 = pmov %p3929_p2 }
  0x83   : > { %3244 = vsyncadd (%p3930_p5), [#allocation8], 4294966784 }
  0x84   : > { %3246 = dma.done.wait (%p3931_p8), [#allocation11], 512   ;;  %p3932_p3 = pmov %p3929_p2 }
  0x85   : > { %p3933_p1 = pmov %p3929_p2 }
  0x86   : > { %3248 = vsyncadd (%p3932_p3), [#allocation11], 4294966784 }
  0x87   : > { %3250 = dma.done.wait (%p3933_p1), [#allocation14], 256   ;;  %p3934_p6 = pmov %p3933_p1 }
  0x88   : > { %p651_p7 = scmp.lt.s32.totalorder %s3409_s11, 1  ;;  %v3282_v0 = vmov 0.0   ;;  %vm3283_vm0 = vmmov 0   ;;  %s3935_s22 = sld [smem:[#allocation29_spill]]  ;;  %v2975_v1 = vld [vmem:[#allocation4 + $0x8] sm:$0xff]   ;;  %v2976_v2 = vld [vmem:[#allocation4] sm:$0xff]   ;;  %v665_v21 = vlaneseq }
  0x89   : > { %3252 = vsyncadd (%p3934_p6), [#allocation14], 4294967040  ;;  %2677 = vmatprep.subr.bf16.mxu1 %v3282_v0  ;;  %2681 = vmatprep.mubr.msk.bf16.mxu1 %vm3283_vm0, %v3282_v0  ;;  %vm692_vm1 = vcmask 261120   ;;  %s3284_s19 = smov 104   ;;  %s3285_s4 = smov 120   ;;  %vm750_vm2 = vcmask 64512  }
  0x8a   : > { %s652_s20 = scalar_select %p651_p7, %s3409_s11, 1  ;;  %2691 = vmatprep.subr.bf16.mxu0 %v3282_v0  ;;  %2693 = vmatprep.mubr.msk.bf16.mxu0 %vm3283_vm0, %v3282_v0  ;;  %v666_v22 = vshrl.u32 %v665_v21, 7  ;;  %v3599_v23 = vand.u32 127, %v665_v21  ;;  %vm1004_vm4 = vcmask 1043456   ;;  %vm1753_vm6 = vcmask 130048  }
  0x8b   : > { %2678 = vmatpush3.bf16.msra.mxu1 %v2975_v1  ;;  %s3286_s21 = smov 96   ;;  %s3287_s30 = smov 112   ;;  %vm2319_vm7 = vcmask 523264  }
  0x8c   : > { %s2556_s28 = sshll.u32 %s652_s20, 3  ;;  %2679 = vmatprep.subr.bf16.mxu1 %v3282_v0  ;;  %vm669_vm3 = vcmp.le.s32.totalorder %v3599_v23, %v666_v22  ;;  %s3288_s23 = smov 64  }
  0x8d   : > { %s2557_s24 = sshll.u32 %s3409_s11, 1  ;;  %s2609_s29 = sshll.u32 %s3409_s11, 7 }
  0x8e   : > { %s654_s27 = scalar_lea.vmem %s3935_s22, %s2556_s28  ;;  %p656_p9 = scmp.lt.s32.totalorder %s2557_s24, 3 }
  0x8f   : > { %v3544_v3 = vld [vmem:[%s654_s27] sm:$0xff]  ;;  %2680 = vmatpush3.bf16.msra.mxu1 %v2976_v2  ;;  %s3936_s28 = sld [smem:[#allocation30_spill]]  ;;  %s3289_s2 = smov [#allocation15]  }
  0x90   : > { %v675_v4 = vpack.c.bf16 %v3544_v3, %v3544_v3  ;;  %2685 = vmatprep.subr.bf16.mxu1 %v3282_v0  ;;  %s3949_s24 = smov (!%p656_p9, %s2557_s24), 3  ;;  %s3197_s20 = sshll.u32 %s3289_s2, 4  ;;  %s3198_s20 = int_to_ptr.vmem [resolvable:$false] %s3197_s20 }
  0x91   : > { %s2558_s25 = sshll.u32 %s3949_s24, 3  ;;  %s648_s24 = sand.u32 1, %s3263_s1  }
  0x92   : > { %2682 = vmatmul.mubr.msk.bf16.vlgmr.msra.gmra.mxu1 %vm692_vm1, %v675_v4 }
  0x93   : > { %2687 = vmatprep.mubr.msk.bf16.mxu1 %vm3283_vm0, %v3282_v0 }
  0x95   : > { %s659_s0 = scalar_lea.vmem %s3936_s28, %s2558_s25  ;;  %s2555_s25 = sshll.u32 %s648_s24, 3 }
  0x96   : > { %s650_s22 = scalar_lea.vmem [#allocation15], %s2555_s25 }
  0x97   : > { %s2408_s27 = sshll.u32 %s650_s22, 4  ;;  %s2409_s27 = int_to_ptr.vmem [resolvable:$true] %s2408_s27 }
  0x98   : > { %p3200_p12 = scmp.lt.s32.totalorder %s2409_s27, %s3198_s20 }
 0x152   : > { %v730_v5 = vpop.f32.mrf.mxu1 }
 0x153   : > { %v3553_v6 = vpack.c.bf16 %v730_v5, %v730_v5 }
 0x154   : > { %v2683_v7 = vpop.f32.mrf.mxu1 }
 0x155   : > { %742 = vrot.lane.b32.xlu1 %v3553_v6, %s3284_s19  ;;  %738 = vrot.lane.b32.xlu0 %v3553_v6, %s3285_s4 }
 0x156   : > { %v733_v8 = vpop.f32.mrf.mxu1 }
 0x158   : > { %v2684_v9 = vpop.f32.mrf.mxu1 }
 0x159   : > { %748 = vrot.lane.b32.xlu1 %v3553_v6, %s3286_s21  ;;  %740 = vrot.lane.b32.xlu0 %v3553_v6, %s3287_s30 }
 0x1c7   : > { %v3563_v10 = vpop.permute.xlu1 %742  ;;  %v3565_v11 = vpop.permute.xlu0 %738 }
 0x1c8   : > { %797 = vrot.lane.b32.xlu0 %v3565_v11, %s3286_s21 }
 0x1cb   : > { %v749_v12 = vpop.permute.xlu1 %748  ;;  %v3569_v13 = vpop.permute.xlu0 %740 }
 0x1cc   : > { %v755_v14 = vsel %vm750_vm2, %v749_v12, 0  ;;  %893 = vrot.lane.b32.xlu0 %v3563_v10, %s3286_s21  ;;  %845 = vrot.lane.b32.xlu1 %v3569_v13, %s3286_s21 }
 0x1cd   : > { %2686 = vmatpush3.bf16.xpose.msra.mxu1 %v755_v14 }
 0x1ce   : > { %2697 = vmatprep.subr.bf16.mxu1 %v3282_v0 }
 0x1d4   : > { %2688 = vmatmul.mubr.msk.bf16.vlgmr.msra.gmra.mxu1 %vm750_vm2, %v3553_v6 }
 0x1d5   : > { %2699 = vmatprep.mubr.msk.bf16.mxu1 %vm3283_vm0, %v3282_v0 }
 0x23a   : > { %v798_v15 = vpop.permute.xlu0 %797 }
 0x23b   : > { %v803_v16 = vsel %vm750_vm2, %v798_v15, 0 }
 0x23c   : > { %2692 = vmatpush3.bf16.xpose.msra.mxu0 %v803_v16 }
 0x23d   : > { %2703 = vmatprep.subr.bf16.mxu0 %v3282_v0 }
 0x23e   : > { %v846_v17 = vpop.permute.xlu1 %845  ;;  %v894_v19 = vpop.permute.xlu0 %893 }
 0x23f   : > { %v851_v18 = vsel %vm750_vm2, %v846_v17, 0  ;;  %v899_v20 = vsel %vm750_vm2, %v894_v19, 0 }
 0x240   : > { %2698 = vmatpush3.bf16.xpose.msra.mxu1 %v851_v18 }
 0x241   : > { %2709 = vmatprep.subr.bf16.mxu1 %v3282_v0 }
 0x243   : > { %2694 = vmatmul.mubr.msk.bf16.vlgmr.msra.gmra.mxu0 %vm750_vm2, %v3565_v11 }
 0x244   : > { %2704 = vmatpush3.bf16.xpose.msra.mxu0 %v899_v20  ;;  %2705 = vmatprep.mubr.msk.bf16.mxu0 %vm3283_vm0, %v3282_v0 }
 0x245   : > { %2715 = vmatprep.subr.bf16.mxu0 %v3282_v0 }
 0x247   : > { %2700 = vmatmul.mubr.msk.bf16.vlgmr.msra.gmra.mxu1 %vm750_vm2, %v3569_v13 }
 0x248   : > { %2711 = vmatprep.mubr.msk.bf16.mxu1 %vm3283_vm0, %v3282_v0 }
 0x24b   : > { %2706 = vmatmul.mubr.msk.bf16.vlgmr.msra.gmra.mxu0 %vm750_vm2, %v3563_v10 }
 0x24c   : > { %2717 = vmatprep.mubr.msk.bf16.mxu0 %vm3283_vm0, %v3282_v0 }
 0x294   : > { %v791_v24 = vpop.f32.mrf.mxu1 }
 0x295   : > { %v941_v25 = vmul.f32 0.35355338, %v791_v24 }
 0x296   : > { %v2689_v26 = vpop.f32.mrf.mxu1 }
 0x297   : > { %v947_v27 = vsel %vm669_vm3, %v941_v25, -1000000.0 }
 0x298   : > { %v794_v28 = vpop.f32.mrf.mxu1  ;;  %v951_v29 = vsel %vm750_vm2, %v947_v27, -inf }
 0x299   : > { %952 = vmax.xlane.f32.xlu1 %v951_v29  ;;  %v744_v29 = vld [vmem:[#allocation7] sm:$0xf] }
 0x29a   : > { %v2690_v30 = vpop.f32.mrf.mxu1 }
 0x303   : > { %v839_v31 = vpop.f32.mrf.mxu0 }
 0x304   : > { %v942_v32 = vmul.f32 0.35355338, %v839_v31 }
 0x305   : > { %v2695_v33 = vpop.f32.mrf.mxu0 }
 0x306   : > { %v948_v34 = vsel %vm669_vm3, %v942_v32, -1000000.0  ;;  %v1200_v33 = vsel %vm1004_vm4, %v744_v29, 0 }
 0x307   : > { %v842_v35 = vpop.f32.mrf.mxu0  ;;  %v887_v36 = vpop.f32.mrf.mxu1  ;;  %v954_v37 = vsel %vm750_vm2, %v948_v34, -inf }
 0x308   : > { %v943_v38 = vmul.f32 0.35355338, %v887_v36  ;;  %955 = vmax.xlane.f32.xlu0 %v954_v37  ;;  %v745_v35 = vld [vmem:[#allocation7 + $0x4] sm:$0xf] }
 0x309   : > { %v2696_v39 = vpop.f32.mrf.mxu0  ;;  %v2701_v40 = vpop.f32.mrf.mxu1 }
 0x30a   : > { %v949_v41 = vsel %vm669_vm3, %v943_v38, -1000000.0  ;;  %v1246_v38 = vsel %vm1004_vm4, %v745_v35, 0  ;;  %v746_v39 = vld [vmem:[#allocation7 + $0x8] sm:$0xf] }
 0x30b   : > { %v890_v42 = vpop.f32.mrf.mxu1  ;;  %v935_v43 = vpop.f32.mrf.mxu0  ;;  %v957_v44 = vsel %vm750_vm2, %v949_v41, -inf }
 0x30c   : > { %v944_v45 = vmul.f32 0.35355338, %v935_v43  ;;  %958 = vmax.xlane.f32.xlu0 %v957_v44  ;;  %v1292_v42 = vsel %vm1004_vm4, %v746_v39, 0 }
 0x30d   : > { %v2702_v46 = vpop.f32.mrf.mxu1  ;;  %v2707_v47 = vpop.f32.mrf.mxu0 }
 0x30e   : > { %v950_v48 = vsel %vm669_vm3, %v944_v45, -1000000.0  ;;  %v747_v46 = vld [vmem:[#allocation7 + $0xc] sm:$0xf] }
 0x30f   : > { %v938_v49 = vpop.f32.mrf.mxu0  ;;  %v960_v50 = vsel %vm750_vm2, %v950_v48, -inf }
 0x310   : > { %961 = vmax.xlane.f32.xlu1 %v960_v50  ;;  %v1338_v49 = vsel %vm1004_vm4, %v747_v46, 0 }
 0x311   : > { %v2708_v51 = vpop.f32.mrf.mxu0 }
 0x321   : > { %1048 = vrot.lane.b32.xlu1 %v3565_v11, %s3288_s23 }
 0x322   : > { %v953_v52 = vpop.xlane.xlu1 %952 }
 0x323   : > { %v963_v53 = vsub.f32 %v947_v27, %v953_v52 }
 0x325   : > { %v967_v54 = vmul.f32 1.442695, %v963_v53 }
 0x327   : > { %2987 = vpow2.f32 %v967_v54 }
 0x334   : > { %v2988_v55 = vpop.eup %2987 }
 0x335   : > { %v975_v56 = vsel %vm750_vm2, %v2988_v55, 0.0 }
 0x336   : > { %976 = vadd.xlane.f32.xlu0 %v975_v56 }
 0x34c   : > { %999 = vrot.lane.b32.xlu0 %v3553_v6, %s3288_s23 }
 0x391   : > { %v956_v57 = vpop.xlane.xlu0 %955 }
 0x392   : > { %v964_v58 = vsub.f32 %v948_v34, %v956_v57 }
 0x394   : > { %v969_v59 = vmul.f32 1.442695, %v964_v58 }
 0x395   : > { %v959_v60 = vpop.xlane.xlu0 %958 }
 0x396   : > { %2989 = vpow2.f32 %v969_v59  ;;  %v965_v61 = vsub.f32 %v949_v41, %v959_v60 }
 0x398   : > { %v971_v62 = vmul.f32 1.442695, %v965_v61 }
 0x399   : > { %v962_v63 = vpop.xlane.xlu1 %961 }
 0x39a   : > { %2991 = vpow2.f32 %v971_v62  ;;  %v966_v1 = vsub.f32 %v950_v48, %v962_v63 }
 0x39c   : > { %v973_v2 = vmul.f32 1.442695, %v966_v1 }
 0x39d   : > { %v1049_v4 = vpop.permute.xlu1 %1048 }
 0x39e   : > { %2993 = vpow2.f32 %v973_v2  ;;  %v1054_v5 = vsel %vm1004_vm4, %v1049_v4, 0 }
 0x39f   : > { %2716 = vmatpush3.bf16.msra.mxu0 %v1054_v5 }
 0x3a0   : > { %2727 = vmatprep.subr.bf16.mxu0 %v3282_v0 }
 0x3a3   : > { %v2990_v6 = vpop.eup %2989 }
 0x3a4   : > { %v978_v7 = vsel %vm750_vm2, %v2990_v6, 0.0 }
 0x3a5   : > { %979 = vadd.xlane.f32.xlu1 %v978_v7 }
 0x3a7   : > { %v2992_v8 = vpop.eup %2991 }
 0x3a8   : > { %v981_v9 = vsel %vm750_vm2, %v2992_v8, 0.0 }
 0x3a9   : > { %982 = vadd.xlane.f32.xlu0 %v981_v9 }
 0x3ab   : > { %v2994_v11 = vpop.eup %2993 }
 0x3ac   : > { %v984_v12 = vsel %vm750_vm2, %v2994_v11, 0.0 }
 0x3ad   : > { %985 = vadd.xlane.f32.xlu1 %v984_v12 }
 0x3be   : > { %1096 = vrot.lane.b32.xlu1 %v3569_v13, %s3288_s23 }
 0x3bf   : > { %1144 = vrot.lane.b32.xlu0 %v3563_v10, %s3288_s23  ;;  %v977_v14 = vpop.xlane.xlu0 %976 }
 0x3c0   : > { %2995 = vrcp.f32 %v977_v14 }
 0x3c3   : > { %v1000_v15 = vpop.permute.xlu0 %999 }
 0x3c4   : > { %v1006_v16 = vsel %vm1004_vm4, %v1000_v15, 0 }
 0x3c5   : > { %2710 = vmatpush3.bf16.msra.mxu1 %v1006_v16 }
 0x3c6   : > { %2721 = vmatprep.subr.bf16.mxu1 %v3282_v0 }
 0x3cd   : > { %v2996_v17 = vpop.eup %2995 }
 0x3ce   : > { %v991_v18 = vmul.f32 %v2996_v17, %v2988_v55 }
 0x3d0   : > { %v995_v19 = vpack.c.bf16 %v991_v18, %v991_v18 }
 0x3d2   : > { %2712 = vmatmul.mubr.msk.bf16.vlgmr.msra.gmra.mxu1 %vm750_vm2, %v995_v19 }
 0x3d3   : > { %2723 = vmatprep.mubr.msk.bf16.mxu1 %vm3283_vm0, %v3282_v0 }
 0x42e   : > { %v980_v13 = vpop.xlane.xlu1 %979 }
 0x42f   : > { %2997 = vrcp.f32 %v980_v13 }
 0x432   : > { %v983_v20 = vpop.xlane.xlu0 %982 }
 0x433   : > { %2999 = vrcp.f32 %v983_v20 }
 0x436   : > { %v986_v10 = vpop.xlane.xlu1 %985  ;;  %v1145_v26 = vpop.permute.xlu0 %1144 }
 0x437   : > { %3001 = vrcp.f32 %v986_v10  ;;  %v1150_v30 = vsel %vm1004_vm4, %v1145_v26, 0 }
 0x43a   : > { %v1097_v21 = vpop.permute.xlu1 %1096 }
 0x43b   : > { %v1102_v22 = vsel %vm1004_vm4, %v1097_v21, 0 }
 0x43c   : > { %v2998_v24 = vpop.eup %2997  ;;  %2722 = vmatpush3.bf16.msra.mxu1 %v1102_v22 }
 0x43d   : > { %v992_v25 = vmul.f32 %v2998_v24, %v2990_v6  ;;  %2733 = vmatprep.subr.bf16.mxu1 %v3282_v0 }
 0x43f   : > { %v996_v27 = vpack.c.bf16 %v992_v25, %v992_v25 }
 0x440   : > { %v3000_v28 = vpop.eup %2999 }
 0x441   : > { %2718 = vmatmul.mubr.msk.bf16.vlgmr.msra.gmra.mxu0 %vm750_vm2, %v996_v27  ;;  %v993_v31 = vmul.f32 %v3000_v28, %v2992_v8  ;;  %v2977_v27 = vld [vmem:[#allocation10 + $0x8] sm:$0xff]  }
 0x442   : > { %2728 = vmatpush3.bf16.msra.mxu0 %v1150_v30  ;;  %2729 = vmatprep.mubr.msk.bf16.mxu0 %vm3283_vm0, %v3282_v0 }
 0x443   : > { %v997_v32 = vpack.c.bf16 %v993_v31, %v993_v31  ;;  %2739 = vmatprep.subr.bf16.mxu0 %v3282_v0 }
 0x444   : > { %v3002_v34 = vpop.eup %3001 }
 0x445   : > { %2724 = vmatmul.mubr.msk.bf16.vlgmr.msra.gmra.mxu1 %vm750_vm2, %v997_v32  ;;  %v994_v36 = vmul.f32 %v3002_v34, %v2994_v11  ;;  %v664_v34 = vld [vmem:[%s659_s0 + $0x8] sm:$0xff] }
 0x446   : > { %2734 = vmatpush3.bf16.msra.mxu1 %v1200_v33  ;;  %2735 = vmatprep.mubr.msk.bf16.mxu1 %vm3283_vm0, %v3282_v0  ;;  %v2978_v33 = vld [vmem:[#allocation10] sm:$0xff]  }
 0x447   : > { %v998_v37 = vpack.c.bf16 %v994_v36, %v994_v36  ;;  %2745 = vmatprep.subr.bf16.mxu1 %v3282_v0  ;;  %v2979_v36 = vld [vmem:[#allocation9 + $0x8] sm:$0xff]  }
 0x449   : > { %2730 = vmatmul.mubr.msk.bf16.vlgmr.msra.gmra.mxu0 %vm750_vm2, %v998_v37  ;;  %v2980_v37 = vld [vmem:[#allocation9] sm:$0xff]  }
 0x44a   : > { %2740 = vmatpush3.bf16.msra.mxu0 %v1246_v38  ;;  %2741 = vmatprep.mubr.msk.bf16.mxu0 %vm3283_vm0, %v3282_v0 }
 0x44b   : > { %2751 = vmatprep.subr.bf16.mxu0 %v3282_v0 }
 0x492   : > { %v1042_v40 = vpop.f32.mrf.mxu1 }
 0x493   : > { %v1192_v41 = vpack.c.bf16 %v1042_v40, %v1042_v40 }
 0x494   : > { %v2713_v43 = vpop.f32.mrf.mxu1 }
 0x495   : > { %2736 = vmatmul.mubr.msk.bf16.vlgmr.msra.gmra.mxu1 %vm750_vm2, %v1192_v41 }
 0x496   : > { %v1045_v44 = vpop.f32.mrf.mxu1  ;;  %2746 = vmatpush3.bf16.msra.mxu1 %v1292_v42  ;;  %2747 = vmatprep.mubr.msk.bf16.mxu1 %vm3283_vm0, %v3282_v0  ;;  %v2574_v42 = vld [vmem:[%s3888_s5] ss:$0 sm:$0xff] }
 0x497   : > { %2757 = vmatprep.subr.bf16.mxu1 %v3282_v0  ;;  %v2575_v44 = vld [vmem:[%s3889_s6] ss:$0 sm:$0xff] }
 0x498   : > { %v2714_v45 = vpop.f32.mrf.mxu1 }
 0x501   : > { %v1090_v47 = vpop.f32.mrf.mxu0 }
 0x502   : > { %v1193_v48 = vpack.c.bf16 %v1090_v47, %v1090_v47 }
 0x503   : > { %v2719_v50 = vpop.f32.mrf.mxu0 }
 0x504   : > { %2742 = vmatmul.mubr.msk.bf16.vlgmr.msra.gmra.mxu0 %vm750_vm2, %v1193_v48 }
 0x505   : > { %v1093_v51 = vpop.f32.mrf.mxu0  ;;  %v1138_v52 = vpop.f32.mrf.mxu1  ;;  %2752 = vmatpush3.bf16.msra.mxu0 %v1338_v49  ;;  %2753 = vmatprep.mubr.msk.bf16.mxu0 %vm3283_vm0, %v3282_v0 }
 0x506   : > { %v1194_v53 = vpack.c.bf16 %v1138_v52, %v1138_v52  ;;  %2765 = vmatprep.subr.bf16.mxu0 %v3282_v0 }
 0x507   : > { %v2720_v54 = vpop.f32.mrf.mxu0  ;;  %v2725_v55 = vpop.f32.mrf.mxu1 }
 0x508   : > { %2748 = vmatmul.mubr.msk.bf16.vlgmr.msra.gmra.mxu1 %vm750_vm2, %v1194_v53 }
 0x509   : > { %v1141_v56 = vpop.f32.mrf.mxu1  ;;  %v1186_v57 = vpop.f32.mrf.mxu0  ;;  %2761 = vmatprep.mubr.msk.bf16.mxu1 %vm3283_vm0, %v3282_v0  ;;  %2758 = vmatpush3.bf16.msra.mxu1 %v2979_v36 }
 0x50a   : > { %v1195_v58 = vpack.c.bf16 %v1186_v57, %v1186_v57  ;;  %2759 = vmatprep.subr.bf16.mxu1 %v3282_v0 }
 0x50b   : > { %v2726_v59 = vpop.f32.mrf.mxu1  ;;  %v2731_v60 = vpop.f32.mrf.mxu0 }
 0x50c   : > { %2754 = vmatmul.mubr.msk.bf16.vlgmr.msra.gmra.mxu0 %vm750_vm2, %v1195_v58 }
 0x50d   : > { %v1189_v61 = vpop.f32.mrf.mxu0  ;;  %2769 = vmatprep.mubr.msk.bf16.mxu0 %vm3283_vm0, %v3282_v0  ;;  %2766 = vmatpush3.bf16.msra.mxu0 %v2977_v27 }
 0x50e   : > { %2767 = vmatprep.subr.bf16.mxu0 %v3282_v0  ;;  %2760 = vmatpush3.bf16.msra.mxu1 %v2980_v37 }
 0x50f   : > { %v2732_v62 = vpop.f32.mrf.mxu0  ;;  %2773 = vmatprep.subr.bf16.mxu1 %v3282_v0 }
 0x511   : > { %2768 = vmatpush3.bf16.msra.mxu0 %v2978_v33 }
 0x512   : > { %2779 = vmatprep.subr.bf16.mxu0 %v3282_v0 }
 0x555   : > { %v1236_v63 = vpop.f32.mrf.mxu1 }
 0x556   : > { %v1380_v11 = vsel %vm692_vm1, %v1236_v63, 0.0 }
 0x557   : > { %v2737_v1 = vpop.f32.mrf.mxu1 }
 0x559   : > { %v1239_v2 = vpop.f32.mrf.mxu1 }
 0x55b   : > { %v2738_v4 = vpop.f32.mrf.mxu1 }
 0x5c4   : > { %v1282_v5 = vpop.f32.mrf.mxu0 }
 0x5c5   : > { %v1381_v7 = vsel %vm692_vm1, %v1282_v5, 0.0 }
 0x5c6   : > { %v2743_v6 = vpop.f32.mrf.mxu0  ;;  %v1382_v14 = vadd.f32 %v1381_v7, %v1380_v11 }
 0x5c8   : > { %v1285_v8 = vpop.f32.mrf.mxu0  ;;  %v1328_v9 = vpop.f32.mrf.mxu1 }
 0x5c9   : > { %v1383_v12 = vsel %vm692_vm1, %v1328_v9, 0.0  ;;  %v1555_v8 = vld [vmem:[#allocation12] sm:$0xf] }
 0x5ca   : > { %v2744_v15 = vpop.f32.mrf.mxu0  ;;  %v2749_v16 = vpop.f32.mrf.mxu1  ;;  %v1384_v17 = vadd.f32 %v1383_v12, %v1382_v14 }
 0x5cc   : > { %v1331_v18 = vpop.f32.mrf.mxu1  ;;  %v1374_v19 = vpop.f32.mrf.mxu0 }
 0x5cd   : > { %v1385_v13 = vsel %vm692_vm1, %v1374_v19, 0.0 }
 0x5ce   : > { %v1386_v20 = vadd.f32 %v1385_v13, %v1384_v17  ;;  %v2750_v10 = vpop.f32.mrf.mxu1  ;;  %v2755_v21 = vpop.f32.mrf.mxu0 }
 0x5d0   : > { %v1377_v22 = vpop.f32.mrf.mxu0  ;;  %v1387_v24 = vadd.f32 %v1386_v20, %v3544_v3  ;;  %v663_v3 = vld [vmem:[%s659_s0] sm:$0xff]  ;;  %s3939_s0 = sld [smem:[#allocation32_spill]] }
 0x5d1   : > { %v1419_v35 = vpack.c.bf16 %v664_v34, %v663_v3 }
 0x5d2   : > { %v2756_v25 = vpop.f32.mrf.mxu0  ;;  %v1390_v26 = vsel %vm692_vm1, %v1387_v24, 0.0 }
 0x5d3   : > { %1391 = vadd.xlane.f32.xlu1 %v1390_v26  ;;  %2770 = vmatmul.mubr.msk.bf16.vlgmr.msra.gmra.mxu0 %vm692_vm1, %v1419_v35 }
 0x5d4   : > { %2781 = vmatprep.mubr.msk.bf16.mxu0 %vm3283_vm0, %v3282_v0 }
 0x65c   : > { %v1392_v28 = vpop.xlane.xlu1 %1391 }
 0x65d   : > { %v1394_v29 = vmul.f32 0.03125, %v1392_v28 }
 0x65f   : > { %v1395_v30 = vsub.f32 %v1387_v24, %v1394_v29 }
 0x661   : > { %v1396_v31 = vmul.f32 %v1395_v30, %v1395_v30 }
 0x663   : > { %v1397_v32 = vsel %vm692_vm1, %v1396_v31, 0.0 }
 0x664   : > { %1398 = vadd.xlane.f32.xlu0 %v1397_v32 }
 0x693   : > { %v1533_v48 = vpop.f32.mrf.mxu0 }
 0x695   : > { %v2771_v49 = vpop.f32.mrf.mxu0 }
 0x697   : > { %v1536_v50 = vpop.f32.mrf.mxu0 }
 0x698   : > { %v3697_v51 = vpack.c.bf16 %v1536_v50, %v1533_v48 }
 0x699   : > { %v2772_v52 = vpop.f32.mrf.mxu0 }
 0x69a   : > { %1549 = vrot.lane.b32.xlu0 %v3697_v51, %s3285_s4  ;;  %1551 = vrot.lane.b32.xlu1 %v3697_v51, %s3287_s30  ;;  %v1563_v53 = vsel %vm750_vm2, %v3697_v51, 0 }
 0x69e   : > { %1553 = vrot.lane.b32.xlu0 %v3697_v51, %s3284_s19 }
 0x6ed   : > { %v1399_v38 = vpop.xlane.xlu0 %1398 }
 0x6ee   : > { %v1400_v39 = vmul.f32 0.03125, %v1399_v38 }
 0x6f0   : > { %v1401_v40 = vadd.f32 1e-05, %v1400_v39 }
 0x6f2   : > { %3003 = vrsqrt.f32 %v1401_v40 }
 0x6ff   : > { %v3004_v41 = vpop.eup %3003 }
 0x700   : > { %v1403_v43 = vmul.f32 %v3004_v41, %v1395_v30 }
 0x702   : > { %v1410_v45 = vmul.f32 %v2574_v42, %v1403_v43 }
 0x704   : > { %v3690_v46 = vadd.f32 %v2575_v44, %v1410_v45 }
 0x706   : > { %v1418_v47 = vpack.c.bf16 %v3690_v46, %v3690_v46 }
 0x708   : > { %2762 = vmatmul.mubr.msk.bf16.vlgmr.msra.gmra.mxu1 %vm692_vm1, %v1418_v47 }
 0x709   : > { %2775 = vmatprep.mubr.msk.bf16.mxu1 %vm3283_vm0, %v3282_v0  ;;  %2774 = vmatpush3.bf16.xpose.msra.mxu1 %v1563_v53 }
 0x70a   : > { %2785 = vmatprep.subr.bf16.mxu1 %v3282_v0 }
 0x70c   : > { %v3708_v54 = vpop.permute.xlu0 %1549  ;;  %v3713_v56 = vpop.permute.xlu1 %1551 }
 0x70d   : > { %v1609_v55 = vsel %vm750_vm2, %v3708_v54, 0  ;;  %v1655_v60 = vsel %vm750_vm2, %v3713_v56, 0 }
 0x70e   : > { %2780 = vmatpush3.bf16.xpose.msra.mxu0 %v1609_v55 }
 0x70f   : > { %2791 = vmatprep.subr.bf16.mxu0 %v3282_v0 }
 0x710   : > { %v3724_v63 = vpop.permute.xlu0 %1553 }
 0x711   : > { %v1701_v2 = vsel %vm750_vm2, %v3724_v63, 0 }
 0x7c8   : > { %v1473_v57 = vpop.f32.mrf.mxu1 }
 0x7c9   : > { %v1479_v58 = vpack.c.bf16 %v1473_v57, %v1473_v57 }
 0x7ca   : > { %v2763_v59 = vpop.f32.mrf.mxu1 }
 0x7cb   : > { %1546 = vrot.lane.b32.xlu0 %v1479_v58, %s3284_s19  ;;  %1542 = vrot.lane.b32.xlu1 %v1479_v58, %s3285_s4  ;;  %s670_s19 = sld [smem:[#allocation3 + %s3409_s11]]  ;;  %s2406_s4 = scalar_lea.hbm %s3901_s18, %s2609_s29 }
 0x7cc   : > { %2776 = vmatmul.mubr.msk.bf16.vlgmr.msra.gmra.mxu1 %vm750_vm2, %v1479_v58  ;;  %v1476_v61 = vpop.f32.mrf.mxu1  ;;  %s3199_s11 = scalar_lea.vmem %s3198_s20, 256 }
 0x7cd   : > { %2786 = vmatpush3.bf16.xpose.msra.mxu1 %v1655_v60  ;;  %2787 = vmatprep.mubr.msk.bf16.mxu1 %vm3283_vm0, %v3282_v0 }
 0x7ce   : > { %v2764_v62 = vpop.f32.mrf.mxu1  ;;  %2797 = vmatprep.subr.bf16.mxu1 %v3282_v0 }
 0x7cf   : > { %1544 = vrot.lane.b32.xlu1 %v1479_v58, %s3287_s30  ;;  %s3193_s30 = scalar_lea.vmem %s2409_s27, 128 }
 0x7d0   : > { %p3194_p0 = scmp.ne.s32.totalorder %s2409_s27, %s3193_s30  ;;  %p3201_p2 = scmp.lt.s32.totalorder %s3199_s11, %s3193_s30 }
 0x7d1   : > { %v671_v6 = vstv %s670_s19 }
 0x7d2   : > { %vm3740_vm5 = vcmp.lt.s32.totalorder %v3599_v23, %v671_v6  ;;  %p3195_p13 = pnand %p3194_p0, %p3426_p10  ;;  %p3202_p5 = por %p3201_p2, %p3200_p12 }
 0x7d4   : > { %p3196_p4 = pneg %p3195_p13 }
 0x7d6   : > { %p3203_p8 = pnand %p3202_p5, %p3196_p4 }
 0x83d   : > { %v1543_v1 = vpop.permute.xlu1 %1542  ;;  %v1547_v5 = vpop.permute.xlu0 %1546 }
 0x83e   : > { %2782 = vmatmul.mubr.msk.bf16.vlgmr.msra.gmra.mxu0 %vm750_vm2, %v1543_v1 }
 0x83f   : > { %2792 = vmatpush3.bf16.xpose.msra.mxu0 %v1701_v2  ;;  %2793 = vmatprep.mubr.msk.bf16.mxu0 %vm3283_vm0, %v3282_v0 }
 0x840   : > { %2803 = vmatprep.subr.bf16.mxu0 %v3282_v0 }
 0x841   : > { %v1545_v4 = vpop.permute.xlu1 %1544 }
 0x842   : > { %2788 = vmatmul.mubr.msk.bf16.vlgmr.msra.gmra.mxu1 %vm750_vm2, %v1545_v4 }
 0x843   : > { %2799 = vmatprep.mubr.msk.bf16.mxu1 %vm3283_vm0, %v3282_v0 }
 0x846   : > { %2794 = vmatmul.mubr.msk.bf16.vlgmr.msra.gmra.mxu0 %vm750_vm2, %v1547_v5 }
 0x847   : > { %2805 = vmatprep.mubr.msk.bf16.mxu0 %vm3283_vm0, %v3282_v0 }
 0x88c   : > { %v1599_v7 = vpop.f32.mrf.mxu1 }
 0x88d   : > { %v1743_v9 = vmul.f32 0.35355338, %v1599_v7 }
 0x88e   : > { %v2777_v11 = vpop.f32.mrf.mxu1 }
 0x88f   : > { %v1749_v12 = vsel %vm3740_vm5, %v1743_v9, -1000000.0 }
 0x890   : > { %v1602_v14 = vpop.f32.mrf.mxu1  ;;  %v1754_v15 = vsel %vm1753_vm6, %v1749_v12, -inf }
 0x891   : > { %1755 = vmax.xlane.f32.xlu1 %v1754_v15  ;;  %v1994_v14 = vsel %vm1004_vm4, %v1555_v8, 0 }
 0x892   : > { %v2778_v16 = vpop.f32.mrf.mxu1 }
 0x893   : > { %v1556_v16 = vld [vmem:[#allocation12 + $0x4] sm:$0xf] }
 0x8fe   : > { %v1645_v17 = vpop.f32.mrf.mxu0 }
 0x8ff   : > { %v1744_v18 = vmul.f32 0.35355338, %v1645_v17 }
 0x900   : > { %v2783_v19 = vpop.f32.mrf.mxu0 }
 0x901   : > { %v1750_v23 = vsel %vm3740_vm5, %v1744_v18, -1000000.0  ;;  %v2040_v19 = vsel %vm1004_vm4, %v1556_v16, 0 }
 0x902   : > { %v1648_v13 = vpop.f32.mrf.mxu0  ;;  %v1691_v20 = vpop.f32.mrf.mxu1  ;;  %v1757_v10 = vsel %vm1753_vm6, %v1750_v23, -inf }
 0x903   : > { %v1745_v21 = vmul.f32 0.35355338, %v1691_v20  ;;  %1758 = vmax.xlane.f32.xlu0 %v1757_v10 }
 0x904   : > { %v2784_v22 = vpop.f32.mrf.mxu0  ;;  %v2789_v24 = vpop.f32.mrf.mxu1 }
 0x905   : > { %v1751_v25 = vsel %vm3740_vm5, %v1745_v21, -1000000.0 }
 0x906   : > { %v1694_v26 = vpop.f32.mrf.mxu1  ;;  %v1737_v27 = vpop.f32.mrf.mxu0  ;;  %v1760_v28 = vsel %vm1753_vm6, %v1751_v25, -inf }
 0x907   : > { %v1746_v29 = vmul.f32 0.35355338, %v1737_v27  ;;  %1761 = vmax.xlane.f32.xlu0 %v1760_v28 }
 0x908   : > { %v2790_v30 = vpop.f32.mrf.mxu1  ;;  %v2795_v31 = vpop.f32.mrf.mxu0 }
 0x909   : > { %v1752_v32 = vsel %vm3740_vm5, %v1746_v29, -1000000.0 }
 0x90a   : > { %v1740_v33 = vpop.f32.mrf.mxu0  ;;  %v1763_v3 = vsel %vm1753_vm6, %v1752_v32, -inf }
 0x90b   : > { %1764 = vmax.xlane.f32.xlu1 %v1763_v3 }
 0x90c   : > { %v2796_v34 = vpop.f32.mrf.mxu0 }
 0x91a   : > { %v1756_v35 = vpop.xlane.xlu1 %1755 }
 0x91b   : > { %v1766_v36 = vsub.f32 %v1749_v12, %v1756_v35 }
 0x91c   : > { %1848 = vrot.lane.b32.xlu1 %v3708_v54, %s3286_s21 }
 0x91d   : > { %v1770_v37 = vmul.f32 1.442695, %v1766_v36 }
 0x91f   : > { %3005 = vpow2.f32 %v1770_v37 }
 0x92c   : > { %v3006_v38 = vpop.eup %3005 }
 0x92d   : > { %v1778_v39 = vsel %vm1753_vm6, %v3006_v38, 0.0 }
 0x92e   : > { %1779 = vadd.xlane.f32.xlu0 %v1778_v39 }
 0x944   : > { %1802 = vrot.lane.b32.xlu0 %v3697_v51, %s3286_s21 }
 0x98c   : > { %v1759_v40 = vpop.xlane.xlu0 %1758 }
 0x98d   : > { %v1767_v41 = vsub.f32 %v1750_v23, %v1759_v40  ;;  %v1557_v23 = vld [vmem:[#allocation12 + $0x8] sm:$0xf] }
 0x98e   : > { %v2086_v10 = vsel %vm1004_vm4, %v1557_v23, 0 }
 0x98f   : > { %v1772_v42 = vmul.f32 1.442695, %v1767_v41 }
 0x990   : > { %v1762_v43 = vpop.xlane.xlu0 %1761 }
 0x991   : > { %3007 = vpow2.f32 %v1772_v42  ;;  %v1768_v44 = vsub.f32 %v1751_v25, %v1762_v43  ;;  %v1558_v25 = vld [vmem:[#allocation12 + $0xc] sm:$0xf] }
 0x992   : > { %v2132_v28 = vsel %vm1004_vm4, %v1558_v25, 0  ;;  %v2596_v25 = vld [vmem:[%s3896_s13] ss:$0 sm:$0xff] }
 0x993   : > { %v1774_v45 = vmul.f32 1.442695, %v1768_v44 }
 0x994   : > { %v1765_v47 = vpop.xlane.xlu1 %1764 }
 0x995   : > { %3009 = vpow2.f32 %v1774_v45  ;;  %v1769_v48 = vsub.f32 %v1752_v32, %v1765_v47 }
 0x997   : > { %v1776_v49 = vmul.f32 1.442695, %v1769_v48 }
 0x998   : > { %v1849_v50 = vpop.permute.xlu1 %1848 }
 0x999   : > { %3011 = vpow2.f32 %v1776_v49  ;;  %2804 = vmatpush3.bf16.msra.mxu0 %v1849_v50 }
 0x99a   : > { %2815 = vmatprep.subr.bf16.mxu0 %v3282_v0 }
 0x99e   : > { %v3008_v52 = vpop.eup %3007 }
 0x99f   : > { %v1781_v53 = vsel %vm1753_vm6, %v3008_v52, 0.0 }
 0x9a0   : > { %1782 = vadd.xlane.f32.xlu1 %v1781_v53 }
 0x9a2   : > { %v3010_v51 = vpop.eup %3009 }
 0x9a3   : > { %v1784_v54 = vsel %vm1753_vm6, %v3010_v51, 0.0 }
 0x9a4   : > { %1785 = vadd.xlane.f32.xlu0 %v1784_v54 }
 0x9a6   : > { %v3012_v55 = vpop.eup %3011 }
 0x9a7   : > { %v1787_v57 = vsel %vm1753_vm6, %v3012_v55, 0.0 }
 0x9a8   : > { %1788 = vadd.xlane.f32.xlu1 %v1787_v57 }
 0x9b7   : > { %v1780_v58 = vpop.xlane.xlu0 %1779 }
 0x9b8   : > { %3013 = vrcp.f32 %v1780_v58 }
 0x9b9   : > { %1894 = vrot.lane.b32.xlu1 %v3713_v56, %s3286_s21 }
 0x9ba   : > { %1940 = vrot.lane.b32.xlu0 %v3724_v63, %s3286_s21  ;;  %s2395_s21 = scalar_lea.sflag [#allocation6], %s648_s24 }
 0x9bb   : > { %v1803_v59 = vpop.permute.xlu0 %1802 }
 0x9bc   : > { %2798 = vmatpush3.bf16.msra.mxu1 %v1803_v59 }
 0x9bd   : > { %2809 = vmatprep.subr.bf16.mxu1 %v3282_v0 }
 0x9c5   : > { %v3014_v60 = vpop.eup %3013 }
 0x9c6   : > { %v1794_v61 = vmul.f32 %v3014_v60, %v3006_v38 }
 0x9c8   : > { %v1798_v62 = vpack.c.bf16 %v1794_v61, %v1794_v61 }
 0x9ca   : > { %2800 = vmatmul.mubr.msk.bf16.vlgmr.msra.gmra.mxu1 %vm1753_vm6, %v1798_v62 }
 0x9cb   : > { %2811 = vmatprep.mubr.msk.bf16.mxu1 %vm3283_vm0, %v3282_v0 }
 0xa29   : > { %v1783_v1 = vpop.xlane.xlu1 %1782 }
 0xa2a   : > { %3015 = vrcp.f32 %v1783_v1 }
 0xa2d   : > { %v1786_v2 = vpop.xlane.xlu0 %1785 }
 0xa2e   : > { %3017 = vrcp.f32 %v1786_v2 }
 0xa31   : > { %v1789_v56 = vpop.xlane.xlu1 %1788  ;;  %v1941_v9 = vpop.permute.xlu0 %1940 }
 0xa32   : > { %3019 = vrcp.f32 %v1789_v56 }
 0xa35   : > { %v1895_v4 = vpop.permute.xlu1 %1894 }
 0xa36   : > { %2810 = vmatpush3.bf16.msra.mxu1 %v1895_v4 }
 0xa37   : > { %v3016_v63 = vpop.eup %3015  ;;  %2821 = vmatprep.subr.bf16.mxu1 %v3282_v0 }
 0xa38   : > { %v1795_v5 = vmul.f32 %v3016_v63, %v3008_v52 }
 0xa3a   : > { %v1799_v6 = vpack.c.bf16 %v1795_v5, %v1795_v5 }
 0xa3b   : > { %v3018_v7 = vpop.eup %3017 }
 0xa3c   : > { %2806 = vmatmul.mubr.msk.bf16.vlgmr.msra.gmra.mxu0 %vm1753_vm6, %v1799_v6  ;;  %v1796_v11 = vmul.f32 %v3018_v7, %v3010_v51 }
 0xa3d   : > { %2816 = vmatpush3.bf16.msra.mxu0 %v1941_v9  ;;  %2817 = vmatprep.mubr.msk.bf16.mxu0 %vm3283_vm0, %v3282_v0 }
 0xa3e   : > { %v1800_v12 = vpack.c.bf16 %v1796_v11, %v1796_v11  ;;  %2827 = vmatprep.subr.bf16.mxu0 %v3282_v0  ;;  %v2981_v11 = vld [vmem:[#allocation13 + $0x8] sm:$0xff]  }
 0xa3f   : > { %v3020_v15 = vpop.eup %3019 }
 0xa40   : > { %2812 = vmatmul.mubr.msk.bf16.vlgmr.msra.gmra.mxu1 %vm1753_vm6, %v1800_v12  ;;  %v1797_v17 = vmul.f32 %v3020_v15, %v3012_v55  ;;  %v2982_v12 = vld [vmem:[#allocation13] sm:$0xff]  }
 0xa41   : > { %2822 = vmatpush3.bf16.msra.mxu1 %v1994_v14  ;;  %2823 = vmatprep.mubr.msk.bf16.mxu1 %vm3283_vm0, %v3282_v0  ;;  %v2984_v14 = vld [vmem:[%s3897_s14 + $0x10] sm:$0xff]  }
 0xa42   : > { %v1801_v18 = vpack.c.bf16 %v1797_v17, %v1797_v17  ;;  %2833 = vmatprep.subr.bf16.mxu1 %v3282_v0 }
 0xa44   : > { %2818 = vmatmul.mubr.msk.bf16.vlgmr.msra.gmra.mxu0 %vm1753_vm6, %v1801_v18 }
 0xa45   : > { %2828 = vmatpush3.bf16.msra.mxu0 %v2040_v19  ;;  %2829 = vmatprep.mubr.msk.bf16.mxu0 %vm3283_vm0, %v3282_v0  ;;  %v2594_v19 = vld [vmem:[%s3893_s10] ss:$0 sm:$0xff] }
 0xa46   : > { %2839 = vmatprep.subr.bf16.mxu0 %v3282_v0 }
 0xa8a   : > { %v1842_v13 = vpop.f32.mrf.mxu1 }
 0xa8b   : > { %v1986_v20 = vpack.c.bf16 %v1842_v13, %v1842_v13  ;;  %v2595_v13 = vld [vmem:[%s3939_s0] ss:$0 sm:$0xff] }
 0xa8c   : > { %v2801_v21 = vpop.f32.mrf.mxu1 }
 0xa8d   : > { %2824 = vmatmul.mubr.msk.bf16.vlgmr.msra.gmra.mxu1 %vm750_vm2, %v1986_v20 }
 0xa8e   : > { %v1845_v22 = vpop.f32.mrf.mxu1  ;;  %2834 = vmatpush3.bf16.msra.mxu1 %v2086_v10  ;;  %2835 = vmatprep.mubr.msk.bf16.mxu1 %vm3283_vm0, %v3282_v0 }
 0xa8f   : > { %2845 = vmatprep.subr.bf16.mxu1 %v3282_v0  ;;  %v2985_v22 = vld [vmem:[%s3897_s14 + $0x8] sm:$0xff]  }
 0xa90   : > { %v2802_v24 = vpop.f32.mrf.mxu1 }
 0xa91   : > { %v2986_v24 = vld [vmem:[%s3897_s14] sm:$0xff]  }
 0xafc   : > { %v1888_v26 = vpop.f32.mrf.mxu0 }
 0xafd   : > { %v1987_v27 = vpack.c.bf16 %v1888_v26, %v1888_v26 }
 0xafe   : > { %v2807_v29 = vpop.f32.mrf.mxu0 }
 0xaff   : > { %2830 = vmatmul.mubr.msk.bf16.vlgmr.msra.gmra.mxu0 %vm750_vm2, %v1987_v27 }
 0xb00   : > { %v1891_v30 = vpop.f32.mrf.mxu0  ;;  %v1934_v31 = vpop.f32.mrf.mxu1  ;;  %2840 = vmatpush3.bf16.msra.mxu0 %v2132_v28  ;;  %2841 = vmatprep.mubr.msk.bf16.mxu0 %vm3283_vm0, %v3282_v0 }
 0xb01   : > { %v1988_v32 = vpack.c.bf16 %v1934_v31, %v1934_v31  ;;  %2853 = vmatprep.subr.bf16.mxu0 %v3282_v0 }
 0xb02   : > { %v2808_v33 = vpop.f32.mrf.mxu0  ;;  %v2813_v3 = vpop.f32.mrf.mxu1 }
 0xb03   : > { %2836 = vmatmul.mubr.msk.bf16.vlgmr.msra.gmra.mxu1 %vm750_vm2, %v1988_v32 }
 0xb04   : > { %v1937_v34 = vpop.f32.mrf.mxu1  ;;  %v1980_v35 = vpop.f32.mrf.mxu0  ;;  %2849 = vmatprep.mubr.msk.bf16.mxu1 %vm3283_vm0, %v3282_v0  ;;  %2846 = vmatpush3.bf16.msra.mxu1 %v2981_v11 }
 0xb05   : > { %v1989_v36 = vpack.c.bf16 %v1980_v35, %v1980_v35  ;;  %2847 = vmatprep.subr.bf16.mxu1 %v3282_v0 }
 0xb06   : > { %v2814_v37 = vpop.f32.mrf.mxu1  ;;  %v2819_v38 = vpop.f32.mrf.mxu0 }
 0xb07   : > { %2842 = vmatmul.mubr.msk.bf16.vlgmr.msra.gmra.mxu0 %vm750_vm2, %v1989_v36 }
 0xb08   : > { %v1983_v39 = vpop.f32.mrf.mxu0  ;;  %2861 = vmatprep.mubr.msk.bf16.mxu0 %vm3283_vm0, %v3282_v0  ;;  %2848 = vmatpush3.bf16.msra.mxu1 %v2982_v12 }
 0xb0a   : > { %v2820_v40 = vpop.f32.mrf.mxu0 }
 0xb4d   : > { %v2030_v41 = vpop.f32.mrf.mxu1 }
 0xb4e   : > { %v2174_v52 = vsel %vm692_vm1, %v2030_v41, 0.0 }
 0xb4f   : > { %v2825_v42 = vpop.f32.mrf.mxu1 }
 0xb51   : > { %v2033_v43 = vpop.f32.mrf.mxu1 }
 0xb53   : > { %v2826_v44 = vpop.f32.mrf.mxu1 }
 0xbbf   : > { %v2076_v45 = vpop.f32.mrf.mxu0 }
 0xbc0   : > { %v2175_v48 = vsel %vm692_vm1, %v2076_v45, 0.0 }
 0xbc1   : > { %v2831_v47 = vpop.f32.mrf.mxu0  ;;  %v2176_v51 = vadd.f32 %v2175_v48, %v2174_v52  ;;  %v2607_v52 = vld [vmem:[%s3900_s17] ss:$0 sm:$0xff] }
 0xbc3   : > { %v2079_v49 = vpop.f32.mrf.mxu0  ;;  %v2122_v50 = vpop.f32.mrf.mxu1 }
 0xbc4   : > { %v2177_v53 = vsel %vm692_vm1, %v2122_v50, 0.0  ;;  %v2606_v49 = vld [vmem:[%s3899_s16] ss:$0 sm:$0xff] }
 0xbc5   : > { %v2832_v54 = vpop.f32.mrf.mxu0  ;;  %v2837_v55 = vpop.f32.mrf.mxu1  ;;  %v2178_v57 = vadd.f32 %v2177_v53, %v2176_v51 }
 0xbc7   : > { %v2125_v58 = vpop.f32.mrf.mxu1  ;;  %v2168_v59 = vpop.f32.mrf.mxu0 }
 0xbc8   : > { %v2179_v60 = vsel %vm692_vm1, %v2168_v59, 0.0 }
 0xbc9   : > { %v2180_v61 = vadd.f32 %v2179_v60, %v2178_v57  ;;  %v2838_v62 = vpop.f32.mrf.mxu1  ;;  %v2843_v1 = vpop.f32.mrf.mxu0 }
 0xbcb   : > { %v2171_v2 = vpop.f32.mrf.mxu0  ;;  %v2181_v56 = vadd.f32 %v2180_v61, %v3690_v46  ;;  %v2983_v46 = vld [vmem:[%s3897_s14 + $0x18] sm:$0xff]  }
 0xbcc   : > { %2854 = vmatpush3.bf16.msra.mxu0 %v2983_v46 }
 0xbcd   : > { %v2844_v4 = vpop.f32.mrf.mxu0  ;;  %v2184_v63 = vsel %vm692_vm1, %v2181_v56, 0.0  ;;  %2855 = vmatprep.subr.bf16.mxu0 %v3282_v0 }
 0xbce   : > { %2185 = vadd.xlane.f32.xlu1 %v2184_v63 }
 0xbd0   : > { %2856 = vmatpush3.bf16.msra.mxu0 %v2984_v14 }
 0xbd1   : > { %2857 = vmatprep.subr.bf16.mxu0 %v3282_v0 }
 0xbd4   : > { %2858 = vmatpush3.bf16.msra.mxu0 %v2985_v22 }
 0xbd5   : > { %2859 = vmatprep.subr.bf16.mxu0 %v3282_v0  ;;  %v2600_v0 = vld [vmem:[%s3898_s15] ss:$0 sm:$0xff] }
 0xbd8   : > { %2860 = vmatpush3.bf16.msra.mxu0 %v2986_v24 }
 0xc57   : > { %v2186_v5 = vpop.xlane.xlu1 %2185 }
 0xc58   : > { %v2187_v6 = vmul.f32 0.03125, %v2186_v5 }
 0xc5a   : > { %v2188_v7 = vsub.f32 %v2181_v56, %v2187_v6 }
 0xc5c   : > { %v2189_v8 = vmul.f32 %v2188_v7, %v2188_v7 }
 0xc5e   : > { %v2190_v9 = vsel %vm692_vm1, %v2189_v8, 0.0 }
 0xc5f   : > { %2191 = vadd.xlane.f32.xlu0 %v2190_v9 }
 0xce8   : > { %v2192_v15 = vpop.xlane.xlu0 %2191 }
 0xce9   : > { %v2193_v16 = vmul.f32 0.03125, %v2192_v15 }
 0xceb   : > { %v2194_v17 = vadd.f32 1e-05, %v2193_v16 }
 0xced   : > { %3021 = vrsqrt.f32 %v2194_v17 }
 0xcfa   : > { %v3022_v18 = vpop.eup %3021 }
 0xcfb   : > { %v2196_v23 = vmul.f32 %v3022_v18, %v2188_v7 }
 0xcfd   : > { %v2203_v20 = vmul.f32 %v2594_v19, %v2196_v23 }
 0xcff   : > { %v2210_v10 = vadd.f32 %v2595_v13, %v2203_v20 }
 0xd01   : > { %v2211_v21 = vpack.c.bf16 %v2210_v10, %v2210_v10 }
 0xd03   : > { %2850 = vmatmul.mubr.msk.bf16.vlgmr.msra.gmra.mxu1 %vm692_vm1, %v2211_v21 }
 0xdc3   : > { %v2272_v26 = vpop.f32.mrf.mxu1 }
 0xdc4   : > { %v2273_v27 = vadd.f32 %v2596_v25, %v2272_v26 }
 0xdc5   : > { %v2851_v28 = vpop.f32.mrf.mxu1 }
 0xdc6   : > { %v2278_v29 = vmax.f32 %v2273_v27, 0.0 }
 0xdc7   : > { %v2275_v30 = vpop.f32.mrf.mxu1 }
 0xdc8   : > { %v2279_v31 = vpack.c.bf16 %v2278_v29, %v2278_v29 }
 0xdc9   : > { %v2852_v32 = vpop.f32.mrf.mxu1 }
 0xdca   : > { %2862 = vmatmul.mubr.msk.bf16.vlgmr.msra.gmra.mxu0 %vm2319_vm7, %v2279_v31 }
 0xe8a   : > { %v2357_v33 = vpop.f32.mrf.mxu0 }
 0xe8b   : > { %v2358_v3 = vadd.f32 %v2600_v0, %v2357_v33 }
 0xe8c   : > { %v2863_v34 = vpop.f32.mrf.mxu0 }
 0xe8d   : > { %v2363_v35 = vadd.f32 %v2358_v3, %v2210_v10 }
 0xe8e   : > { %v2360_v36 = vpop.f32.mrf.mxu0 }
 0xe8f   : > { %v2366_v37 = vsel %vm692_vm1, %v2363_v35, 0.0 }
 0xe90   : > { %2367 = vadd.xlane.f32.xlu0 %v2366_v37  ;;  %v2864_v38 = vpop.f32.mrf.mxu0 }
 0xf19   : > { %v2368_v39 = vpop.xlane.xlu0 %2367 }
 0xf1a   : > { %v2369_v40 = vmul.f32 0.03125, %v2368_v39 }
 0xf1c   : > { %v2370_v41 = vsub.f32 %v2363_v35, %v2369_v40 }
 0xf1e   : > { %v2371_v42 = vmul.f32 %v2370_v41, %v2370_v41 }
 0xf20   : > { %v2372_v43 = vsel %vm692_vm1, %v2371_v42, 0.0 }
 0xf21   : > { %2373 = vadd.xlane.f32.xlu1 %v2372_v43 }
 0xfaa   : > { %v2374_v44 = vpop.xlane.xlu1 %2373 }
 0xfab   : > { %v2375_v45 = vmul.f32 0.03125, %v2374_v44 }
 0xfad   : > { %v2376_v47 = vadd.f32 1e-05, %v2375_v45 }
 0xfaf   : > { %3023 = vrsqrt.f32 %v2376_v47 }
 0xfbc   : > { %v3024_v48 = vpop.eup %3023 }
 0xfbd   : > { %v2378_v50 = vmul.f32 %v3024_v48, %v2370_v41 }
 0xfbf   : > { %v2385_v53 = vmul.f32 %v2606_v49, %v2378_v50 }
 0xfc1   : > { %v2392_v51 = vadd.f32 %v2607_v52, %v2385_v53 }
 0xfc3   : > { %2393 = vst.msk [vmem:[%s650_s22] sm:$0xff] %vm692_vm1, %v2392_v51 }
 0xfc4   : > { %3206 = shalt.err (!%p3203_p8)
}
 0xfc5   : > { %s3207_s25 = scalar_lea.hbm %s2406_s4, 128  ;;  %s3211_s0 = scalar_lea.hbm %s3901_s18, 256 }
 0xfc6   : > { %p3208_p3 = scmp.ne.s32.totalorder %s2406_s4, %s3207_s25  ;;  %p3212_p7 = scmp.lt.s32.totalorder %s2406_s4, %s3901_s18 }
 0xfc7   : > { %p3213_p9 = scmp.lt.s32.totalorder %s3211_s0, %s3207_s25 }
 0xfc8   : > { %p3209_p1 = pnand %p3208_p3, %p3426_p10 }
 0xfc9   : > { %p3214_p0 = por %p3213_p9, %p3212_p7 }
 0xfca   : > { %p3210_p6 = pneg %p3209_p1 }
 0xfcc   : > { %p3215_p13 = pnand %p3214_p0, %p3210_p6 }
 0xfce   : > { %3218 = shalt.err (!%p3215_p13)
}
 0xfcf   : > { %2889 = dma.vmem_to_hbm [thread:$0]  (%p3426_p10), %s2409_s27, 128, %s2406_s4, %s2395_s21  }
 0xfd0 PF: > { %s3940_s23 = sld [smem:[#allocation24_spill]] }
 0xfd1   : > { %s3941_s19 = sld [smem:[#allocation22_spill]] }
 0xfd6   : > { %p2926_p4 = scmp.ge.s32.totalorder %s3940_s23, 2 }
 0xfd7   : > { %s2420_s2 = sand.u32 1, %s3941_s19  }
 0xfd8   : > { %p2911_p12 = pnand %p2926_p4, %p3430_p11  ;;  %s2421_s20 = scalar_lea.sflag [#allocation6], %s2420_s2 }
 0xfda   : > { %p2912_p2 = pneg %p2911_p12 }
 0xfdc   : > { %3254 = dma.done.wait (%p2912_p2), %s2421_s20, 128  }
 0xfdd   : > { %3256 = vsyncadd (%p2912_p2), %s2421_s20, 4294967168  ;;  %s3943_s21 = sld [smem:[#allocation25_spill]]  ;;  %s3946_s19 = smov %s3263_s1 }
 0xfde   : > { %s3944_s11 = sld [smem:[#allocation23_spill]] }
 0xfdf   : > { %s3945_s20 = sld [smem:[#allocation26_spill]] }
 0xfe3   : > { %p38_p5 = scmp.ge.s32.totalorder %s3943_s21, 4  }
 0xfe4   : > { %s3947_s1 = smov %s3944_s11 }
 0xfe5   :  { %40 = sbr.rel (!%p38_p5) target bundleno = 33 (0x21), region = 151 }
 0xfea   :  { %2426 = vsyncpa [#allocation5], 1 }
 0xfeb   :  { %2428 = vsyncpa [#allocation5 + $0x1], 1 }
 0xfec   :  { %2429 = vsyncpa [#allocation8], 1 }
 0xfed   :  { %2430 = vsyncpa [#allocation11], 1 }
 0xfee   :  { %2431 = vsyncpa [#allocation14], 1 }
 0xfef   :  { %2432 = vsyncpa [#allocation6], 1 }
 0xff0   :  { %2434 = vsyncpa [#allocation6 + $0x1], 1 }

</bundles_post_ra>
